<compile_context>
chip_gen: v5e
topology: v5e:2x2
jax: 0.10.0
libtpu: 0.0.40
codegen_flags: <defaults>
</compile_context>

<pallas_src>
import functools
from typing import NamedTuple

import jax
import jax.numpy as jnp
from jax.experimental import pallas as pl
from jax.experimental.pallas import tpu as pltpu

_VMEM_LIMIT = 32 * 1024 * 1024  # fits v5e/v6e/v7x scoped VMEM comfortably


# ----------------------------------------------------------------------------
# Flattened / padded spatial layout helpers
# ----------------------------------------------------------------------------
def _round_up(x, m):
    return ((x + m - 1) // m) * m


def _cdiv(a, b):
    return (a + b - 1) // b


class FlatGrid(NamedTuple):
    h: int
    w: int
    hp: int        # H + 2
    wp: int        # W + 2
    npix: int      # Hp * Wp (padded-grid pixel count)
    tn: int        # lane tile size (multiple of 128)
    hpad: int      # halo held on each side of the conv DMA window (mult. of 128)
    nvb: int       # number of valid column tiles == conv grid length
    nf: int        # total flat length incl. guard tiles
    border: jax.Array  # (1, nf) f32, 1.0 on the valid HxW interior, else 0.0


def make_grid(h, w, tn_max=4096):
    hp, wp = h + 2, w + 2
    npix = hp * wp
    halo = wp + 1                              # max |flat offset| of a 3x3 tap
    hpad = _round_up(halo, 128)
    tn = min(tn_max, max(hpad, _round_up(_cdiv(npix, 8), 128)))
    tn = max(tn, hpad)                          # DMA window start must be >= 0
    nvb = _cdiv(npix, tn)
    nf = (nvb + 2) * tn                         # 1 guard tile left, >=1 right
    interior = jnp.zeros((hp, wp), jnp.float32).at[1:h + 1, 1:w + 1].set(1.0)
    border = jnp.pad(interior.reshape(1, npix), ((0, 0), (tn, nf - tn - npix)))
    return FlatGrid(h, w, hp, wp, npix, tn, hpad, nvb, nf, border)


def chw_to_flat(x, g):
    """(C, H, W) -> (C, Nf) flattened padded layout (zero border + guards)."""
    c = x.shape[0]
    xp = jnp.pad(x, ((0, 0), (1, 1), (1, 1)))
    xf = xp.reshape(c, g.npix)
    return jnp.pad(xf, ((0, 0), (g.tn, g.nf - g.tn - g.npix)))


def flat_to_chw(xf, g):
    """(C, Nf) flattened padded layout -> (C, H, W) valid interior."""
    c = xf.shape[0]
    xp = xf[:, g.tn:g.tn + g.npix].reshape(c, g.hp, g.wp)
    return xp[:, 1:g.h + 1, 1:g.w + 1]


# ----------------------------------------------------------------------------
# Pallas kernels
# ----------------------------------------------------------------------------
def _masked_sum_kernel(img_ref, mask_ref, sum_ref, cnt_ref):
    """Lane-dense masked per-channel sums, accumulated across the grid."""
    @pl.when(pl.program_id(0) == 0)
    def _():
        sum_ref[...] = jnp.zeros_like(sum_ref)
        cnt_ref[...] = jnp.zeros_like(cnt_ref)

    img = img_ref[...]                                   # (C, TN)
    m = mask_ref[...]                                    # (1, TN)
    sum_ref[...] += jnp.sum(img * m, axis=1, keepdims=True)
    cnt_ref[...] += jnp.sum(m, axis=1, keepdims=True)


def _package_kernel(a_ref, t_ref, ma_ref, mt_ref, brd_ref, mua_ref, mut_ref,
                    pkg_ref, pair_ref, cro_ref):
    """Fused Referencer: color-inverse refs + package assembly, lane-dense."""
    a = a_ref[...]                                       # (3, TN)
    t = t_ref[...]
    ma = ma_ref[...]                                     # (1, TN)
    mt = mt_ref[...]
    brd = brd_ref[...]                                   # (1, TN)
    mu_a = mua_ref[...]                                  # (3, 1)
    mu_t = mut_ref[...]

    inv_a2t = (a - mu_a + mu_t) * brd                    # recolor A -> T stats
    inv_t2a = (t - mu_t + mu_a) * brd                    # recolor T -> A stats
    cro_a2t = inv_a2t * mt
    cro_t2a = inv_t2a * ma

    pkg_ref[0:3, :] = a
    pkg_ref[3:6, :] = t
    pkg_ref[6:9, :] = inv_a2t
    pkg_ref[9:12, :] = inv_t2a
    pkg_ref[12:13, :] = ma
    pkg_ref[13:14, :] = mt

    pair_ref[0:3, :] = inv_a2t
    pair_ref[3:6, :] = inv_t2a
    cro_ref[0:3, :] = cro_a2t
    cro_ref[3:6, :] = cro_t2a


def _conv3x3_kernel(x_hbm, w_ref, b_ref, m_ref, *args,
                    cout, tn, hpad, wp, act, res_mode):
    """Fused 3x3 conv over the flattened-padded layout.

    out tile (Cout, TN) = sum over 9 taps of (Cout,Cin) @ shifted (Cin,TN),
    then bias + optional residual + activation + border masking.
    """
    if res_mode is None:
        o_ref, xbuf, sem = args
        res_ref = None
    else:
        res_ref, o_ref, xbuf, sem = args

    jt = pl.program_id(0)
    # Haloed window of the flattened activation, fetched straight from HBM.
    start = pl.multiple_of((jt + 1) * tn - hpad, 128)
    cp = pltpu.make_async_copy(x_hbm.at[:, pl.ds(start, tn + 2 * hpad)],
                               xbuf, sem)
    cp.start()
    cp.wait()

    acc = jnp.zeros((cout, tn), jnp.float32)
    k = 0
    for dy in range(3):
        for dx in range(3):
            off = (dy - 1) * wp + (dx - 1)               # flat shift of this tap
            slab = xbuf[:, hpad + off:hpad + off + tn].astype(jnp.bfloat16)
            acc = acc + jnp.dot(w_ref[k], slab,
                                preferred_element_type=jnp.float32)
            k += 1

    acc = acc + b_ref[...]
    if res_mode == "add_before_act":
        acc = acc + res_ref[...].astype(jnp.float32)
    if act == "relu":
        acc = jnp.maximum(acc, 0.0)
    elif act == "tanh":
        acc = jnp.tanh(acc)
    if res_mode == "add_after_act":
        acc = acc + res_ref[...].astype(jnp.float32)
    # Zero the padded-grid border (select, so garbage/NaN in guards never leaks).
    acc = jnp.where(m_ref[...] > 0.5, acc, 0.0)
    o_ref[...] = acc.astype(o_ref.dtype)


# ----------------------------------------------------------------------------
# Pallas wrappers
# ----------------------------------------------------------------------------
def masked_sum(img, mask, g):
    """img (C, Nf), mask (1, Nf) -> (per-channel masked sum (C,1), count (1,1))."""
    c = img.shape[0]
    nblk = g.nf // g.tn
    return pl.pallas_call(
        _masked_sum_kernel,
        out_shape=(jax.ShapeDtypeStruct((c, 1), jnp.float32),
                   jax.ShapeDtypeStruct((1, 1), jnp.float32)),
        grid=(nblk,),
        in_specs=[pl.BlockSpec((c, g.tn), lambda j: (0, j)),
                  pl.BlockSpec((1, g.tn), lambda j: (0, j))],
        out_specs=(pl.BlockSpec((c, 1), lambda j: (0, 0)),
                   pl.BlockSpec((1, 1), lambda j: (0, 0))),
        compiler_params=pltpu.CompilerParams(
            dimension_semantics=("arbitrary",),
            vmem_limit_bytes=_VMEM_LIMIT),
    )(img, mask)


def build_packages(a, t, ma, mt, mu_a, mu_t, g):
    """Returns (packages (14,Nf), color_inv_pair (6,Nf), color_inv_pair_cro (6,Nf))."""
    tn = g.tn

    def blk(c):
        return pl.BlockSpec((c, tn), lambda j: (0, j + 1))

    full31 = pl.BlockSpec((3, 1), lambda j: (0, 0))
    return pl.pallas_call(
        _package_kernel,
        out_shape=(jax.ShapeDtypeStruct((14, g.nf), jnp.float32),
                   jax.ShapeDtypeStruct((6, g.nf), jnp.float32),
                   jax.ShapeDtypeStruct((6, g.nf), jnp.float32)),
        grid=(g.nvb,),
        in_specs=[blk(3), blk(3), blk(1), blk(1), blk(1), full31, full31],
        out_specs=(blk(14), blk(6), blk(6)),
        compiler_params=pltpu.CompilerParams(
            dimension_semantics=("parallel",),
            vmem_limit_bytes=_VMEM_LIMIT),
    )(a, t, ma, mt, g.border, mu_a, mu_t)


def conv3x3_flat(xf, w, b, g, *, act="none", residual=None, res_mode=None,
                 out_dtype=jnp.bfloat16):
    """3x3 'same' conv in the flattened-padded layout.

    xf: (Cin, Nf)   w: (3, 3, Cin, Cout)   b: (Cout,)
    residual (optional): (Cout, Nf), combined per res_mode
      ("add_before_act": act(conv + res), "add_after_act": act(conv) + res).
    """
    cin = xf.shape[0]
    cout = w.shape[-1]
    tn, hpad, wp = g.tn, g.hpad, g.wp
    tnh = tn + 2 * hpad

    w9 = jnp.transpose(w.reshape(9, cin, cout), (0, 2, 1)).astype(jnp.bfloat16)
    b2 = b.reshape(cout, 1).astype(jnp.float32)

    kernel = functools.partial(_conv3x3_kernel, cout=cout, tn=tn, hpad=hpad,
                               wp=wp, act=act, res_mode=res_mode)

    in_specs = [
        pl.BlockSpec(memory_space=pl.ANY),                    # x stays in HBM
        pl.BlockSpec((9, cout, cin), lambda j: (0, 0, 0)),    # weights (resident)
        pl.BlockSpec((cout, 1), lambda j: (0, 0)),            # bias (resident)
        pl.BlockSpec((1, tn), lambda j: (0, j + 1)),          # border mask tile
    ]
    args = [xf, w9, b2, g.border]
    if res_mode is not None:
        in_specs.append(pl.BlockSpec((cout, tn), lambda j: (0, j + 1)))
        args.append(residual)

    return pl.pallas_call(
        kernel,
        out_shape=jax.ShapeDtypeStruct((cout, g.nf), out_dtype),
        grid=(g.nvb,),
        in_specs=in_specs,
        out_specs=pl.BlockSpec((cout, tn), lambda j: (0, j + 1)),
        scratch_shapes=[pltpu.VMEM((cin, tnh), xf.dtype),
                        pltpu.SemaphoreType.DMA],
        compiler_params=pltpu.CompilerParams(
            dimension_semantics=("parallel",),
            vmem_limit_bytes=_VMEM_LIMIT),
    )(*args)


# ----------------------------------------------------------------------------
# Small JAX glue (resolution changes only; all heavy lifting is in Pallas)
# ----------------------------------------------------------------------------
def avg_pool2(x):                          # (C, H, W), H/W even
    c, h, w = x.shape
    return x.reshape(c, h // 2, 2, w // 2, 2).mean(axis=(2, 4))


def upsample2(x):                          # (C, H, W) -> (C, 2H, 2W)
    return jnp.repeat(jnp.repeat(x, 2, axis=1), 2, axis=2)


def init_params(key, f=8, cin_pkg=14):
    # TODO(synk): original ResUNet/Referencer weights unavailable; deterministic
    # synthetic init with the same structure as before.
    def conv_w(k, cin, cout):
        scale = 0.1 / jnp.sqrt(jnp.float32(9 * cin))
        return jax.random.normal(k, (3, 3, cin, cout), jnp.float32) * scale

    ks = jax.random.split(key, 6)
    z = lambda c: jnp.zeros((c,), jnp.float32)
    return {
        "w_in": conv_w(ks[0], cin_pkg, f), "b_in": z(f),
        "w_e2": conv_w(ks[1], f, f),       "b_e2": z(f),
        "w_r1": conv_w(ks[2], f, f),       "b_r1": z(f),
        "w_r2": conv_w(ks[3], f, f),       "b_r2": z(f),
        "w_d1": conv_w(ks[4], f, f),       "b_d1": z(f),
        "w_out": conv_w(ks[5], f, 3),      "b_out": z(3),
    }


# ----------------------------------------------------------------------------
# Blender forward
# ----------------------------------------------------------------------------
def blender_forward(params, img_A, img_T, mask_A, mask_T):
    """img_A/img_T: (1,3,H,W);  mask_A/mask_T: (1,H,W).  H, W even."""
    H, W = img_A.shape[-2], img_A.shape[-1]
    g1 = make_grid(H, W)
    g2 = make_grid(H // 2, W // 2)

    a = chw_to_flat(img_A[0].astype(jnp.float32), g1)     # (3, Nf)
    t = chw_to_flat(img_T[0].astype(jnp.float32), g1)
    ma = chw_to_flat(mask_A.astype(jnp.float32), g1)      # (1, Nf)
    mt = chw_to_flat(mask_T.astype(jnp.float32), g1)

    # ---- Referencer ----
    sum_a, cnt_a = masked_sum(a, ma, g1)
    sum_t, cnt_t = masked_sum(t, mt, g1)
    mu_a = sum_a / jnp.maximum(cnt_a, 1e-6)               # (3, 1)
    mu_t = sum_t / jnp.maximum(cnt_t, 1e-6)
    packages, pair, cro = build_packages(a, t, ma, mt, mu_a, mu_t, g1)

    # ---- ResUNet (bf16 activations, fused conv epilogues) ----
    e1 = conv3x3_flat(packages, params["w_in"], params["b_in"], g1, act="relu")
    d = avg_pool2(flat_to_chw(e1, g1).astype(jnp.float32))
    d_flat = chw_to_flat(d.astype(jnp.bfloat16), g2)
    e2 = conv3x3_flat(d_flat, params["w_e2"], params["b_e2"], g2, act="relu")
    r = conv3x3_flat(e2, params["w_r1"], params["b_r1"], g2, act="relu")
    # residual block: relu(e2 + conv(r)) fused into the conv epilogue
    e2b = conv3x3_flat(r, params["w_r2"], params["b_r2"], g2, act="relu",
                       residual=e2, res_mode="add_before_act")
    up = upsample2(flat_to_chw(e2b, g2).astype(jnp.float32))
    u = chw_to_flat(up.astype(jnp.bfloat16), g1) + e1       # skip connection
    # residual refine: u + relu(conv(u)) fused into the conv epilogue
    u2 = conv3x3_flat(u, params["w_d1"], params["b_d1"], g1, act="relu",
                      residual=u, res_mode="add_after_act")
    pred = conv3x3_flat(u2, params["w_out"], params["b_out"], g1, act="tanh",
                        out_dtype=jnp.float32)

    to_nchw = lambda xf, g: flat_to_chw(xf, g).astype(jnp.float32)[None]
    return (to_nchw(pred, g1), to_nchw(packages, g1),
            to_nchw(pair, g1), to_nchw(cro, g1))


# ----------------------------------------------------------------------------
# Demo
# ----------------------------------------------------------------------------
if __name__ == "__main__":
    H = W = 32  # scaled-down stand-in for the module's 256x256 (must be even)
    key = jax.random.PRNGKey(0)
    k1, k2 = jax.random.split(key)
    img_A = jax.random.uniform(k1, (1, 3, H, W), jnp.float32)
    img_T = jax.random.uniform(k2, (1, 3, H, W), jnp.float32)

    yy, xx = jnp.meshgrid(jnp.arange(H), jnp.arange(W), indexing="ij")
    mask_A = ((yy >= 8) & (yy < 24) & (xx >= 8) & (xx < 24)).astype(jnp.float32)[None]
    mask_T = ((yy >= 6) & (yy < 26) & (xx >= 6) & (xx < 26)).astype(jnp.float32)[None]

    params = init_params(jax.random.PRNGKey(42))

    outs = jax.jit(blender_forward)(params, img_A, img_T, mask_A, mask_T)
    jax.block_until_ready(outs)

    pred_imgs, packages, pair, pair_cro = outs
    assert pred_imgs.shape == (1, 3, H, W)
    assert packages.shape == (1, 14, H, W)
    assert pair.shape == (1, 6, H, W) and pair_cro.shape == (1, 6, H, W)
    assert bool(jnp.all(jnp.isfinite(pred_imgs)))
    assert bool(jnp.all(jnp.isfinite(packages)))
    print("KERNEL_OK")
</pallas_src>

<mosaic_0001>
module attributes {stable_mosaic.version = 11 : i64} {
  func.func @_package_kernel(%arg0: i32, %arg1: memref<3x256xf32, #tpu.memory_space<vmem>>, %arg2: memref<3x256xf32, #tpu.memory_space<vmem>>, %arg3: memref<1x256xf32, #tpu.memory_space<vmem>>, %arg4: memref<1x256xf32, #tpu.memory_space<vmem>>, %arg5: memref<1x256xf32, #tpu.memory_space<vmem>>, %arg6: memref<3x1xf32, #tpu.memory_space<vmem>>, %arg7: memref<3x1xf32, #tpu.memory_space<vmem>>, %arg8: memref<14x256xf32, #tpu.memory_space<vmem>>, %arg9: memref<6x256xf32, #tpu.memory_space<vmem>>, %arg10: memref<6x256xf32, #tpu.memory_space<vmem>>) attributes {dimension_semantics = [#tpu.dimension_semantics<parallel>], iteration_bounds = array<i64: 5>, scalar_prefetch = 0 : i64, scratch_operands = 0 : i64, tpu.core_type = #tpu.core_type<tc>, window_params = [{transform_indices = @transform_0, window_bounds = array<i64: 3, 256>}, {transform_indices = @transform_1, window_bounds = array<i64: 3, 256>}, {transform_indices = @transform_2, window_bounds = array<i64: 1, 256>}, {transform_indices = @transform_3, window_bounds = array<i64: 1, 256>}, {transform_indices = @transform_4, window_bounds = array<i64: 1, 256>}, {pipeline_mode = #tpu.pipeline_mode<synchronous>, transform_indices = @transform_5, window_bounds = array<i64: 3, 1>}, {pipeline_mode = #tpu.pipeline_mode<synchronous>, transform_indices = @transform_6, window_bounds = array<i64: 3, 1>}, {transform_indices = @transform_7, window_bounds = array<i64: 14, 256>}, {transform_indices = @transform_8, window_bounds = array<i64: 6, 256>}, {transform_indices = @transform_9, window_bounds = array<i64: 6, 256>}]} {
    %c0 = arith.constant 0 : index
    %c0_0 = arith.constant 0 : index
    %0 = vector.load %arg1[%c0, %c0_0] : memref<3x256xf32, #tpu.memory_space<vmem>>, vector<3x256xf32>
    %c0_1 = arith.constant 0 : index
    %c0_2 = arith.constant 0 : index
    %1 = vector.load %arg2[%c0_1, %c0_2] : memref<3x256xf32, #tpu.memory_space<vmem>>, vector<3x256xf32>
    %c0_3 = arith.constant 0 : index
    %c0_4 = arith.constant 0 : index
    %2 = vector.load %arg3[%c0_3, %c0_4] : memref<1x256xf32, #tpu.memory_space<vmem>>, vector<1x256xf32>
    %c0_5 = arith.constant 0 : index
    %c0_6 = arith.constant 0 : index
    %3 = vector.load %arg4[%c0_5, %c0_6] : memref<1x256xf32, #tpu.memory_space<vmem>>, vector<1x256xf32>
    %c0_7 = arith.constant 0 : index
    %c0_8 = arith.constant 0 : index
    %4 = vector.load %arg5[%c0_7, %c0_8] : memref<1x256xf32, #tpu.memory_space<vmem>>, vector<1x256xf32>
    %c0_9 = arith.constant 0 : index
    %c0_10 = arith.constant 0 : index
    %5 = vector.load %arg6[%c0_9, %c0_10] : memref<3x1xf32, #tpu.memory_space<vmem>>, vector<3x1xf32>
    %c0_11 = arith.constant 0 : index
    %c0_12 = arith.constant 0 : index
    %6 = vector.load %arg7[%c0_11, %c0_12] : memref<3x1xf32, #tpu.memory_space<vmem>>, vector<3x1xf32>
    %7 = vector.broadcast %5 : vector<3x1xf32> to vector<3x256xf32>
    %8 = arith.subf %0, %7 : vector<3x256xf32>
    %9 = vector.broadcast %6 : vector<3x1xf32> to vector<3x256xf32>
    %10 = arith.addf %8, %9 : vector<3x256xf32>
    %11 = vector.broadcast %4 : vector<1x256xf32> to vector<3x256xf32>
    %12 = arith.mulf %10, %11 : vector<3x256xf32>
    %13 = vector.broadcast %6 : vector<3x1xf32> to vector<3x256xf32>
    %14 = arith.subf %1, %13 : vector<3x256xf32>
    %15 = vector.broadcast %5 : vector<3x1xf32> to vector<3x256xf32>
    %16 = arith.addf %14, %15 : vector<3x256xf32>
    %17 = vector.broadcast %4 : vector<1x256xf32> to vector<3x256xf32>
    %18 = arith.mulf %16, %17 : vector<3x256xf32>
    %19 = vector.broadcast %3 : vector<1x256xf32> to vector<3x256xf32>
    %20 = arith.mulf %12, %19 : vector<3x256xf32>
    %21 = vector.broadcast %2 : vector<1x256xf32> to vector<3x256xf32>
    %22 = arith.mulf %18, %21 : vector<3x256xf32>
    %c0_13 = arith.constant 0 : index
    %c0_14 = arith.constant 0 : index
    %23 = vector.load %arg8[%c0_13, %c0_14] : memref<14x256xf32, #tpu.memory_space<vmem>>, vector<3x256xf32>
    tpu.vector_store %arg8[%c0_13, %c0_14], %0 {strides = array<i32>} : memref<14x256xf32, #tpu.memory_space<vmem>>, vector<3x256xf32>,
    %c3 = arith.constant 3 : index
    %c0_15 = arith.constant 0 : index
    %24 = vector.load %arg8[%c3, %c0_15] : memref<14x256xf32, #tpu.memory_space<vmem>>, vector<3x256xf32>
    tpu.vector_store %arg8[%c3, %c0_15], %1 {strides = array<i32>} : memref<14x256xf32, #tpu.memory_space<vmem>>, vector<3x256xf32>,
    %c6 = arith.constant 6 : index
    %c0_16 = arith.constant 0 : index
    %25 = vector.load %arg8[%c6, %c0_16] : memref<14x256xf32, #tpu.memory_space<vmem>>, vector<3x256xf32>
    tpu.vector_store %arg8[%c6, %c0_16], %12 {strides = array<i32>} : memref<14x256xf32, #tpu.memory_space<vmem>>, vector<3x256xf32>,
    %c9 = arith.constant 9 : index
    %c0_17 = arith.constant 0 : index
    %26 = vector.load %arg8[%c9, %c0_17] : memref<14x256xf32, #tpu.memory_space<vmem>>, vector<3x256xf32>
    tpu.vector_store %arg8[%c9, %c0_17], %18 {strides = array<i32>} : memref<14x256xf32, #tpu.memory_space<vmem>>, vector<3x256xf32>,
    %c12 = arith.constant 12 : index
    %c0_18 = arith.constant 0 : index
    %27 = vector.load %arg8[%c12, %c0_18] : memref<14x256xf32, #tpu.memory_space<vmem>>, vector<1x256xf32>
    tpu.vector_store %arg8[%c12, %c0_18], %2 {strides = array<i32>} : memref<14x256xf32, #tpu.memory_space<vmem>>, vector<1x256xf32>,
    %c13 = arith.constant 13 : index
    %c0_19 = arith.constant 0 : index
    %28 = vector.load %arg8[%c13, %c0_19] : memref<14x256xf32, #tpu.memory_space<vmem>>, vector<1x256xf32>
    tpu.vector_store %arg8[%c13, %c0_19], %3 {strides = array<i32>} : memref<14x256xf32, #tpu.memory_space<vmem>>, vector<1x256xf32>,
    %c0_20 = arith.constant 0 : index
    %c0_21 = arith.constant 0 : index
    %29 = vector.load %arg9[%c0_20, %c0_21] : memref<6x256xf32, #tpu.memory_space<vmem>>, vector<3x256xf32>
    tpu.vector_store %arg9[%c0_20, %c0_21], %12 {strides = array<i32>} : memref<6x256xf32, #tpu.memory_space<vmem>>, vector<3x256xf32>,
    %c3_22 = arith.constant 3 : index
    %c0_23 = arith.constant 0 : index
    %30 = vector.load %arg9[%c3_22, %c0_23] : memref<6x256xf32, #tpu.memory_space<vmem>>, vector<3x256xf32>
    tpu.vector_store %arg9[%c3_22, %c0_23], %18 {strides = array<i32>} : memref<6x256xf32, #tpu.memory_space<vmem>>, vector<3x256xf32>,
    %c0_24 = arith.constant 0 : index
    %c0_25 = arith.constant 0 : index
    %31 = vector.load %arg10[%c0_24, %c0_25] : memref<6x256xf32, #tpu.memory_space<vmem>>, vector<3x256xf32>
    tpu.vector_store %arg10[%c0_24, %c0_25], %20 {strides = array<i32>} : memref<6x256xf32, #tpu.memory_space<vmem>>, vector<3x256xf32>,
    %c3_26 = arith.constant 3 : index
    %c0_27 = arith.constant 0 : index
    %32 = vector.load %arg10[%c3_26, %c0_27] : memref<6x256xf32, #tpu.memory_space<vmem>>, vector<3x256xf32>
    tpu.vector_store %arg10[%c3_26, %c0_27], %22 {strides = array<i32>} : memref<6x256xf32, #tpu.memory_space<vmem>>, vector<3x256xf32>,
    return
  }
  func.func @transform_0(%arg0: i32) -> (i32, i32) {
    %c1_i32 = arith.constant 1 : i32
    %0 = arith.addi %arg0, %c1_i32 : i32
    %c0_i32 = arith.constant 0 : i32
    %c0_i32_0 = arith.constant 0 : i32
    return %c0_i32, %0 : i32, i32
  }
  func.func @transform_1(%arg0: i32) -> (i32, i32) {
    %c1_i32 = arith.constant 1 : i32
    %0 = arith.addi %arg0, %c1_i32 : i32
    %c0_i32 = arith.constant 0 : i32
    %c0_i32_0 = arith.constant 0 : i32
    return %c0_i32, %0 : i32, i32
  }
  func.func @transform_2(%arg0: i32) -> (i32, i32) {
    %c1_i32 = arith.constant 1 : i32
    %0 = arith.addi %arg0, %c1_i32 : i32
    %c0_i32 = arith.constant 0 : i32
    %c0_i32_0 = arith.constant 0 : i32
    return %c0_i32, %0 : i32, i32
  }
  func.func @transform_3(%arg0: i32) -> (i32, i32) {
    %c1_i32 = arith.constant 1 : i32
    %0 = arith.addi %arg0, %c1_i32 : i32
    %c0_i32 = arith.constant 0 : i32
    %c0_i32_0 = arith.constant 0 : i32
    return %c0_i32, %0 : i32, i32
  }
  func.func @transform_4(%arg0: i32) -> (i32, i32) {
    %c1_i32 = arith.constant 1 : i32
    %0 = arith.addi %arg0, %c1_i32 : i32
    %c0_i32 = arith.constant 0 : i32
    %c0_i32_0 = arith.constant 0 : i32
    return %c0_i32, %0 : i32, i32
  }
  func.func @transform_5(%arg0: i32) -> (i32, i32) {
    %c0_i32 = arith.constant 0 : i32
    %c0_i32_0 = arith.constant 0 : i32
    %c0_i32_1 = arith.constant 0 : i32
    return %c0_i32, %c0_i32_0 : i32, i32
  }
  func.func @transform_6(%arg0: i32) -> (i32, i32) {
    %c0_i32 = arith.constant 0 : i32
    %c0_i32_0 = arith.constant 0 : i32
    %c0_i32_1 = arith.constant 0 : i32
    return %c0_i32, %c0_i32_0 : i32, i32
  }
  func.func @transform_7(%arg0: i32) -> (i32, i32) {
    %c1_i32 = arith.constant 1 : i32
    %0 = arith.addi %arg0, %c1_i32 : i32
    %c0_i32 = arith.constant 0 : i32
    %c0_i32_0 = arith.constant 0 : i32
    return %c0_i32, %0 : i32, i32
  }
  func.func @transform_8(%arg0: i32) -> (i32, i32) {
    %c1_i32 = arith.constant 1 : i32
    %0 = arith.addi %arg0, %c1_i32 : i32
    %c0_i32 = arith.constant 0 : i32
    %c0_i32_0 = arith.constant 0 : i32
    return %c0_i32, %0 : i32, i32
  }
  func.func @transform_9(%arg0: i32) -> (i32, i32) {
    %c1_i32 = arith.constant 1 : i32
    %0 = arith.addi %arg0, %c1_i32 : i32
    %c0_i32 = arith.constant 0 : i32
    %c0_i32_0 = arith.constant 0 : i32
    return %c0_i32, %0 : i32, i32
  }
}

module attributes {stable_mosaic.version = 11 : i64} {
  func.func @_masked_sum_kernel(%arg0: i32, %arg1: memref<3x256xf32, #tpu.memory_space<vmem>>, %arg2: memref<1x256xf32, #tpu.memory_space<vmem>>, %arg3: memref<3x1xf32, #tpu.memory_space<vmem>>, %arg4: memref<1x1xf32, #tpu.memory_space<vmem>>) attributes {dimension_semantics = [#tpu.dimension_semantics<arbitrary>], iteration_bounds = array<i64: 7>, scalar_prefetch = 0 : i64, scratch_operands = 0 : i64, tpu.core_type = #tpu.core_type<tc>, window_params = [{transform_indices = @transform_0, window_bounds = array<i64: 3, 256>}, {transform_indices = @transform_1, window_bounds = array<i64: 1, 256>}, {pipeline_mode = #tpu.pipeline_mode<synchronous>, transform_indices = @transform_2, window_bounds = array<i64: 3, 1>}, {pipeline_mode = #tpu.pipeline_mode<synchronous>, transform_indices = @transform_3, window_bounds = array<i64: 1, 1>}]} {
    %c0_i32 = arith.constant 0 : i32
    %0 = arith.cmpi eq, %arg0, %c0_i32 : i32
    %1 = arith.extui %0 : i1 to i32
    %c0_i32_0 = arith.constant 0 : i32
    %2 = arith.cmpi ne, %1, %c0_i32_0 : i32
    scf.if %2 {
      %cst_13 = arith.constant 0.000000e+00 : f32
      %17 = vector.broadcast %cst_13 : f32 to vector<3x1xf32>
      %c0_14 = arith.constant 0 : index
      %c0_15 = arith.constant 0 : index
      %18 = vector.load %arg3[%c0_14, %c0_15] : memref<3x1xf32, #tpu.memory_space<vmem>>, vector<3x1xf32>
      tpu.vector_store %arg3[%c0_14, %c0_15], %17 {strides = array<i32>} : memref<3x1xf32, #tpu.memory_space<vmem>>, vector<3x1xf32>,
      %cst_16 = arith.constant 0.000000e+00 : f32
      %19 = vector.broadcast %cst_16 : f32 to vector<1x1xf32>
      %c0_17 = arith.constant 0 : index
      %c0_18 = arith.constant 0 : index
      %20 = vector.load %arg4[%c0_17, %c0_18] : memref<1x1xf32, #tpu.memory_space<vmem>>, vector<1x1xf32>
      tpu.vector_store %arg4[%c0_17, %c0_18], %19 {strides = array<i32>} : memref<1x1xf32, #tpu.memory_space<vmem>>, vector<1x1xf32>,
    } else {
    }
    %c0 = arith.constant 0 : index
    %c0_1 = arith.constant 0 : index
    %3 = vector.load %arg1[%c0, %c0_1] : memref<3x256xf32, #tpu.memory_space<vmem>>, vector<3x256xf32>
    %c0_2 = arith.constant 0 : index
    %c0_3 = arith.constant 0 : index
    %4 = vector.load %arg2[%c0_2, %c0_3] : memref<1x256xf32, #tpu.memory_space<vmem>>, vector<1x256xf32>
    %c0_4 = arith.constant 0 : index
    %c0_5 = arith.constant 0 : index
    %5 = vector.load %arg3[%c0_4, %c0_5] : memref<3x1xf32, #tpu.memory_space<vmem>>, vector<3x1xf32>
    %6 = vector.broadcast %4 : vector<1x256xf32> to vector<3x256xf32>
    %7 = arith.mulf %3, %6 : vector<3x256xf32>
    %cst = arith.constant dense<0.000000e+00> : vector<3xf32>
    %8 = vector.multi_reduction <add>, %7, %cst [1] : vector<3x256xf32> to vector<3xf32>
    %9 = vector.shape_cast %8 : vector<3xf32> to vector<3x1xf32>
    %10 = arith.addf %5, %9 : vector<3x1xf32>
    %c0_6 = arith.constant 0 : index
    %c0_7 = arith.constant 0 : index
    %11 = vector.load %arg3[%c0_6, %c0_7] : memref<3x1xf32, #tpu.memory_space<vmem>>, vector<3x1xf32>
    tpu.vector_store %arg3[%c0_6, %c0_7], %10 {strides = array<i32>} : memref<3x1xf32, #tpu.memory_space<vmem>>, vector<3x1xf32>,
    %c0_8 = arith.constant 0 : index
    %c0_9 = arith.constant 0 : index
    %12 = vector.load %arg4[%c0_8, %c0_9] : memref<1x1xf32, #tpu.memory_space<vmem>>, vector<1x1xf32>
    %cst_10 = arith.constant dense<0.000000e+00> : vector<1xf32>
    %13 = vector.multi_reduction <add>, %4, %cst_10 [1] : vector<1x256xf32> to vector<1xf32>
    %14 = vector.shape_cast %13 : vector<1xf32> to vector<1x1xf32>
    %15 = arith.addf %12, %14 : vector<1x1xf32>
    %c0_11 = arith.constant 0 : index
    %c0_12 = arith.constant 0 : index
    %16 = vector.load %arg4[%c0_11, %c0_12] : memref<1x1xf32, #tpu.memory_space<vmem>>, vector<1x1xf32>
    tpu.vector_store %arg4[%c0_11, %c0_12], %15 {strides = array<i32>} : memref<1x1xf32, #tpu.memory_space<vmem>>, vector<1x1xf32>,
    return
  }
  func.func @transform_0(%arg0: i32) -> (i32, i32) {
    %c0_i32 = arith.constant 0 : i32
    %c0_i32_0 = arith.constant 0 : i32
    return %c0_i32, %arg0 : i32, i32
  }
  func.func @transform_1(%arg0: i32) -> (i32, i32) {
    %c0_i32 = arith.constant 0 : i32
    %c0_i32_0 = arith.constant 0 : i32
    return %c0_i32, %arg0 : i32, i32
  }
  func.func @transform_2(%arg0: i32) -> (i32, i32) {
    %c0_i32 = arith.constant 0 : i32
    %c0_i32_0 = arith.constant 0 : i32
    %c0_i32_1 = arith.constant 0 : i32
    return %c0_i32, %c0_i32_0 : i32, i32
  }
  func.func @transform_3(%arg0: i32) -> (i32, i32) {
    %c0_i32 = arith.constant 0 : i32
    %c0_i32_0 = arith.constant 0 : i32
    %c0_i32_1 = arith.constant 0 : i32
    return %c0_i32, %c0_i32_0 : i32, i32
  }
}

module attributes {stable_mosaic.version = 11 : i64} {
  func.func @_conv3x3_kernel(%arg0: i32, %arg1: memref<14x1792xf32, #tpu.memory_space<any>>, %arg2: memref<9x8x14xbf16, #tpu.memory_space<vmem>>, %arg3: memref<8x1xf32, #tpu.memory_space<vmem>>, %arg4: memref<1x256xf32, #tpu.memory_space<vmem>>, %arg5: memref<8x256xbf16, #tpu.memory_space<vmem>>, %arg6: memref<14x512xf32, #tpu.memory_space<vmem>>, %arg7: memref<!tpu.dma_semaphore, #tpu.memory_space<semaphore_mem>>) attributes {dimension_semantics = [#tpu.dimension_semantics<parallel>], iteration_bounds = array<i64: 5>, scalar_prefetch = 0 : i64, scratch_operands = 2 : i64, tpu.core_type = #tpu.core_type<tc>, window_params = [{}, {pipeline_mode = #tpu.pipeline_mode<synchronous>, transform_indices = @transform_1, window_bounds = array<i64: 9, 8, 14>}, {pipeline_mode = #tpu.pipeline_mode<synchronous>, transform_indices = @transform_2, window_bounds = array<i64: 8, 1>}, {transform_indices = @transform_3, window_bounds = array<i64: 1, 256>}, {transform_indices = @transform_4, window_bounds = array<i64: 8, 256>}]} {
    %c1_i32 = arith.constant 1 : i32
    %0 = arith.addi %arg0, %c1_i32 : i32
    %c256_i32 = arith.constant 256 : i32
    %1 = arith.muli %0, %c256_i32 : i32
    %c128_i32 = arith.constant 128 : i32
    %2 = arith.subi %1, %c128_i32 : i32
    %3 = tpu.assume_multiple %2, 128 : i32
    %c0_i32 = arith.constant 0 : i32
    %4 = tpu.memref_slice %arg1[%c0_i32, %3] : memref<14x1792xf32, #tpu.memory_space<any>> -> memref<14x512xf32, #tpu.memory_space<any>>
    tpu.enqueue_dma source(%4 : memref<14x512xf32, #tpu.memory_space<any>>) target(%arg6 : memref<14x512xf32, #tpu.memory_space<vmem>>) target_semaphore(%arg7 : memref<!tpu.dma_semaphore, #tpu.memory_space<semaphore_mem>>)
    %c0_i32_0 = arith.constant 0 : i32
    %5 = tpu.memref_slice %arg1[%c0_i32_0, %3] : memref<14x1792xf32, #tpu.memory_space<any>> -> memref<14x512xf32, #tpu.memory_space<any>>
    tpu.wait_dma2 semaphore(%arg7 : memref<!tpu.dma_semaphore, #tpu.memory_space<semaphore_mem>>) src(%5 : memref<14x512xf32, #tpu.memory_space<any>>) dst(%arg6 : memref<14x512xf32, #tpu.memory_space<vmem>>)
    %cst = arith.constant 0.000000e+00 : f32
    %6 = vector.broadcast %cst : f32 to vector<8x256xf32>
    %c0 = arith.constant 0 : index
    %c93 = arith.constant 93 : index
    %7 = vector.load %arg6[%c0, %c93] : memref<14x512xf32, #tpu.memory_space<vmem>>, vector<14x256xf32>
    %8 = arith.truncf %7 : vector<14x256xf32> to vector<14x256xbf16>
    %c0_1 = arith.constant 0 : index
    %c0_2 = arith.constant 0 : index
    %c0_3 = arith.constant 0 : index
    %9 = vector.load %arg2[%c0_1, %c0_2, %c0_3] : memref<9x8x14xbf16, #tpu.memory_space<vmem>>, vector<1x8x14xbf16>
    %10 = vector.shape_cast %9 : vector<1x8x14xbf16> to vector<8x14xbf16>
    %cst_4 = arith.constant dense<0.000000e+00> : vector<8x256xf32>
    %11 = tpu.matmul %10, %8, %cst_4 {dimension_numbers = #tpu.dot_dimension_numbers<[1], [0], [0], [1], [0, 0, 1, 1], [], []>} : vector<8x14xbf16>, vector<14x256xbf16>, vector<8x256xf32> -> vector<8x256xf32>
    %12 = arith.addf %6, %11 : vector<8x256xf32>
    %c0_5 = arith.constant 0 : index
    %c94 = arith.constant 94 : index
    %13 = vector.load %arg6[%c0_5, %c94] : memref<14x512xf32, #tpu.memory_space<vmem>>, vector<14x256xf32>
    %14 = arith.truncf %13 : vector<14x256xf32> to vector<14x256xbf16>
    %c1 = arith.constant 1 : index
    %c0_6 = arith.constant 0 : index
    %c0_7 = arith.constant 0 : index
    %15 = vector.load %arg2[%c1, %c0_6, %c0_7] : memref<9x8x14xbf16, #tpu.memory_space<vmem>>, vector<1x8x14xbf16>
    %16 = vector.shape_cast %15 : vector<1x8x14xbf16> to vector<8x14xbf16>
    %cst_8 = arith.constant dense<0.000000e+00> : vector<8x256xf32>
    %17 = tpu.matmul %16, %14, %cst_8 {dimension_numbers = #tpu.dot_dimension_numbers<[1], [0], [0], [1], [0, 0, 1, 1], [], []>} : vector<8x14xbf16>, vector<14x256xbf16>, vector<8x256xf32> -> vector<8x256xf32>
    %18 = arith.addf %12, %17 : vector<8x256xf32>
    %c0_9 = arith.constant 0 : index
    %c95 = arith.constant 95 : index
    %19 = vector.load %arg6[%c0_9, %c95] : memref<14x512xf32, #tpu.memory_space<vmem>>, vector<14x256xf32>
    %20 = arith.truncf %19 : vector<14x256xf32> to vector<14x256xbf16>
    %c2 = arith.constant 2 : index
    %c0_10 = arith.constant 0 : index
    %c0_11 = arith.constant 0 : index
    %21 = vector.load %arg2[%c2, %c0_10, %c0_11] : memref<9x8x14xbf16, #tpu.memory_space<vmem>>, vector<1x8x14xbf16>
    %22 = vector.shape_cast %21 : vector<1x8x14xbf16> to vector<8x14xbf16>
    %cst_12 = arith.constant dense<0.000000e+00> : vector<8x256xf32>
    %23 = tpu.matmul %22, %20, %cst_12 {dimension_numbers = #tpu.dot_dimension_numbers<[1], [0], [0], [1], [0, 0, 1, 1], [], []>} : vector<8x14xbf16>, vector<14x256xbf16>, vector<8x256xf32> -> vector<8x256xf32>
    %24 = arith.addf %18, %23 : vector<8x256xf32>
    %c0_13 = arith.constant 0 : index
    %c127 = arith.constant 127 : index
    %25 = vector.load %arg6[%c0_13, %c127] : memref<14x512xf32, #tpu.memory_space<vmem>>, vector<14x256xf32>
    %26 = arith.truncf %25 : vector<14x256xf32> to vector<14x256xbf16>
    %c3 = arith.constant 3 : index
    %c0_14 = arith.constant 0 : index
    %c0_15 = arith.constant 0 : index
    %27 = vector.load %arg2[%c3, %c0_14, %c0_15] : memref<9x8x14xbf16, #tpu.memory_space<vmem>>, vector<1x8x14xbf16>
    %28 = vector.shape_cast %27 : vector<1x8x14xbf16> to vector<8x14xbf16>
    %cst_16 = arith.constant dense<0.000000e+00> : vector<8x256xf32>
    %29 = tpu.matmul %28, %26, %cst_16 {dimension_numbers = #tpu.dot_dimension_numbers<[1], [0], [0], [1], [0, 0, 1, 1], [], []>} : vector<8x14xbf16>, vector<14x256xbf16>, vector<8x256xf32> -> vector<8x256xf32>
    %30 = arith.addf %24, %29 : vector<8x256xf32>
    %c0_17 = arith.constant 0 : index
    %c128 = arith.constant 128 : index
    %31 = vector.load %arg6[%c0_17, %c128] : memref<14x512xf32, #tpu.memory_space<vmem>>, vector<14x256xf32>
    %32 = arith.truncf %31 : vector<14x256xf32> to vector<14x256xbf16>
    %c4 = arith.constant 4 : index
    %c0_18 = arith.constant 0 : index
    %c0_19 = arith.constant 0 : index
    %33 = vector.load %arg2[%c4, %c0_18, %c0_19] : memref<9x8x14xbf16, #tpu.memory_space<vmem>>, vector<1x8x14xbf16>
    %34 = vector.shape_cast %33 : vector<1x8x14xbf16> to vector<8x14xbf16>
    %cst_20 = arith.constant dense<0.000000e+00> : vector<8x256xf32>
    %35 = tpu.matmul %34, %32, %cst_20 {dimension_numbers = #tpu.dot_dimension_numbers<[1], [0], [0], [1], [0, 0, 1, 1], [], []>} : vector<8x14xbf16>, vector<14x256xbf16>, vector<8x256xf32> -> vector<8x256xf32>
    %36 = arith.addf %30, %35 : vector<8x256xf32>
    %c0_21 = arith.constant 0 : index
    %c129 = arith.constant 129 : index
    %37 = vector.load %arg6[%c0_21, %c129] : memref<14x512xf32, #tpu.memory_space<vmem>>, vector<14x256xf32>
    %38 = arith.truncf %37 : vector<14x256xf32> to vector<14x256xbf16>
    %c5 = arith.constant 5 : index
    %c0_22 = arith.constant 0 : index
    %c0_23 = arith.constant 0 : index
    %39 = vector.load %arg2[%c5, %c0_22, %c0_23] : memref<9x8x14xbf16, #tpu.memory_space<vmem>>, vector<1x8x14xbf16>
    %40 = vector.shape_cast %39 : vector<1x8x14xbf16> to vector<8x14xbf16>
    %cst_24 = arith.constant dense<0.000000e+00> : vector<8x256xf32>
    %41 = tpu.matmul %40, %38, %cst_24 {dimension_numbers = #tpu.dot_dimension_numbers<[1], [0], [0], [1], [0, 0, 1, 1], [], []>} : vector<8x14xbf16>, vector<14x256xbf16>, vector<8x256xf32> -> vector<8x256xf32>
    %42 = arith.addf %36, %41 : vector<8x256xf32>
    %c0_25 = arith.constant 0 : index
    %c161 = arith.constant 161 : index
    %43 = vector.load %arg6[%c0_25, %c161] : memref<14x512xf32, #tpu.memory_space<vmem>>, vector<14x256xf32>
    %44 = arith.truncf %43 : vector<14x256xf32> to vector<14x256xbf16>
    %c6 = arith.constant 6 : index
    %c0_26 = arith.constant 0 : index
    %c0_27 = arith.constant 0 : index
    %45 = vector.load %arg2[%c6, %c0_26, %c0_27] : memref<9x8x14xbf16, #tpu.memory_space<vmem>>, vector<1x8x14xbf16>
    %46 = vector.shape_cast %45 : vector<1x8x14xbf16> to vector<8x14xbf16>
    %cst_28 = arith.constant dense<0.000000e+00> : vector<8x256xf32>
    %47 = tpu.matmul %46, %44, %cst_28 {dimension_numbers = #tpu.dot_dimension_numbers<[1], [0], [0], [1], [0, 0, 1, 1], [], []>} : vector<8x14xbf16>, vector<14x256xbf16>, vector<8x256xf32> -> vector<8x256xf32>
    %48 = arith.addf %42, %47 : vector<8x256xf32>
    %c0_29 = arith.constant 0 : index
    %c162 = arith.constant 162 : index
    %49 = vector.load %arg6[%c0_29, %c162] : memref<14x512xf32, #tpu.memory_space<vmem>>, vector<14x256xf32>
    %50 = arith.truncf %49 : vector<14x256xf32> to vector<14x256xbf16>
    %c7 = arith.constant 7 : index
    %c0_30 = arith.constant 0 : index
    %c0_31 = arith.constant 0 : index
    %51 = vector.load %arg2[%c7, %c0_30, %c0_31] : memref<9x8x14xbf16, #tpu.memory_space<vmem>>, vector<1x8x14xbf16>
    %52 = vector.shape_cast %51 : vector<1x8x14xbf16> to vector<8x14xbf16>
    %cst_32 = arith.constant dense<0.000000e+00> : vector<8x256xf32>
    %53 = tpu.matmul %52, %50, %cst_32 {dimension_numbers = #tpu.dot_dimension_numbers<[1], [0], [0], [1], [0, 0, 1, 1], [], []>} : vector<8x14xbf16>, vector<14x256xbf16>, vector<8x256xf32> -> vector<8x256xf32>
    %54 = arith.addf %48, %53 : vector<8x256xf32>
    %c0_33 = arith.constant 0 : index
    %c163 = arith.constant 163 : index
    %55 = vector.load %arg6[%c0_33, %c163] : memref<14x512xf32, #tpu.memory_space<vmem>>, vector<14x256xf32>
    %56 = arith.truncf %55 : vector<14x256xf32> to vector<14x256xbf16>
    %c8 = arith.constant 8 : index
    %c0_34 = arith.constant 0 : index
    %c0_35 = arith.constant 0 : index
    %57 = vector.load %arg2[%c8, %c0_34, %c0_35] : memref<9x8x14xbf16, #tpu.memory_space<vmem>>, vector<1x8x14xbf16>
    %58 = vector.shape_cast %57 : vector<1x8x14xbf16> to vector<8x14xbf16>
    %cst_36 = arith.constant dense<0.000000e+00> : vector<8x256xf32>
    %59 = tpu.matmul %58, %56, %cst_36 {dimension_numbers = #tpu.dot_dimension_numbers<[1], [0], [0], [1], [0, 0, 1, 1], [], []>} : vector<8x14xbf16>, vector<14x256xbf16>, vector<8x256xf32> -> vector<8x256xf32>
    %60 = arith.addf %54, %59 : vector<8x256xf32>
    %c0_37 = arith.constant 0 : index
    %c0_38 = arith.constant 0 : index
    %61 = vector.load %arg3[%c0_37, %c0_38] : memref<8x1xf32, #tpu.memory_space<vmem>>, vector<8x1xf32>
    %62 = vector.broadcast %61 : vector<8x1xf32> to vector<8x256xf32>
    %63 = arith.addf %60, %62 : vector<8x256xf32>
    %cst_39 = arith.constant 0.000000e+00 : f32
    %64 = vector.broadcast %cst_39 : f32 to vector<8x256xf32>
    %65 = arith.maximumf %63, %64 : vector<8x256xf32>
    %c0_40 = arith.constant 0 : index
    %c0_41 = arith.constant 0 : index
    %66 = vector.load %arg4[%c0_40, %c0_41] : memref<1x256xf32, #tpu.memory_space<vmem>>, vector<1x256xf32>
    %cst_42 = arith.constant 5.000000e-01 : f32
    %67 = vector.broadcast %cst_42 : f32 to vector<1x256xf32>
    %68 = arith.cmpf ogt, %66, %67 : vector<1x256xf32>
    %cst_43 = arith.constant 0.000000e+00 : f32
    %69 = vector.shape_cast %68 : vector<1x256xi1> to vector<1x256xi1>
    %70 = vector.broadcast %69 : vector<1x256xi1> to vector<8x256xi1>
    %71 = vector.broadcast %cst_43 : f32 to vector<8x256xf32>
    %72 = arith.select %70, %65, %71 : vector<8x256xi1>, vector<8x256xf32>
    %73 = arith.truncf %72 : vector<8x256xf32> to vector<8x256xbf16>
    %c0_44 = arith.constant 0 : index
    %c0_45 = arith.constant 0 : index
    %74 = vector.load %arg5[%c0_44, %c0_45] : memref<8x256xbf16, #tpu.memory_space<vmem>>, vector<8x256xbf16>
    tpu.vector_store %arg5[%c0_44, %c0_45], %73 {strides = array<i32>} : memref<8x256xbf16, #tpu.memory_space<vmem>>, vector<8x256xbf16>,
    return
  }
  func.func @transform_1(%arg0: i32) -> (i32, i32, i32) {
    %c0_i32 = arith.constant 0 : i32
    %c0_i32_0 = arith.constant 0 : i32
    %c0_i32_1 = arith.constant 0 : i32
    %c0_i32_2 = arith.constant 0 : i32
    return %c0_i32, %c0_i32_0, %c0_i32_1 : i32, i32, i32
  }
  func.func @transform_2(%arg0: i32) -> (i32, i32) {
    %c0_i32 = arith.constant 0 : i32
    %c0_i32_0 = arith.constant 0 : i32
    %c0_i32_1 = arith.constant 0 : i32
    return %c0_i32, %c0_i32_0 : i32, i32
  }
  func.func @transform_3(%arg0: i32) -> (i32, i32) {
    %c1_i32 = arith.constant 1 : i32
    %0 = arith.addi %arg0, %c1_i32 : i32
    %c0_i32 = arith.constant 0 : i32
    %c0_i32_0 = arith.constant 0 : i32
    return %c0_i32, %0 : i32, i32
  }
  func.func @transform_4(%arg0: i32) -> (i32, i32) {
    %c1_i32 = arith.constant 1 : i32
    %0 = arith.addi %arg0, %c1_i32 : i32
    %c0_i32 = arith.constant 0 : i32
    %c0_i32_0 = arith.constant 0 : i32
    return %c0_i32, %0 : i32, i32
  }
}

module attributes {stable_mosaic.version = 11 : i64} {
  func.func @_conv3x3_kernel(%arg0: i32, %arg1: memref<8x640xbf16, #tpu.memory_space<any>>, %arg2: memref<9x8x8xbf16, #tpu.memory_space<vmem>>, %arg3: memref<8x1xf32, #tpu.memory_space<vmem>>, %arg4: memref<1x128xf32, #tpu.memory_space<vmem>>, %arg5: memref<8x128xbf16, #tpu.memory_space<vmem>>, %arg6: memref<8x384xbf16, #tpu.memory_space<vmem>>, %arg7: memref<!tpu.dma_semaphore, #tpu.memory_space<semaphore_mem>>) attributes {dimension_semantics = [#tpu.dimension_semantics<parallel>], iteration_bounds = array<i64: 3>, scalar_prefetch = 0 : i64, scratch_operands = 2 : i64, tpu.core_type = #tpu.core_type<tc>, window_params = [{}, {pipeline_mode = #tpu.pipeline_mode<synchronous>, transform_indices = @transform_1, window_bounds = array<i64: 9, 8, 8>}, {pipeline_mode = #tpu.pipeline_mode<synchronous>, transform_indices = @transform_2, window_bounds = array<i64: 8, 1>}, {transform_indices = @transform_3, window_bounds = array<i64: 1, 128>}, {transform_indices = @transform_4, window_bounds = array<i64: 8, 128>}]} {
    %c1_i32 = arith.constant 1 : i32
    %0 = arith.addi %arg0, %c1_i32 : i32
    %c128_i32 = arith.constant 128 : i32
    %1 = arith.muli %0, %c128_i32 : i32
    %c128_i32_0 = arith.constant 128 : i32
    %2 = arith.subi %1, %c128_i32_0 : i32
    %3 = tpu.assume_multiple %2, 128 : i32
    %c0_i32 = arith.constant 0 : i32
    %4 = tpu.memref_slice %arg1[%c0_i32, %3] : memref<8x640xbf16, #tpu.memory_space<any>> -> memref<8x384xbf16, #tpu.memory_space<any>>
    tpu.enqueue_dma source(%4 : memref<8x384xbf16, #tpu.memory_space<any>>) target(%arg6 : memref<8x384xbf16, #tpu.memory_space<vmem>>) target_semaphore(%arg7 : memref<!tpu.dma_semaphore, #tpu.memory_space<semaphore_mem>>)
    %c0_i32_1 = arith.constant 0 : i32
    %5 = tpu.memref_slice %arg1[%c0_i32_1, %3] : memref<8x640xbf16, #tpu.memory_space<any>> -> memref<8x384xbf16, #tpu.memory_space<any>>
    tpu.wait_dma2 semaphore(%arg7 : memref<!tpu.dma_semaphore, #tpu.memory_space<semaphore_mem>>) src(%5 : memref<8x384xbf16, #tpu.memory_space<any>>) dst(%arg6 : memref<8x384xbf16, #tpu.memory_space<vmem>>)
    %cst = arith.constant 0.000000e+00 : f32
    %6 = vector.broadcast %cst : f32 to vector<8x128xf32>
    %c0 = arith.constant 0 : index
    %c109 = arith.constant 109 : index
    %7 = vector.load %arg6[%c0, %c109] : memref<8x384xbf16, #tpu.memory_space<vmem>>, vector<8x128xbf16>
    %c0_2 = arith.constant 0 : index
    %c0_3 = arith.constant 0 : index
    %c0_4 = arith.constant 0 : index
    %8 = vector.load %arg2[%c0_2, %c0_3, %c0_4] : memref<9x8x8xbf16, #tpu.memory_space<vmem>>, vector<1x8x8xbf16>
    %9 = vector.shape_cast %8 : vector<1x8x8xbf16> to vector<8x8xbf16>
    %cst_5 = arith.constant dense<0.000000e+00> : vector<8x128xf32>
    %10 = tpu.matmul %9, %7, %cst_5 {dimension_numbers = #tpu.dot_dimension_numbers<[1], [0], [0], [1], [0, 0, 1, 1], [], []>} : vector<8x8xbf16>, vector<8x128xbf16>, vector<8x128xf32> -> vector<8x128xf32>
    %11 = arith.addf %6, %10 : vector<8x128xf32>
    %c0_6 = arith.constant 0 : index
    %c110 = arith.constant 110 : index
    %12 = vector.load %arg6[%c0_6, %c110] : memref<8x384xbf16, #tpu.memory_space<vmem>>, vector<8x128xbf16>
    %c1 = arith.constant 1 : index
    %c0_7 = arith.constant 0 : index
    %c0_8 = arith.constant 0 : index
    %13 = vector.load %arg2[%c1, %c0_7, %c0_8] : memref<9x8x8xbf16, #tpu.memory_space<vmem>>, vector<1x8x8xbf16>
    %14 = vector.shape_cast %13 : vector<1x8x8xbf16> to vector<8x8xbf16>
    %cst_9 = arith.constant dense<0.000000e+00> : vector<8x128xf32>
    %15 = tpu.matmul %14, %12, %cst_9 {dimension_numbers = #tpu.dot_dimension_numbers<[1], [0], [0], [1], [0, 0, 1, 1], [], []>} : vector<8x8xbf16>, vector<8x128xbf16>, vector<8x128xf32> -> vector<8x128xf32>
    %16 = arith.addf %11, %15 : vector<8x128xf32>
    %c0_10 = arith.constant 0 : index
    %c111 = arith.constant 111 : index
    %17 = vector.load %arg6[%c0_10, %c111] : memref<8x384xbf16, #tpu.memory_space<vmem>>, vector<8x128xbf16>
    %c2 = arith.constant 2 : index
    %c0_11 = arith.constant 0 : index
    %c0_12 = arith.constant 0 : index
    %18 = vector.load %arg2[%c2, %c0_11, %c0_12] : memref<9x8x8xbf16, #tpu.memory_space<vmem>>, vector<1x8x8xbf16>
    %19 = vector.shape_cast %18 : vector<1x8x8xbf16> to vector<8x8xbf16>
    %cst_13 = arith.constant dense<0.000000e+00> : vector<8x128xf32>
    %20 = tpu.matmul %19, %17, %cst_13 {dimension_numbers = #tpu.dot_dimension_numbers<[1], [0], [0], [1], [0, 0, 1, 1], [], []>} : vector<8x8xbf16>, vector<8x128xbf16>, vector<8x128xf32> -> vector<8x128xf32>
    %21 = arith.addf %16, %20 : vector<8x128xf32>
    %c0_14 = arith.constant 0 : index
    %c127 = arith.constant 127 : index
    %22 = vector.load %arg6[%c0_14, %c127] : memref<8x384xbf16, #tpu.memory_space<vmem>>, vector<8x128xbf16>
    %c3 = arith.constant 3 : index
    %c0_15 = arith.constant 0 : index
    %c0_16 = arith.constant 0 : index
    %23 = vector.load %arg2[%c3, %c0_15, %c0_16] : memref<9x8x8xbf16, #tpu.memory_space<vmem>>, vector<1x8x8xbf16>
    %24 = vector.shape_cast %23 : vector<1x8x8xbf16> to vector<8x8xbf16>
    %cst_17 = arith.constant dense<0.000000e+00> : vector<8x128xf32>
    %25 = tpu.matmul %24, %22, %cst_17 {dimension_numbers = #tpu.dot_dimension_numbers<[1], [0], [0], [1], [0, 0, 1, 1], [], []>} : vector<8x8xbf16>, vector<8x128xbf16>, vector<8x128xf32> -> vector<8x128xf32>
    %26 = arith.addf %21, %25 : vector<8x128xf32>
    %c0_18 = arith.constant 0 : index
    %c128 = arith.constant 128 : index
    %27 = vector.load %arg6[%c0_18, %c128] : memref<8x384xbf16, #tpu.memory_space<vmem>>, vector<8x128xbf16>
    %c4 = arith.constant 4 : index
    %c0_19 = arith.constant 0 : index
    %c0_20 = arith.constant 0 : index
    %28 = vector.load %arg2[%c4, %c0_19, %c0_20] : memref<9x8x8xbf16, #tpu.memory_space<vmem>>, vector<1x8x8xbf16>
    %29 = vector.shape_cast %28 : vector<1x8x8xbf16> to vector<8x8xbf16>
    %cst_21 = arith.constant dense<0.000000e+00> : vector<8x128xf32>
    %30 = tpu.matmul %29, %27, %cst_21 {dimension_numbers = #tpu.dot_dimension_numbers<[1], [0], [0], [1], [0, 0, 1, 1], [], []>} : vector<8x8xbf16>, vector<8x128xbf16>, vector<8x128xf32> -> vector<8x128xf32>
    %31 = arith.addf %26, %30 : vector<8x128xf32>
    %c0_22 = arith.constant 0 : index
    %c129 = arith.constant 129 : index
    %32 = vector.load %arg6[%c0_22, %c129] : memref<8x384xbf16, #tpu.memory_space<vmem>>, vector<8x128xbf16>
    %c5 = arith.constant 5 : index
    %c0_23 = arith.constant 0 : index
    %c0_24 = arith.constant 0 : index
    %33 = vector.load %arg2[%c5, %c0_23, %c0_24] : memref<9x8x8xbf16, #tpu.memory_space<vmem>>, vector<1x8x8xbf16>
    %34 = vector.shape_cast %33 : vector<1x8x8xbf16> to vector<8x8xbf16>
    %cst_25 = arith.constant dense<0.000000e+00> : vector<8x128xf32>
    %35 = tpu.matmul %34, %32, %cst_25 {dimension_numbers = #tpu.dot_dimension_numbers<[1], [0], [0], [1], [0, 0, 1, 1], [], []>} : vector<8x8xbf16>, vector<8x128xbf16>, vector<8x128xf32> -> vector<8x128xf32>
    %36 = arith.addf %31, %35 : vector<8x128xf32>
    %c0_26 = arith.constant 0 : index
    %c145 = arith.constant 145 : index
    %37 = vector.load %arg6[%c0_26, %c145] : memref<8x384xbf16, #tpu.memory_space<vmem>>, vector<8x128xbf16>
    %c6 = arith.constant 6 : index
    %c0_27 = arith.constant 0 : index
    %c0_28 = arith.constant 0 : index
    %38 = vector.load %arg2[%c6, %c0_27, %c0_28] : memref<9x8x8xbf16, #tpu.memory_space<vmem>>, vector<1x8x8xbf16>
    %39 = vector.shape_cast %38 : vector<1x8x8xbf16> to vector<8x8xbf16>
    %cst_29 = arith.constant dense<0.000000e+00> : vector<8x128xf32>
    %40 = tpu.matmul %39, %37, %cst_29 {dimension_numbers = #tpu.dot_dimension_numbers<[1], [0], [0], [1], [0, 0, 1, 1], [], []>} : vector<8x8xbf16>, vector<8x128xbf16>, vector<8x128xf32> -> vector<8x128xf32>
    %41 = arith.addf %36, %40 : vector<8x128xf32>
    %c0_30 = arith.constant 0 : index
    %c146 = arith.constant 146 : index
    %42 = vector.load %arg6[%c0_30, %c146] : memref<8x384xbf16, #tpu.memory_space<vmem>>, vector<8x128xbf16>
    %c7 = arith.constant 7 : index
    %c0_31 = arith.constant 0 : index
    %c0_32 = arith.constant 0 : index
    %43 = vector.load %arg2[%c7, %c0_31, %c0_32] : memref<9x8x8xbf16, #tpu.memory_space<vmem>>, vector<1x8x8xbf16>
    %44 = vector.shape_cast %43 : vector<1x8x8xbf16> to vector<8x8xbf16>
    %cst_33 = arith.constant dense<0.000000e+00> : vector<8x128xf32>
    %45 = tpu.matmul %44, %42, %cst_33 {dimension_numbers = #tpu.dot_dimension_numbers<[1], [0], [0], [1], [0, 0, 1, 1], [], []>} : vector<8x8xbf16>, vector<8x128xbf16>, vector<8x128xf32> -> vector<8x128xf32>
    %46 = arith.addf %41, %45 : vector<8x128xf32>
    %c0_34 = arith.constant 0 : index
    %c147 = arith.constant 147 : index
    %47 = vector.load %arg6[%c0_34, %c147] : memref<8x384xbf16, #tpu.memory_space<vmem>>, vector<8x128xbf16>
    %c8 = arith.constant 8 : index
    %c0_35 = arith.constant 0 : index
    %c0_36 = arith.constant 0 : index
    %48 = vector.load %arg2[%c8, %c0_35, %c0_36] : memref<9x8x8xbf16, #tpu.memory_space<vmem>>, vector<1x8x8xbf16>
    %49 = vector.shape_cast %48 : vector<1x8x8xbf16> to vector<8x8xbf16>
    %cst_37 = arith.constant dense<0.000000e+00> : vector<8x128xf32>
    %50 = tpu.matmul %49, %47, %cst_37 {dimension_numbers = #tpu.dot_dimension_numbers<[1], [0], [0], [1], [0, 0, 1, 1], [], []>} : vector<8x8xbf16>, vector<8x128xbf16>, vector<8x128xf32> -> vector<8x128xf32>
    %51 = arith.addf %46, %50 : vector<8x128xf32>
    %c0_38 = arith.constant 0 : index
    %c0_39 = arith.constant 0 : index
    %52 = vector.load %arg3[%c0_38, %c0_39] : memref<8x1xf32, #tpu.memory_space<vmem>>, vector<8x1xf32>
    %53 = vector.broadcast %52 : vector<8x1xf32> to vector<8x128xf32>
    %54 = arith.addf %51, %53 : vector<8x128xf32>
    %cst_40 = arith.constant 0.000000e+00 : f32
    %55 = vector.broadcast %cst_40 : f32 to vector<8x128xf32>
    %56 = arith.maximumf %54, %55 : vector<8x128xf32>
    %c0_41 = arith.constant 0 : index
    %c0_42 = arith.constant 0 : index
    %57 = vector.load %arg4[%c0_41, %c0_42] : memref<1x128xf32, #tpu.memory_space<vmem>>, vector<1x128xf32>
    %cst_43 = arith.constant 5.000000e-01 : f32
    %58 = vector.broadcast %cst_43 : f32 to vector<1x128xf32>
    %59 = arith.cmpf ogt, %57, %58 : vector<1x128xf32>
    %cst_44 = arith.constant 0.000000e+00 : f32
    %60 = vector.shape_cast %59 : vector<1x128xi1> to vector<1x128xi1>
    %61 = vector.broadcast %60 : vector<1x128xi1> to vector<8x128xi1>
    %62 = vector.broadcast %cst_44 : f32 to vector<8x128xf32>
    %63 = arith.select %61, %56, %62 : vector<8x128xi1>, vector<8x128xf32>
    %64 = arith.truncf %63 : vector<8x128xf32> to vector<8x128xbf16>
    %c0_45 = arith.constant 0 : index
    %c0_46 = arith.constant 0 : index
    %65 = vector.load %arg5[%c0_45, %c0_46] : memref<8x128xbf16, #tpu.memory_space<vmem>>, vector<8x128xbf16>
    tpu.vector_store %arg5[%c0_45, %c0_46], %64 {strides = array<i32>} : memref<8x128xbf16, #tpu.memory_space<vmem>>, vector<8x128xbf16>,
    return
  }
  func.func @transform_1(%arg0: i32) -> (i32, i32, i32) {
    %c0_i32 = arith.constant 0 : i32
    %c0_i32_0 = arith.constant 0 : i32
    %c0_i32_1 = arith.constant 0 : i32
    %c0_i32_2 = arith.constant 0 : i32
    return %c0_i32, %c0_i32_0, %c0_i32_1 : i32, i32, i32
  }
  func.func @transform_2(%arg0: i32) -> (i32, i32) {
    %c0_i32 = arith.constant 0 : i32
    %c0_i32_0 = arith.constant 0 : i32
    %c0_i32_1 = arith.constant 0 : i32
    return %c0_i32, %c0_i32_0 : i32, i32
  }
  func.func @transform_3(%arg0: i32) -> (i32, i32) {
    %c1_i32 = arith.constant 1 : i32
    %0 = arith.addi %arg0, %c1_i32 : i32
    %c0_i32 = arith.constant 0 : i32
    %c0_i32_0 = arith.constant 0 : i32
    return %c0_i32, %0 : i32, i32
  }
  func.func @transform_4(%arg0: i32) -> (i32, i32) {
    %c1_i32 = arith.constant 1 : i32
    %0 = arith.addi %arg0, %c1_i32 : i32
    %c0_i32 = arith.constant 0 : i32
    %c0_i32_0 = arith.constant 0 : i32
    return %c0_i32, %0 : i32, i32
  }
}

module attributes {stable_mosaic.version = 11 : i64} {
  func.func @_conv3x3_kernel(%arg0: i32, %arg1: memref<8x640xbf16, #tpu.memory_space<any>>, %arg2: memref<9x8x8xbf16, #tpu.memory_space<vmem>>, %arg3: memref<8x1xf32, #tpu.memory_space<vmem>>, %arg4: memref<1x128xf32, #tpu.memory_space<vmem>>, %arg5: memref<8x128xbf16, #tpu.memory_space<vmem>>, %arg6: memref<8x128xbf16, #tpu.memory_space<vmem>>, %arg7: memref<8x384xbf16, #tpu.memory_space<vmem>>, %arg8: memref<!tpu.dma_semaphore, #tpu.memory_space<semaphore_mem>>) attributes {dimension_semantics = [#tpu.dimension_semantics<parallel>], iteration_bounds = array<i64: 3>, scalar_prefetch = 0 : i64, scratch_operands = 2 : i64, tpu.core_type = #tpu.core_type<tc>, window_params = [{}, {pipeline_mode = #tpu.pipeline_mode<synchronous>, transform_indices = @transform_1, window_bounds = array<i64: 9, 8, 8>}, {pipeline_mode = #tpu.pipeline_mode<synchronous>, transform_indices = @transform_2, window_bounds = array<i64: 8, 1>}, {transform_indices = @transform_3, window_bounds = array<i64: 1, 128>}, {transform_indices = @transform_4, window_bounds = array<i64: 8, 128>}, {transform_indices = @transform_5, window_bounds = array<i64: 8, 128>}]} {
    %c1_i32 = arith.constant 1 : i32
    %0 = arith.addi %arg0, %c1_i32 : i32
    %c128_i32 = arith.constant 128 : i32
    %1 = arith.muli %0, %c128_i32 : i32
    %c128_i32_0 = arith.constant 128 : i32
    %2 = arith.subi %1, %c128_i32_0 : i32
    %3 = tpu.assume_multiple %2, 128 : i32
    %c0_i32 = arith.constant 0 : i32
    %4 = tpu.memref_slice %arg1[%c0_i32, %3] : memref<8x640xbf16, #tpu.memory_space<any>> -> memref<8x384xbf16, #tpu.memory_space<any>>
    tpu.enqueue_dma source(%4 : memref<8x384xbf16, #tpu.memory_space<any>>) target(%arg7 : memref<8x384xbf16, #tpu.memory_space<vmem>>) target_semaphore(%arg8 : memref<!tpu.dma_semaphore, #tpu.memory_space<semaphore_mem>>)
    %c0_i32_1 = arith.constant 0 : i32
    %5 = tpu.memref_slice %arg1[%c0_i32_1, %3] : memref<8x640xbf16, #tpu.memory_space<any>> -> memref<8x384xbf16, #tpu.memory_space<any>>
    tpu.wait_dma2 semaphore(%arg8 : memref<!tpu.dma_semaphore, #tpu.memory_space<semaphore_mem>>) src(%5 : memref<8x384xbf16, #tpu.memory_space<any>>) dst(%arg7 : memref<8x384xbf16, #tpu.memory_space<vmem>>)
    %cst = arith.constant 0.000000e+00 : f32
    %6 = vector.broadcast %cst : f32 to vector<8x128xf32>
    %c0 = arith.constant 0 : index
    %c109 = arith.constant 109 : index
    %7 = vector.load %arg7[%c0, %c109] : memref<8x384xbf16, #tpu.memory_space<vmem>>, vector<8x128xbf16>
    %c0_2 = arith.constant 0 : index
    %c0_3 = arith.constant 0 : index
    %c0_4 = arith.constant 0 : index
    %8 = vector.load %arg2[%c0_2, %c0_3, %c0_4] : memref<9x8x8xbf16, #tpu.memory_space<vmem>>, vector<1x8x8xbf16>
    %9 = vector.shape_cast %8 : vector<1x8x8xbf16> to vector<8x8xbf16>
    %cst_5 = arith.constant dense<0.000000e+00> : vector<8x128xf32>
    %10 = tpu.matmul %9, %7, %cst_5 {dimension_numbers = #tpu.dot_dimension_numbers<[1], [0], [0], [1], [0, 0, 1, 1], [], []>} : vector<8x8xbf16>, vector<8x128xbf16>, vector<8x128xf32> -> vector<8x128xf32>
    %11 = arith.addf %6, %10 : vector<8x128xf32>
    %c0_6 = arith.constant 0 : index
    %c110 = arith.constant 110 : index
    %12 = vector.load %arg7[%c0_6, %c110] : memref<8x384xbf16, #tpu.memory_space<vmem>>, vector<8x128xbf16>
    %c1 = arith.constant 1 : index
    %c0_7 = arith.constant 0 : index
    %c0_8 = arith.constant 0 : index
    %13 = vector.load %arg2[%c1, %c0_7, %c0_8] : memref<9x8x8xbf16, #tpu.memory_space<vmem>>, vector<1x8x8xbf16>
    %14 = vector.shape_cast %13 : vector<1x8x8xbf16> to vector<8x8xbf16>
    %cst_9 = arith.constant dense<0.000000e+00> : vector<8x128xf32>
    %15 = tpu.matmul %14, %12, %cst_9 {dimension_numbers = #tpu.dot_dimension_numbers<[1], [0], [0], [1], [0, 0, 1, 1], [], []>} : vector<8x8xbf16>, vector<8x128xbf16>, vector<8x128xf32> -> vector<8x128xf32>
    %16 = arith.addf %11, %15 : vector<8x128xf32>
    %c0_10 = arith.constant 0 : index
    %c111 = arith.constant 111 : index
    %17 = vector.load %arg7[%c0_10, %c111] : memref<8x384xbf16, #tpu.memory_space<vmem>>, vector<8x128xbf16>
    %c2 = arith.constant 2 : index
    %c0_11 = arith.constant 0 : index
    %c0_12 = arith.constant 0 : index
    %18 = vector.load %arg2[%c2, %c0_11, %c0_12] : memref<9x8x8xbf16, #tpu.memory_space<vmem>>, vector<1x8x8xbf16>
    %19 = vector.shape_cast %18 : vector<1x8x8xbf16> to vector<8x8xbf16>
    %cst_13 = arith.constant dense<0.000000e+00> : vector<8x128xf32>
    %20 = tpu.matmul %19, %17, %cst_13 {dimension_numbers = #tpu.dot_dimension_numbers<[1], [0], [0], [1], [0, 0, 1, 1], [], []>} : vector<8x8xbf16>, vector<8x128xbf16>, vector<8x128xf32> -> vector<8x128xf32>
    %21 = arith.addf %16, %20 : vector<8x128xf32>
    %c0_14 = arith.constant 0 : index
    %c127 = arith.constant 127 : index
    %22 = vector.load %arg7[%c0_14, %c127] : memref<8x384xbf16, #tpu.memory_space<vmem>>, vector<8x128xbf16>
    %c3 = arith.constant 3 : index
    %c0_15 = arith.constant 0 : index
    %c0_16 = arith.constant 0 : index
    %23 = vector.load %arg2[%c3, %c0_15, %c0_16] : memref<9x8x8xbf16, #tpu.memory_space<vmem>>, vector<1x8x8xbf16>
    %24 = vector.shape_cast %23 : vector<1x8x8xbf16> to vector<8x8xbf16>
    %cst_17 = arith.constant dense<0.000000e+00> : vector<8x128xf32>
    %25 = tpu.matmul %24, %22, %cst_17 {dimension_numbers = #tpu.dot_dimension_numbers<[1], [0], [0], [1], [0, 0, 1, 1], [], []>} : vector<8x8xbf16>, vector<8x128xbf16>, vector<8x128xf32> -> vector<8x128xf32>
    %26 = arith.addf %21, %25 : vector<8x128xf32>
    %c0_18 = arith.constant 0 : index
    %c128 = arith.constant 128 : index
    %27 = vector.load %arg7[%c0_18, %c128] : memref<8x384xbf16, #tpu.memory_space<vmem>>, vector<8x128xbf16>
    %c4 = arith.constant 4 : index
    %c0_19 = arith.constant 0 : index
    %c0_20 = arith.constant 0 : index
    %28 = vector.load %arg2[%c4, %c0_19, %c0_20] : memref<9x8x8xbf16, #tpu.memory_space<vmem>>, vector<1x8x8xbf16>
    %29 = vector.shape_cast %28 : vector<1x8x8xbf16> to vector<8x8xbf16>
    %cst_21 = arith.constant dense<0.000000e+00> : vector<8x128xf32>
    %30 = tpu.matmul %29, %27, %cst_21 {dimension_numbers = #tpu.dot_dimension_numbers<[1], [0], [0], [1], [0, 0, 1, 1], [], []>} : vector<8x8xbf16>, vector<8x128xbf16>, vector<8x128xf32> -> vector<8x128xf32>
    %31 = arith.addf %26, %30 : vector<8x128xf32>
    %c0_22 = arith.constant 0 : index
    %c129 = arith.constant 129 : index
    %32 = vector.load %arg7[%c0_22, %c129] : memref<8x384xbf16, #tpu.memory_space<vmem>>, vector<8x128xbf16>
    %c5 = arith.constant 5 : index
    %c0_23 = arith.constant 0 : index
    %c0_24 = arith.constant 0 : index
    %33 = vector.load %arg2[%c5, %c0_23, %c0_24] : memref<9x8x8xbf16, #tpu.memory_space<vmem>>, vector<1x8x8xbf16>
    %34 = vector.shape_cast %33 : vector<1x8x8xbf16> to vector<8x8xbf16>
    %cst_25 = arith.constant dense<0.000000e+00> : vector<8x128xf32>
    %35 = tpu.matmul %34, %32, %cst_25 {dimension_numbers = #tpu.dot_dimension_numbers<[1], [0], [0], [1], [0, 0, 1, 1], [], []>} : vector<8x8xbf16>, vector<8x128xbf16>, vector<8x128xf32> -> vector<8x128xf32>
    %36 = arith.addf %31, %35 : vector<8x128xf32>
    %c0_26 = arith.constant 0 : index
    %c145 = arith.constant 145 : index
    %37 = vector.load %arg7[%c0_26, %c145] : memref<8x384xbf16, #tpu.memory_space<vmem>>, vector<8x128xbf16>
    %c6 = arith.constant 6 : index
    %c0_27 = arith.constant 0 : index
    %c0_28 = arith.constant 0 : index
    %38 = vector.load %arg2[%c6, %c0_27, %c0_28] : memref<9x8x8xbf16, #tpu.memory_space<vmem>>, vector<1x8x8xbf16>
    %39 = vector.shape_cast %38 : vector<1x8x8xbf16> to vector<8x8xbf16>
    %cst_29 = arith.constant dense<0.000000e+00> : vector<8x128xf32>
    %40 = tpu.matmul %39, %37, %cst_29 {dimension_numbers = #tpu.dot_dimension_numbers<[1], [0], [0], [1], [0, 0, 1, 1], [], []>} : vector<8x8xbf16>, vector<8x128xbf16>, vector<8x128xf32> -> vector<8x128xf32>
    %41 = arith.addf %36, %40 : vector<8x128xf32>
    %c0_30 = arith.constant 0 : index
    %c146 = arith.constant 146 : index
    %42 = vector.load %arg7[%c0_30, %c146] : memref<8x384xbf16, #tpu.memory_space<vmem>>, vector<8x128xbf16>
    %c7 = arith.constant 7 : index
    %c0_31 = arith.constant 0 : index
    %c0_32 = arith.constant 0 : index
    %43 = vector.load %arg2[%c7, %c0_31, %c0_32] : memref<9x8x8xbf16, #tpu.memory_space<vmem>>, vector<1x8x8xbf16>
    %44 = vector.shape_cast %43 : vector<1x8x8xbf16> to vector<8x8xbf16>
    %cst_33 = arith.constant dense<0.000000e+00> : vector<8x128xf32>
    %45 = tpu.matmul %44, %42, %cst_33 {dimension_numbers = #tpu.dot_dimension_numbers<[1], [0], [0], [1], [0, 0, 1, 1], [], []>} : vector<8x8xbf16>, vector<8x128xbf16>, vector<8x128xf32> -> vector<8x128xf32>
    %46 = arith.addf %41, %45 : vector<8x128xf32>
    %c0_34 = arith.constant 0 : index
    %c147 = arith.constant 147 : index
    %47 = vector.load %arg7[%c0_34, %c147] : memref<8x384xbf16, #tpu.memory_space<vmem>>, vector<8x128xbf16>
    %c8 = arith.constant 8 : index
    %c0_35 = arith.constant 0 : index
    %c0_36 = arith.constant 0 : index
    %48 = vector.load %arg2[%c8, %c0_35, %c0_36] : memref<9x8x8xbf16, #tpu.memory_space<vmem>>, vector<1x8x8xbf16>
    %49 = vector.shape_cast %48 : vector<1x8x8xbf16> to vector<8x8xbf16>
    %cst_37 = arith.constant dense<0.000000e+00> : vector<8x128xf32>
    %50 = tpu.matmul %49, %47, %cst_37 {dimension_numbers = #tpu.dot_dimension_numbers<[1], [0], [0], [1], [0, 0, 1, 1], [], []>} : vector<8x8xbf16>, vector<8x128xbf16>, vector<8x128xf32> -> vector<8x128xf32>
    %51 = arith.addf %46, %50 : vector<8x128xf32>
    %c0_38 = arith.constant 0 : index
    %c0_39 = arith.constant 0 : index
    %52 = vector.load %arg3[%c0_38, %c0_39] : memref<8x1xf32, #tpu.memory_space<vmem>>, vector<8x1xf32>
    %53 = vector.broadcast %52 : vector<8x1xf32> to vector<8x128xf32>
    %54 = arith.addf %51, %53 : vector<8x128xf32>
    %c0_40 = arith.constant 0 : index
    %c0_41 = arith.constant 0 : index
    %55 = vector.load %arg5[%c0_40, %c0_41] : memref<8x128xbf16, #tpu.memory_space<vmem>>, vector<8x128xbf16>
    %56 = arith.extf %55 : vector<8x128xbf16> to vector<8x128xf32>
    %57 = arith.addf %54, %56 : vector<8x128xf32>
    %cst_42 = arith.constant 0.000000e+00 : f32
    %58 = vector.broadcast %cst_42 : f32 to vector<8x128xf32>
    %59 = arith.maximumf %57, %58 : vector<8x128xf32>
    %c0_43 = arith.constant 0 : index
    %c0_44 = arith.constant 0 : index
    %60 = vector.load %arg4[%c0_43, %c0_44] : memref<1x128xf32, #tpu.memory_space<vmem>>, vector<1x128xf32>
    %cst_45 = arith.constant 5.000000e-01 : f32
    %61 = vector.broadcast %cst_45 : f32 to vector<1x128xf32>
    %62 = arith.cmpf ogt, %60, %61 : vector<1x128xf32>
    %cst_46 = arith.constant 0.000000e+00 : f32
    %63 = vector.shape_cast %62 : vector<1x128xi1> to vector<1x128xi1>
    %64 = vector.broadcast %63 : vector<1x128xi1> to vector<8x128xi1>
    %65 = vector.broadcast %cst_46 : f32 to vector<8x128xf32>
    %66 = arith.select %64, %59, %65 : vector<8x128xi1>, vector<8x128xf32>
    %67 = arith.truncf %66 : vector<8x128xf32> to vector<8x128xbf16>
    %c0_47 = arith.constant 0 : index
    %c0_48 = arith.constant 0 : index
    %68 = vector.load %arg6[%c0_47, %c0_48] : memref<8x128xbf16, #tpu.memory_space<vmem>>, vector<8x128xbf16>
    tpu.vector_store %arg6[%c0_47, %c0_48], %67 {strides = array<i32>} : memref<8x128xbf16, #tpu.memory_space<vmem>>, vector<8x128xbf16>,
    return
  }
  func.func @transform_1(%arg0: i32) -> (i32, i32, i32) {
    %c0_i32 = arith.constant 0 : i32
    %c0_i32_0 = arith.constant 0 : i32
    %c0_i32_1 = arith.constant 0 : i32
    %c0_i32_2 = arith.constant 0 : i32
    return %c0_i32, %c0_i32_0, %c0_i32_1 : i32, i32, i32
  }
  func.func @transform_2(%arg0: i32) -> (i32, i32) {
    %c0_i32 = arith.constant 0 : i32
    %c0_i32_0 = arith.constant 0 : i32
    %c0_i32_1 = arith.constant 0 : i32
    return %c0_i32, %c0_i32_0 : i32, i32
  }
  func.func @transform_3(%arg0: i32) -> (i32, i32) {
    %c1_i32 = arith.constant 1 : i32
    %0 = arith.addi %arg0, %c1_i32 : i32
    %c0_i32 = arith.constant 0 : i32
    %c0_i32_0 = arith.constant 0 : i32
    return %c0_i32, %0 : i32, i32
  }
  func.func @transform_4(%arg0: i32) -> (i32, i32) {
    %c1_i32 = arith.constant 1 : i32
    %0 = arith.addi %arg0, %c1_i32 : i32
    %c0_i32 = arith.constant 0 : i32
    %c0_i32_0 = arith.constant 0 : i32
    return %c0_i32, %0 : i32, i32
  }
  func.func @transform_5(%arg0: i32) -> (i32, i32) {
    %c1_i32 = arith.constant 1 : i32
    %0 = arith.addi %arg0, %c1_i32 : i32
    %c0_i32 = arith.constant 0 : i32
    %c0_i32_0 = arith.constant 0 : i32
    return %c0_i32, %0 : i32, i32
  }
}

module attributes {stable_mosaic.version = 11 : i64} {
  func.func @_conv3x3_kernel(%arg0: i32, %arg1: memref<8x1792xbf16, #tpu.memory_space<any>>, %arg2: memref<9x8x8xbf16, #tpu.memory_space<vmem>>, %arg3: memref<8x1xf32, #tpu.memory_space<vmem>>, %arg4: memref<1x256xf32, #tpu.memory_space<vmem>>, %arg5: memref<8x256xbf16, #tpu.memory_space<vmem>>, %arg6: memref<8x256xbf16, #tpu.memory_space<vmem>>, %arg7: memref<8x512xbf16, #tpu.memory_space<vmem>>, %arg8: memref<!tpu.dma_semaphore, #tpu.memory_space<semaphore_mem>>) attributes {dimension_semantics = [#tpu.dimension_semantics<parallel>], iteration_bounds = array<i64: 5>, scalar_prefetch = 0 : i64, scratch_operands = 2 : i64, tpu.core_type = #tpu.core_type<tc>, window_params = [{}, {pipeline_mode = #tpu.pipeline_mode<synchronous>, transform_indices = @transform_1, window_bounds = array<i64: 9, 8, 8>}, {pipeline_mode = #tpu.pipeline_mode<synchronous>, transform_indices = @transform_2, window_bounds = array<i64: 8, 1>}, {transform_indices = @transform_3, window_bounds = array<i64: 1, 256>}, {transform_indices = @transform_4, window_bounds = array<i64: 8, 256>}, {transform_indices = @transform_5, window_bounds = array<i64: 8, 256>}]} {
    %c1_i32 = arith.constant 1 : i32
    %0 = arith.addi %arg0, %c1_i32 : i32
    %c256_i32 = arith.constant 256 : i32
    %1 = arith.muli %0, %c256_i32 : i32
    %c128_i32 = arith.constant 128 : i32
    %2 = arith.subi %1, %c128_i32 : i32
    %3 = tpu.assume_multiple %2, 128 : i32
    %c0_i32 = arith.constant 0 : i32
    %4 = tpu.memref_slice %arg1[%c0_i32, %3] : memref<8x1792xbf16, #tpu.memory_space<any>> -> memref<8x512xbf16, #tpu.memory_space<any>>
    tpu.enqueue_dma source(%4 : memref<8x512xbf16, #tpu.memory_space<any>>) target(%arg7 : memref<8x512xbf16, #tpu.memory_space<vmem>>) target_semaphore(%arg8 : memref<!tpu.dma_semaphore, #tpu.memory_space<semaphore_mem>>)
    %c0_i32_0 = arith.constant 0 : i32
    %5 = tpu.memref_slice %arg1[%c0_i32_0, %3] : memref<8x1792xbf16, #tpu.memory_space<any>> -> memref<8x512xbf16, #tpu.memory_space<any>>
    tpu.wait_dma2 semaphore(%arg8 : memref<!tpu.dma_semaphore, #tpu.memory_space<semaphore_mem>>) src(%5 : memref<8x512xbf16, #tpu.memory_space<any>>) dst(%arg7 : memref<8x512xbf16, #tpu.memory_space<vmem>>)
    %cst = arith.constant 0.000000e+00 : f32
    %6 = vector.broadcast %cst : f32 to vector<8x256xf32>
    %c0 = arith.constant 0 : index
    %c93 = arith.constant 93 : index
    %7 = vector.load %arg7[%c0, %c93] : memref<8x512xbf16, #tpu.memory_space<vmem>>, vector<8x256xbf16>
    %c0_1 = arith.constant 0 : index
    %c0_2 = arith.constant 0 : index
    %c0_3 = arith.constant 0 : index
    %8 = vector.load %arg2[%c0_1, %c0_2, %c0_3] : memref<9x8x8xbf16, #tpu.memory_space<vmem>>, vector<1x8x8xbf16>
    %9 = vector.shape_cast %8 : vector<1x8x8xbf16> to vector<8x8xbf16>
    %cst_4 = arith.constant dense<0.000000e+00> : vector<8x256xf32>
    %10 = tpu.matmul %9, %7, %cst_4 {dimension_numbers = #tpu.dot_dimension_numbers<[1], [0], [0], [1], [0, 0, 1, 1], [], []>} : vector<8x8xbf16>, vector<8x256xbf16>, vector<8x256xf32> -> vector<8x256xf32>
    %11 = arith.addf %6, %10 : vector<8x256xf32>
    %c0_5 = arith.constant 0 : index
    %c94 = arith.constant 94 : index
    %12 = vector.load %arg7[%c0_5, %c94] : memref<8x512xbf16, #tpu.memory_space<vmem>>, vector<8x256xbf16>
    %c1 = arith.constant 1 : index
    %c0_6 = arith.constant 0 : index
    %c0_7 = arith.constant 0 : index
    %13 = vector.load %arg2[%c1, %c0_6, %c0_7] : memref<9x8x8xbf16, #tpu.memory_space<vmem>>, vector<1x8x8xbf16>
    %14 = vector.shape_cast %13 : vector<1x8x8xbf16> to vector<8x8xbf16>
    %cst_8 = arith.constant dense<0.000000e+00> : vector<8x256xf32>
    %15 = tpu.matmul %14, %12, %cst_8 {dimension_numbers = #tpu.dot_dimension_numbers<[1], [0], [0], [1], [0, 0, 1, 1], [], []>} : vector<8x8xbf16>, vector<8x256xbf16>, vector<8x256xf32> -> vector<8x256xf32>
    %16 = arith.addf %11, %15 : vector<8x256xf32>
    %c0_9 = arith.constant 0 : index
    %c95 = arith.constant 95 : index
    %17 = vector.load %arg7[%c0_9, %c95] : memref<8x512xbf16, #tpu.memory_space<vmem>>, vector<8x256xbf16>
    %c2 = arith.constant 2 : index
    %c0_10 = arith.constant 0 : index
    %c0_11 = arith.constant 0 : index
    %18 = vector.load %arg2[%c2, %c0_10, %c0_11] : memref<9x8x8xbf16, #tpu.memory_space<vmem>>, vector<1x8x8xbf16>
    %19 = vector.shape_cast %18 : vector<1x8x8xbf16> to vector<8x8xbf16>
    %cst_12 = arith.constant dense<0.000000e+00> : vector<8x256xf32>
    %20 = tpu.matmul %19, %17, %cst_12 {dimension_numbers = #tpu.dot_dimension_numbers<[1], [0], [0], [1], [0, 0, 1, 1], [], []>} : vector<8x8xbf16>, vector<8x256xbf16>, vector<8x256xf32> -> vector<8x256xf32>
    %21 = arith.addf %16, %20 : vector<8x256xf32>
    %c0_13 = arith.constant 0 : index
    %c127 = arith.constant 127 : index
    %22 = vector.load %arg7[%c0_13, %c127] : memref<8x512xbf16, #tpu.memory_space<vmem>>, vector<8x256xbf16>
    %c3 = arith.constant 3 : index
    %c0_14 = arith.constant 0 : index
    %c0_15 = arith.constant 0 : index
    %23 = vector.load %arg2[%c3, %c0_14, %c0_15] : memref<9x8x8xbf16, #tpu.memory_space<vmem>>, vector<1x8x8xbf16>
    %24 = vector.shape_cast %23 : vector<1x8x8xbf16> to vector<8x8xbf16>
    %cst_16 = arith.constant dense<0.000000e+00> : vector<8x256xf32>
    %25 = tpu.matmul %24, %22, %cst_16 {dimension_numbers = #tpu.dot_dimension_numbers<[1], [0], [0], [1], [0, 0, 1, 1], [], []>} : vector<8x8xbf16>, vector<8x256xbf16>, vector<8x256xf32> -> vector<8x256xf32>
    %26 = arith.addf %21, %25 : vector<8x256xf32>
    %c0_17 = arith.constant 0 : index
    %c128 = arith.constant 128 : index
    %27 = vector.load %arg7[%c0_17, %c128] : memref<8x512xbf16, #tpu.memory_space<vmem>>, vector<8x256xbf16>
    %c4 = arith.constant 4 : index
    %c0_18 = arith.constant 0 : index
    %c0_19 = arith.constant 0 : index
    %28 = vector.load %arg2[%c4, %c0_18, %c0_19] : memref<9x8x8xbf16, #tpu.memory_space<vmem>>, vector<1x8x8xbf16>
    %29 = vector.shape_cast %28 : vector<1x8x8xbf16> to vector<8x8xbf16>
    %cst_20 = arith.constant dense<0.000000e+00> : vector<8x256xf32>
    %30 = tpu.matmul %29, %27, %cst_20 {dimension_numbers = #tpu.dot_dimension_numbers<[1], [0], [0], [1], [0, 0, 1, 1], [], []>} : vector<8x8xbf16>, vector<8x256xbf16>, vector<8x256xf32> -> vector<8x256xf32>
    %31 = arith.addf %26, %30 : vector<8x256xf32>
    %c0_21 = arith.constant 0 : index
    %c129 = arith.constant 129 : index
    %32 = vector.load %arg7[%c0_21, %c129] : memref<8x512xbf16, #tpu.memory_space<vmem>>, vector<8x256xbf16>
    %c5 = arith.constant 5 : index
    %c0_22 = arith.constant 0 : index
    %c0_23 = arith.constant 0 : index
    %33 = vector.load %arg2[%c5, %c0_22, %c0_23] : memref<9x8x8xbf16, #tpu.memory_space<vmem>>, vector<1x8x8xbf16>
    %34 = vector.shape_cast %33 : vector<1x8x8xbf16> to vector<8x8xbf16>
    %cst_24 = arith.constant dense<0.000000e+00> : vector<8x256xf32>
    %35 = tpu.matmul %34, %32, %cst_24 {dimension_numbers = #tpu.dot_dimension_numbers<[1], [0], [0], [1], [0, 0, 1, 1], [], []>} : vector<8x8xbf16>, vector<8x256xbf16>, vector<8x256xf32> -> vector<8x256xf32>
    %36 = arith.addf %31, %35 : vector<8x256xf32>
    %c0_25 = arith.constant 0 : index
    %c161 = arith.constant 161 : index
    %37 = vector.load %arg7[%c0_25, %c161] : memref<8x512xbf16, #tpu.memory_space<vmem>>, vector<8x256xbf16>
    %c6 = arith.constant 6 : index
    %c0_26 = arith.constant 0 : index
    %c0_27 = arith.constant 0 : index
    %38 = vector.load %arg2[%c6, %c0_26, %c0_27] : memref<9x8x8xbf16, #tpu.memory_space<vmem>>, vector<1x8x8xbf16>
    %39 = vector.shape_cast %38 : vector<1x8x8xbf16> to vector<8x8xbf16>
    %cst_28 = arith.constant dense<0.000000e+00> : vector<8x256xf32>
    %40 = tpu.matmul %39, %37, %cst_28 {dimension_numbers = #tpu.dot_dimension_numbers<[1], [0], [0], [1], [0, 0, 1, 1], [], []>} : vector<8x8xbf16>, vector<8x256xbf16>, vector<8x256xf32> -> vector<8x256xf32>
    %41 = arith.addf %36, %40 : vector<8x256xf32>
    %c0_29 = arith.constant 0 : index
    %c162 = arith.constant 162 : index
    %42 = vector.load %arg7[%c0_29, %c162] : memref<8x512xbf16, #tpu.memory_space<vmem>>, vector<8x256xbf16>
    %c7 = arith.constant 7 : index
    %c0_30 = arith.constant 0 : index
    %c0_31 = arith.constant 0 : index
    %43 = vector.load %arg2[%c7, %c0_30, %c0_31] : memref<9x8x8xbf16, #tpu.memory_space<vmem>>, vector<1x8x8xbf16>
    %44 = vector.shape_cast %43 : vector<1x8x8xbf16> to vector<8x8xbf16>
    %cst_32 = arith.constant dense<0.000000e+00> : vector<8x256xf32>
    %45 = tpu.matmul %44, %42, %cst_32 {dimension_numbers = #tpu.dot_dimension_numbers<[1], [0], [0], [1], [0, 0, 1, 1], [], []>} : vector<8x8xbf16>, vector<8x256xbf16>, vector<8x256xf32> -> vector<8x256xf32>
    %46 = arith.addf %41, %45 : vector<8x256xf32>
    %c0_33 = arith.constant 0 : index
    %c163 = arith.constant 163 : index
    %47 = vector.load %arg7[%c0_33, %c163] : memref<8x512xbf16, #tpu.memory_space<vmem>>, vector<8x256xbf16>
    %c8 = arith.constant 8 : index
    %c0_34 = arith.constant 0 : index
    %c0_35 = arith.constant 0 : index
    %48 = vector.load %arg2[%c8, %c0_34, %c0_35] : memref<9x8x8xbf16, #tpu.memory_space<vmem>>, vector<1x8x8xbf16>
    %49 = vector.shape_cast %48 : vector<1x8x8xbf16> to vector<8x8xbf16>
    %cst_36 = arith.constant dense<0.000000e+00> : vector<8x256xf32>
    %50 = tpu.matmul %49, %47, %cst_36 {dimension_numbers = #tpu.dot_dimension_numbers<[1], [0], [0], [1], [0, 0, 1, 1], [], []>} : vector<8x8xbf16>, vector<8x256xbf16>, vector<8x256xf32> -> vector<8x256xf32>
    %51 = arith.addf %46, %50 : vector<8x256xf32>
    %c0_37 = arith.constant 0 : index
    %c0_38 = arith.constant 0 : index
    %52 = vector.load %arg3[%c0_37, %c0_38] : memref<8x1xf32, #tpu.memory_space<vmem>>, vector<8x1xf32>
    %53 = vector.broadcast %52 : vector<8x1xf32> to vector<8x256xf32>
    %54 = arith.addf %51, %53 : vector<8x256xf32>
    %cst_39 = arith.constant 0.000000e+00 : f32
    %55 = vector.broadcast %cst_39 : f32 to vector<8x256xf32>
    %56 = arith.maximumf %54, %55 : vector<8x256xf32>
    %c0_40 = arith.constant 0 : index
    %c0_41 = arith.constant 0 : index
    %57 = vector.load %arg5[%c0_40, %c0_41] : memref<8x256xbf16, #tpu.memory_space<vmem>>, vector<8x256xbf16>
    %58 = arith.extf %57 : vector<8x256xbf16> to vector<8x256xf32>
    %59 = arith.addf %56, %58 : vector<8x256xf32>
    %c0_42 = arith.constant 0 : index
    %c0_43 = arith.constant 0 : index
    %60 = vector.load %arg4[%c0_42, %c0_43] : memref<1x256xf32, #tpu.memory_space<vmem>>, vector<1x256xf32>
    %cst_44 = arith.constant 5.000000e-01 : f32
    %61 = vector.broadcast %cst_44 : f32 to vector<1x256xf32>
    %62 = arith.cmpf ogt, %60, %61 : vector<1x256xf32>
    %cst_45 = arith.constant 0.000000e+00 : f32
    %63 = vector.shape_cast %62 : vector<1x256xi1> to vector<1x256xi1>
    %64 = vector.broadcast %63 : vector<1x256xi1> to vector<8x256xi1>
    %65 = vector.broadcast %cst_45 : f32 to vector<8x256xf32>
    %66 = arith.select %64, %59, %65 : vector<8x256xi1>, vector<8x256xf32>
    %67 = arith.truncf %66 : vector<8x256xf32> to vector<8x256xbf16>
    %c0_46 = arith.constant 0 : index
    %c0_47 = arith.constant 0 : index
    %68 = vector.load %arg6[%c0_46, %c0_47] : memref<8x256xbf16, #tpu.memory_space<vmem>>, vector<8x256xbf16>
    tpu.vector_store %arg6[%c0_46, %c0_47], %67 {strides = array<i32>} : memref<8x256xbf16, #tpu.memory_space<vmem>>, vector<8x256xbf16>,
    return
  }
  func.func @transform_1(%arg0: i32) -> (i32, i32, i32) {
    %c0_i32 = arith.constant 0 : i32
    %c0_i32_0 = arith.constant 0 : i32
    %c0_i32_1 = arith.constant 0 : i32
    %c0_i32_2 = arith.constant 0 : i32
    return %c0_i32, %c0_i32_0, %c0_i32_1 : i32, i32, i32
  }
  func.func @transform_2(%arg0: i32) -> (i32, i32) {
    %c0_i32 = arith.constant 0 : i32
    %c0_i32_0 = arith.constant 0 : i32
    %c0_i32_1 = arith.constant 0 : i32
    return %c0_i32, %c0_i32_0 : i32, i32
  }
  func.func @transform_3(%arg0: i32) -> (i32, i32) {
    %c1_i32 = arith.constant 1 : i32
    %0 = arith.addi %arg0, %c1_i32 : i32
    %c0_i32 = arith.constant 0 : i32
    %c0_i32_0 = arith.constant 0 : i32
    return %c0_i32, %0 : i32, i32
  }
  func.func @transform_4(%arg0: i32) -> (i32, i32) {
    %c1_i32 = arith.constant 1 : i32
    %0 = arith.addi %arg0, %c1_i32 : i32
    %c0_i32 = arith.constant 0 : i32
    %c0_i32_0 = arith.constant 0 : i32
    return %c0_i32, %0 : i32, i32
  }
  func.func @transform_5(%arg0: i32) -> (i32, i32) {
    %c1_i32 = arith.constant 1 : i32
    %0 = arith.addi %arg0, %c1_i32 : i32
    %c0_i32 = arith.constant 0 : i32
    %c0_i32_0 = arith.constant 0 : i32
    return %c0_i32, %0 : i32, i32
  }
}

module attributes {stable_mosaic.version = 11 : i64} {
  func.func @_conv3x3_kernel(%arg0: i32, %arg1: memref<8x1792xbf16, #tpu.memory_space<any>>, %arg2: memref<9x3x8xbf16, #tpu.memory_space<vmem>>, %arg3: memref<3x1xf32, #tpu.memory_space<vmem>>, %arg4: memref<1x256xf32, #tpu.memory_space<vmem>>, %arg5: memref<3x256xf32, #tpu.memory_space<vmem>>, %arg6: memref<8x512xbf16, #tpu.memory_space<vmem>>, %arg7: memref<!tpu.dma_semaphore, #tpu.memory_space<semaphore_mem>>) attributes {dimension_semantics = [#tpu.dimension_semantics<parallel>], iteration_bounds = array<i64: 5>, scalar_prefetch = 0 : i64, scratch_operands = 2 : i64, tpu.core_type = #tpu.core_type<tc>, window_params = [{}, {pipeline_mode = #tpu.pipeline_mode<synchronous>, transform_indices = @transform_1, window_bounds = array<i64: 9, 3, 8>}, {pipeline_mode = #tpu.pipeline_mode<synchronous>, transform_indices = @transform_2, window_bounds = array<i64: 3, 1>}, {transform_indices = @transform_3, window_bounds = array<i64: 1, 256>}, {transform_indices = @transform_4, window_bounds = array<i64: 3, 256>}]} {
    %c1_i32 = arith.constant 1 : i32
    %0 = arith.addi %arg0, %c1_i32 : i32
    %c256_i32 = arith.constant 256 : i32
    %1 = arith.muli %0, %c256_i32 : i32
    %c128_i32 = arith.constant 128 : i32
    %2 = arith.subi %1, %c128_i32 : i32
    %3 = tpu.assume_multiple %2, 128 : i32
    %c0_i32 = arith.constant 0 : i32
    %4 = tpu.memref_slice %arg1[%c0_i32, %3] : memref<8x1792xbf16, #tpu.memory_space<any>> -> memref<8x512xbf16, #tpu.memory_space<any>>
    tpu.enqueue_dma source(%4 : memref<8x512xbf16, #tpu.memory_space<any>>) target(%arg6 : memref<8x512xbf16, #tpu.memory_space<vmem>>) target_semaphore(%arg7 : memref<!tpu.dma_semaphore, #tpu.memory_space<semaphore_mem>>)
    %c0_i32_0 = arith.constant 0 : i32
    %5 = tpu.memref_slice %arg1[%c0_i32_0, %3] : memref<8x1792xbf16, #tpu.memory_space<any>> -> memref<8x512xbf16, #tpu.memory_space<any>>
    tpu.wait_dma2 semaphore(%arg7 : memref<!tpu.dma_semaphore, #tpu.memory_space<semaphore_mem>>) src(%5 : memref<8x512xbf16, #tpu.memory_space<any>>) dst(%arg6 : memref<8x512xbf16, #tpu.memory_space<vmem>>)
    %cst = arith.constant 0.000000e+00 : f32
    %6 = vector.broadcast %cst : f32 to vector<3x256xf32>
    %c0 = arith.constant 0 : index
    %c93 = arith.constant 93 : index
    %7 = vector.load %arg6[%c0, %c93] : memref<8x512xbf16, #tpu.memory_space<vmem>>, vector<8x256xbf16>
    %c0_1 = arith.constant 0 : index
    %c0_2 = arith.constant 0 : index
    %c0_3 = arith.constant 0 : index
    %8 = vector.load %arg2[%c0_1, %c0_2, %c0_3] : memref<9x3x8xbf16, #tpu.memory_space<vmem>>, vector<1x3x8xbf16>
    %9 = vector.shape_cast %8 : vector<1x3x8xbf16> to vector<3x8xbf16>
    %cst_4 = arith.constant dense<0.000000e+00> : vector<3x256xf32>
    %10 = tpu.matmul %9, %7, %cst_4 {dimension_numbers = #tpu.dot_dimension_numbers<[1], [0], [0], [1], [0, 0, 1, 1], [], []>} : vector<3x8xbf16>, vector<8x256xbf16>, vector<3x256xf32> -> vector<3x256xf32>
    %11 = arith.addf %6, %10 : vector<3x256xf32>
    %c0_5 = arith.constant 0 : index
    %c94 = arith.constant 94 : index
    %12 = vector.load %arg6[%c0_5, %c94] : memref<8x512xbf16, #tpu.memory_space<vmem>>, vector<8x256xbf16>
    %c1 = arith.constant 1 : index
    %c0_6 = arith.constant 0 : index
    %c0_7 = arith.constant 0 : index
    %13 = vector.load %arg2[%c1, %c0_6, %c0_7] : memref<9x3x8xbf16, #tpu.memory_space<vmem>>, vector<1x3x8xbf16>
    %14 = vector.shape_cast %13 : vector<1x3x8xbf16> to vector<3x8xbf16>
    %cst_8 = arith.constant dense<0.000000e+00> : vector<3x256xf32>
    %15 = tpu.matmul %14, %12, %cst_8 {dimension_numbers = #tpu.dot_dimension_numbers<[1], [0], [0], [1], [0, 0, 1, 1], [], []>} : vector<3x8xbf16>, vector<8x256xbf16>, vector<3x256xf32> -> vector<3x256xf32>
    %16 = arith.addf %11, %15 : vector<3x256xf32>
    %c0_9 = arith.constant 0 : index
    %c95 = arith.constant 95 : index
    %17 = vector.load %arg6[%c0_9, %c95] : memref<8x512xbf16, #tpu.memory_space<vmem>>, vector<8x256xbf16>
    %c2 = arith.constant 2 : index
    %c0_10 = arith.constant 0 : index
    %c0_11 = arith.constant 0 : index
    %18 = vector.load %arg2[%c2, %c0_10, %c0_11] : memref<9x3x8xbf16, #tpu.memory_space<vmem>>, vector<1x3x8xbf16>
    %19 = vector.shape_cast %18 : vector<1x3x8xbf16> to vector<3x8xbf16>
    %cst_12 = arith.constant dense<0.000000e+00> : vector<3x256xf32>
    %20 = tpu.matmul %19, %17, %cst_12 {dimension_numbers = #tpu.dot_dimension_numbers<[1], [0], [0], [1], [0, 0, 1, 1], [], []>} : vector<3x8xbf16>, vector<8x256xbf16>, vector<3x256xf32> -> vector<3x256xf32>
    %21 = arith.addf %16, %20 : vector<3x256xf32>
    %c0_13 = arith.constant 0 : index
    %c127 = arith.constant 127 : index
    %22 = vector.load %arg6[%c0_13, %c127] : memref<8x512xbf16, #tpu.memory_space<vmem>>, vector<8x256xbf16>
    %c3 = arith.constant 3 : index
    %c0_14 = arith.constant 0 : index
    %c0_15 = arith.constant 0 : index
    %23 = vector.load %arg2[%c3, %c0_14, %c0_15] : memref<9x3x8xbf16, #tpu.memory_space<vmem>>, vector<1x3x8xbf16>
    %24 = vector.shape_cast %23 : vector<1x3x8xbf16> to vector<3x8xbf16>
    %cst_16 = arith.constant dense<0.000000e+00> : vector<3x256xf32>
    %25 = tpu.matmul %24, %22, %cst_16 {dimension_numbers = #tpu.dot_dimension_numbers<[1], [0], [0], [1], [0, 0, 1, 1], [], []>} : vector<3x8xbf16>, vector<8x256xbf16>, vector<3x256xf32> -> vector<3x256xf32>
    %26 = arith.addf %21, %25 : vector<3x256xf32>
    %c0_17 = arith.constant 0 : index
    %c128 = arith.constant 128 : index
    %27 = vector.load %arg6[%c0_17, %c128] : memref<8x512xbf16, #tpu.memory_space<vmem>>, vector<8x256xbf16>
    %c4 = arith.constant 4 : index
    %c0_18 = arith.constant 0 : index
    %c0_19 = arith.constant 0 : index
    %28 = vector.load %arg2[%c4, %c0_18, %c0_19] : memref<9x3x8xbf16, #tpu.memory_space<vmem>>, vector<1x3x8xbf16>
    %29 = vector.shape_cast %28 : vector<1x3x8xbf16> to vector<3x8xbf16>
    %cst_20 = arith.constant dense<0.000000e+00> : vector<3x256xf32>
    %30 = tpu.matmul %29, %27, %cst_20 {dimension_numbers = #tpu.dot_dimension_numbers<[1], [0], [0], [1], [0, 0, 1, 1], [], []>} : vector<3x8xbf16>, vector<8x256xbf16>, vector<3x256xf32> -> vector<3x256xf32>
    %31 = arith.addf %26, %30 : vector<3x256xf32>
    %c0_21 = arith.constant 0 : index
    %c129 = arith.constant 129 : index
    %32 = vector.load %arg6[%c0_21, %c129] : memref<8x512xbf16, #tpu.memory_space<vmem>>, vector<8x256xbf16>
    %c5 = arith.constant 5 : index
    %c0_22 = arith.constant 0 : index
    %c0_23 = arith.constant 0 : index
    %33 = vector.load %arg2[%c5, %c0_22, %c0_23] : memref<9x3x8xbf16, #tpu.memory_space<vmem>>, vector<1x3x8xbf16>
    %34 = vector.shape_cast %33 : vector<1x3x8xbf16> to vector<3x8xbf16>
    %cst_24 = arith.constant dense<0.000000e+00> : vector<3x256xf32>
    %35 = tpu.matmul %34, %32, %cst_24 {dimension_numbers = #tpu.dot_dimension_numbers<[1], [0], [0], [1], [0, 0, 1, 1], [], []>} : vector<3x8xbf16>, vector<8x256xbf16>, vector<3x256xf32> -> vector<3x256xf32>
    %36 = arith.addf %31, %35 : vector<3x256xf32>
    %c0_25 = arith.constant 0 : index
    %c161 = arith.constant 161 : index
    %37 = vector.load %arg6[%c0_25, %c161] : memref<8x512xbf16, #tpu.memory_space<vmem>>, vector<8x256xbf16>
    %c6 = arith.constant 6 : index
    %c0_26 = arith.constant 0 : index
    %c0_27 = arith.constant 0 : index
    %38 = vector.load %arg2[%c6, %c0_26, %c0_27] : memref<9x3x8xbf16, #tpu.memory_space<vmem>>, vector<1x3x8xbf16>
    %39 = vector.shape_cast %38 : vector<1x3x8xbf16> to vector<3x8xbf16>
    %cst_28 = arith.constant dense<0.000000e+00> : vector<3x256xf32>
    %40 = tpu.matmul %39, %37, %cst_28 {dimension_numbers = #tpu.dot_dimension_numbers<[1], [0], [0], [1], [0, 0, 1, 1], [], []>} : vector<3x8xbf16>, vector<8x256xbf16>, vector<3x256xf32> -> vector<3x256xf32>
    %41 = arith.addf %36, %40 : vector<3x256xf32>
    %c0_29 = arith.constant 0 : index
    %c162 = arith.constant 162 : index
    %42 = vector.load %arg6[%c0_29, %c162] : memref<8x512xbf16, #tpu.memory_space<vmem>>, vector<8x256xbf16>
    %c7 = arith.constant 7 : index
    %c0_30 = arith.constant 0 : index
    %c0_31 = arith.constant 0 : index
    %43 = vector.load %arg2[%c7, %c0_30, %c0_31] : memref<9x3x8xbf16, #tpu.memory_space<vmem>>, vector<1x3x8xbf16>
    %44 = vector.shape_cast %43 : vector<1x3x8xbf16> to vector<3x8xbf16>
    %cst_32 = arith.constant dense<0.000000e+00> : vector<3x256xf32>
    %45 = tpu.matmul %44, %42, %cst_32 {dimension_numbers = #tpu.dot_dimension_numbers<[1], [0], [0], [1], [0, 0, 1, 1], [], []>} : vector<3x8xbf16>, vector<8x256xbf16>, vector<3x256xf32> -> vector<3x256xf32>
    %46 = arith.addf %41, %45 : vector<3x256xf32>
    %c0_33 = arith.constant 0 : index
    %c163 = arith.constant 163 : index
    %47 = vector.load %arg6[%c0_33, %c163] : memref<8x512xbf16, #tpu.memory_space<vmem>>, vector<8x256xbf16>
    %c8 = arith.constant 8 : index
    %c0_34 = arith.constant 0 : index
    %c0_35 = arith.constant 0 : index
    %48 = vector.load %arg2[%c8, %c0_34, %c0_35] : memref<9x3x8xbf16, #tpu.memory_space<vmem>>, vector<1x3x8xbf16>
    %49 = vector.shape_cast %48 : vector<1x3x8xbf16> to vector<3x8xbf16>
    %cst_36 = arith.constant dense<0.000000e+00> : vector<3x256xf32>
    %50 = tpu.matmul %49, %47, %cst_36 {dimension_numbers = #tpu.dot_dimension_numbers<[1], [0], [0], [1], [0, 0, 1, 1], [], []>} : vector<3x8xbf16>, vector<8x256xbf16>, vector<3x256xf32> -> vector<3x256xf32>
    %51 = arith.addf %46, %50 : vector<3x256xf32>
    %c0_37 = arith.constant 0 : index
    %c0_38 = arith.constant 0 : index
    %52 = vector.load %arg3[%c0_37, %c0_38] : memref<3x1xf32, #tpu.memory_space<vmem>>, vector<3x1xf32>
    %53 = vector.broadcast %52 : vector<3x1xf32> to vector<3x256xf32>
    %54 = arith.addf %51, %53 : vector<3x256xf32>
    %55 = math.tanh %54 : vector<3x256xf32>
    %c0_39 = arith.constant 0 : index
    %c0_40 = arith.constant 0 : index
    %56 = vector.load %arg4[%c0_39, %c0_40] : memref<1x256xf32, #tpu.memory_space<vmem>>, vector<1x256xf32>
    %cst_41 = arith.constant 5.000000e-01 : f32
    %57 = vector.broadcast %cst_41 : f32 to vector<1x256xf32>
    %58 = arith.cmpf ogt, %56, %57 : vector<1x256xf32>
    %cst_42 = arith.constant 0.000000e+00 : f32
    %59 = vector.shape_cast %58 : vector<1x256xi1> to vector<1x256xi1>
    %60 = vector.broadcast %59 : vector<1x256xi1> to vector<3x256xi1>
    %61 = vector.broadcast %cst_42 : f32 to vector<3x256xf32>
    %62 = arith.select %60, %55, %61 : vector<3x256xi1>, vector<3x256xf32>
    %c0_43 = arith.constant 0 : index
    %c0_44 = arith.constant 0 : index
    %63 = vector.load %arg5[%c0_43, %c0_44] : memref<3x256xf32, #tpu.memory_space<vmem>>, vector<3x256xf32>
    tpu.vector_store %arg5[%c0_43, %c0_44], %62 {strides = array<i32>} : memref<3x256xf32, #tpu.memory_space<vmem>>, vector<3x256xf32>,
    return
  }
  func.func @transform_1(%arg0: i32) -> (i32, i32, i32) {
    %c0_i32 = arith.constant 0 : i32
    %c0_i32_0 = arith.constant 0 : i32
    %c0_i32_1 = arith.constant 0 : i32
    %c0_i32_2 = arith.constant 0 : i32
    return %c0_i32, %c0_i32_0, %c0_i32_1 : i32, i32, i32
  }
  func.func @transform_2(%arg0: i32) -> (i32, i32) {
    %c0_i32 = arith.constant 0 : i32
    %c0_i32_0 = arith.constant 0 : i32
    %c0_i32_1 = arith.constant 0 : i32
    return %c0_i32, %c0_i32_0 : i32, i32
  }
  func.func @transform_3(%arg0: i32) -> (i32, i32) {
    %c1_i32 = arith.constant 1 : i32
    %0 = arith.addi %arg0, %c1_i32 : i32
    %c0_i32 = arith.constant 0 : i32
    %c0_i32_0 = arith.constant 0 : i32
    return %c0_i32, %0 : i32, i32
  }
  func.func @transform_4(%arg0: i32) -> (i32, i32) {
    %c1_i32 = arith.constant 1 : i32
    %0 = arith.addi %arg0, %c1_i32 : i32
    %c0_i32 = arith.constant 0 : i32
    %c0_i32_0 = arith.constant 0 : i32
    return %c0_i32, %0 : i32, i32
  }
}

</mosaic_0001>

<bundles_post_ra>
// kernel: blender_forward.10
= control target key start
LH: loop header
LB: loop body
LE: loop exit
PB: predicated region body
PF: predicated region fallthrough
CT: control target
= control target key end

     0   :  { %9 = vsyncpa [#allocation3], 0  ;;  %s375_s12 = smov 0   ;;  %s409_s0 = inlined_call_operand.vmem [shape: f32[3,1792], index: 0, kind: input, shape index: {}]   ;;  %s410_s1 = inlined_call_operand.vmem [shape: f32[1,1792], index: 1, kind: input, shape index: {}]   ;;  %s411_s2 = inlined_call_operand.vmem [shape: f32[3,1], index: 2, kind: output, shape index: {0}]   ;;  %s412_s3 = inlined_call_operand.hbm [shape: f32[1,1], index: 3, kind: output, shape index: {1}]  }
   0x1 LB: > { %s381_s13 = sadd.s32 4294967295, %s351_s12   ;;  %p288_p0 = scmp.ge.s32.totalorder %s351_s12, 1  ;;  %s351_s12 = sphi %s375_s12, %s15_s12  }
   0x2   : > { %p142_p1 = scmp.lt.s32.totalorder %s351_s12, 8 }
   0x4   : > { %p143_p2 = pnand %p288_p0, %p142_p1 }
   0x5   : > { %s289_s14 = sshll.u32 (!%p143_p2), %s381_s13, 1  ;;  %p292_p4 = scmp.ne.s32.totalorder (!%p143_p2), %s381_s13, 0 }
   0x6   : > { %146 = sbr.rel (%p143_p2) target bundleno = 159 (0x9f), region = 28  ;;  %p166_p3 = scmp.lt.s32.totalorder (!%p143_p2), %s289_s14, 13 }
   0xb   : > { %s414_s14 = smov (!%p166_p3, %s289_s14), 13  ;;  %179 = sbr.rel (%p292_p4) target bundleno = 19 (0x13), region = 32 }
   0xc   : > { %s290_s15 = sshll.u32 %s414_s14, 2  ;;  %s174_s18 = scalar_lea.vmem %s410_s1, %s414_s14 }
   0xd   : > { %s169_s21 = scalar_lea.vmem %s409_s0, %s290_s15 }
  0x10   : > { %vm180_vm0 = vcmask 2048   ;;  %vm182_vm1 = vcmask 0   ;;  %v353_v0 = vmov 0.0  }
  0x11   : > { %181 = vst.msk [vmem:[%s411_s2] sm:$0x7] %vm180_vm0, %v353_v0 }
  0x12   : > { %183 = vst.msk [vmem:[#allocation2] sm:$0x1] %vm182_vm1, %v353_v0 }
  0x13 PF: > { %v185_v1 = vld [vmem:[%s174_s18] sm:$0x3]  ;;  %vm213_vm2 = vcmask 1040384   ;;  %vm191_vm3 = vcmask 1043456   ;;  %vm201_vm4 = vcmask 1042432   ;;  %s354_s24 = smov [#allocation2]  }
  0x14   : > { %v188_v2 = vperm.slane %v185_v1, 0  ;;  %v189_v3 = vperm.slane %v185_v1, 1  ;;  %v184_v7 = vld [vmem:[%s169_s21] sm:$0x77]  ;;  %s231_s25 = sshll.u32 %s354_s24, 4  ;;  %s233_s28 = sshll.u32 %s412_s3, 4  ;;  %s232_s25 = int_to_ptr.vmem [resolvable:$true] %s231_s25  ;;  %s234_s28 = int_to_ptr.hbm [resolvable:$true] %s233_s28 }
  0x15   : > { %vm220_vm5 = vcmask 0   ;;  %p301_p5 = scmp.eq.s32.totalorder %s381_s13, 6  ;;  %vm208_vm6 = vcmask 2048  }
  0x16   : > { %v190_v4 = vrot.slane %v189_v3, 4  ;;  %v214_v5 = vsel %vm213_vm2, %v188_v2, 0.0  ;;  %v215_v6 = vsel %vm213_vm2, %v189_v3, 0.0 }
  0x17   : > { %v216_v8 = vadd.f32 %v215_v6, %v214_v5 }
  0x18   : > { %v192_v9 = vsel %vm191_vm3, %v188_v2, %v190_v4  ;;  %v186_v19 = vld [vmem:[%s411_s2] sm:$0x7] }
  0x19   : > { %217 = vadd.xlane.f32.xlu0 %v216_v8  ;;  %v194_v10 = vmul.f32 %v192_v9, %v184_v7  ;;  %v210_v16 = vld [vmem:[#allocation2] sm:$0x1] }
  0x1b   : > { %196 = vst [vmem:[#allocation1] ss:$2 sm:$0xff] %v194_v10 }
  0x22   : > { %v197_v11 = vld.sshfl [vmem:[#allocation1] sm:$0xff pattern:$0x75316420]  ;;  %v198_v12 = vld.sshfl [vmem:[#allocation1 + $0x8] sm:$0xff pattern:$0x75316420] }
  0x23   : > { %v202_v13 = vsel %vm201_vm4, %v197_v11, 0.0  ;;  %v203_v14 = vsel %vm201_vm4, %v198_v12, 0.0 }
  0x24   : > { %v204_v15 = vadd.f32 %v203_v14, %v202_v13 }
  0x26   : > { %205 = vadd.xlane.f32.xlu0 %v204_v15 }
  0x8c   : > { %v218_v17 = vpop.xlane.xlu0 %217 }
  0x8d   : > { %v219_v18 = vadd.f32 %v218_v17, %v210_v16 }
  0x8f   : > { %221 = vst.msk [vmem:[#allocation2] sm:$0x1] %vm220_vm5, %v219_v18 }
  0x90   : > { %298 = dma.vmem_to_hbm [thread:$0]  (%p301_p5), %s232_s25, 16, %s234_s28, [#allocation3]  }
  0x99   : > { %v206_v20 = vpop.xlane.xlu0 %205 }
  0x9a   : > { %v207_v21 = vadd.f32 %v206_v20, %v186_v19 }
  0x9c   : > { %209 = vst.msk [vmem:[%s411_s2] sm:$0x7] %vm208_vm6, %v207_v21 }
  0x9d   : > { %346 = dma.done.wait (%p301_p5), [#allocation3], 16  }
  0x9e   : > { %348 = vsyncadd (%p301_p5), [#allocation3], 4294967280 }
  0x9f PF: > { %s15_s12 = sadd.s32 1, %s351_s12  }
  0xa0   : > { %p12_p6 = scmp.ge.s32.totalorder %s15_s12, 9  }
  0xa2   :  { %14 = sbr.rel (!%p12_p6) target bundleno = 1 (0x1), region = 70 }
  0xa7   :  { %250 = vsyncpa [#allocation3], 1 }
  0xa8   :  { %252 = vsyncpa [#allocation3 + $0x1], 1 }

// kernel: blender_forward.11
= control target key start
LH: loop header
LB: loop body
LE: loop exit
PB: predicated region body
PF: predicated region fallthrough
CT: control target
= control target key end

     0   :  { %s962_s30 = smov 0   ;;  %s964_s10 = smov 0   ;;  %s1070_s0 = inlined_call_operand.vmem [shape: f32[3,1792], index: 0, kind: input, shape index: {}]   ;;  %s1071_s1 = inlined_call_operand.vmem [shape: f32[3,1792], index: 1, kind: input, shape index: {}]   ;;  %s1072_s2 = inlined_call_operand.vmem [shape: f32[1,1792], index: 2, kind: input, shape index: {}]   ;;  %s1073_s3 = inlined_call_operand.vmem [shape: f32[1,1792], index: 3, kind: input, shape index: {}]   ;;  %s1074_s4 = inlined_call_operand.vmem [shape: f32[1,1792], index: 4, kind: input, shape index: {}]   ;;  %s1075_s5 = inlined_call_operand.vmem [shape: f32[3,1], index: 5, kind: input, shape index: {}]   ;;  %s1076_s6 = inlined_call_operand.vmem [shape: f32[3,1], index: 6, kind: input, shape index: {}]   ;;  %s1077_s7 = inlined_call_operand.vmem [shape: f32[14,1792], index: 7, kind: output, shape index: {0}]   ;;  %s1078_s8 = inlined_call_operand.vmem [shape: f32[6,1792], index: 8, kind: output, shape index: {1}]   ;;  %s1079_s9 = inlined_call_operand.vmem [shape: f32[6,1792], index: 9, kind: output, shape index: {2}]  }
   0x1   :  { %s966_s11 = smov 0  }
   0x2 LB: > { %s975_s12 = sadd.s32 4294967295, %s908_s11   ;;  %s977_s13 = sadd.s32 1, %s908_s11   ;;  %s908_s11 = sphi %s966_s11, %s1083_s11   ;;  %s904_s10 = sphi %s964_s10, %s1082_s10   ;;  %s900_s30 = sphi %s962_s30, %s1081_s30  }
   0x3   : > { %s207_s14 = sadd.s32 1, %s977_s13  ;;  %s211_s15 = sadd.s32 1, %s904_s10 }
   0x4   : > { %s208_s16 = ssub.s32 %s977_s13, %s207_s14  ;;  %p221_p0 = scmp.ne.s32.totalorder %s904_s10, %s900_s30 }
   0x5   : > { %p209_p1 = scmp.eq.s32.totalorder %s208_s16, 0  ;;  %p222_p2 = scmp.eq.s32.totalorder %s975_s12, 4 }
   0x6   : > { %p822_p3 = scmp.ge.s32.totalorder %s908_s11, 1  ;;  %p360_p4 = scmp.lt.s32.totalorder %s908_s11, 6 }
   0x7   : > { %s986_s17 = scalar_select %p209_p1, %s904_s10, %s211_s15  }
   0x8   : > { %p988_p5 = por %p222_p2, %p221_p0  ;;  %p361_p6 = pnand %p822_p3, %p360_p4 }
   0x9   : > { %s845_s23 = sshll.u32 (!%p361_p6), %s975_s12, 1  ;;  %s410_s29 = sand.u32 (!%p361_p6), 1, %s900_s30  }
   0xa   : > { %364 = sbr.rel (%p361_p6) target bundleno = 203 (0xcb), region = 48  ;;  %s846_s24 = sadd.s32 (!%p361_p6), 2, %s845_s23 }
   0xb   : > { %p431_p7 = scmp.lt.s32.totalorder (!%p361_p6), %s846_s24, 13  ;;  %s823_s11 = sshll.u32 (!%p361_p6), %s410_s29, 5 }
   0xc   : > { %s1013_s22 = scalar_lea.vmem (!%p361_p6), [#allocation2], %s823_s11 }
   0xf   : > { %v489_v0 = vld [vmem:[%s1075_s5] sm:$0x7]  ;;  %v910_v1 = vmov 0   ;;  %s1085_s24 = smov (!%p431_p7, %s846_s24), 13  ;;  %v576_v4 = vlaneseq  ;;  %v911_v14 = vmov 839922192  }
  0x10   : > { %885 = vset.pattern.permute.xlu0 %v910_v1  ;;  %v490_v2 = vld [vmem:[%s1076_s6] sm:$0x7]  ;;  %s825_s25 = sshll.u32 %s1085_s24, 2  ;;  %s449_s21 = scalar_lea.vmem %s1072_s2, %s1085_s24  ;;  %v496_v15 = vunpack.c.l.s4 %v911_v14  ;;  %vm515_vm1 = vcmask 1043456  }
  0x11   : > { %493 = vperm.xlu0 %885, %v489_v0   ;;  %s434_s28 = scalar_lea.vmem %s1070_s0, %s825_s25  ;;  %s442_s16 = scalar_lea.vmem %s1071_s1, %s825_s25  ;;  %vm578_vm0 = vcmp.lt.s32.totalorder %v576_v4, 256  ;;  %v1021_v8 = vld [vmem:[%s449_s21] sm:$0x3] }
  0x12   : > { %v484_v3 = vld [vmem:[%s434_s28] sm:$0x77]  ;;  %s456_s25 = scalar_lea.vmem %s1073_s3, %s1085_s24  ;;  %835 = vst.msk [vmem:[%s1013_s22 + $0x14] ss:$8 sm:$0x3] %vm578_vm0, %v1021_v8  ;;  %s463_s28 = scalar_lea.vmem %s1074_s4, %s1085_s24  ;;  %v497_v18 = vunpack.c.0.s8 %v496_v15  ;;  %v531_v46 = vperm.slane %v1021_v8, 1 }
  0x13   : > { %537 = vst [vmem:[#allocation1] ss:$2 sm:$0xff] %v484_v3  ;;  %v485_v6 = vld [vmem:[%s442_s16] sm:$0x77]  ;;  %s832_s29 = sshll.u32 %s1085_s24, 3  ;;  %v530_v52 = vperm.slane %v1021_v8, 0 }
  0x14   : > { %v487_v9 = vld [vmem:[%s456_s25] sm:$0x3]  ;;  %s473_s15 = scalar_lea.vmem %s1078_s8, %s832_s29  ;;  %v532_v53 = vrot.slane %v531_v46, 4  ;;  %s481_s19 = scalar_lea.vmem %s1079_s9, %s832_s29 }
  0x15   : > { %836 = vst.msk [vmem:[%s1013_s22 + $0x15] ss:$8 sm:$0x3] %vm578_vm0, %v487_v9  ;;  %v488_v16 = vld [vmem:[%s463_s28] sm:$0x3]  ;;  %v524_v40 = vperm.slane %v487_v9, 1 }
  0x16   : > { %v513_v19 = vperm.slane %v488_v16, 1  ;;  %v512_v21 = vperm.slane %v488_v16, 0  ;;  %v523_v43 = vperm.slane %v487_v9, 0  ;;  %v533_v54 = vsel %vm515_vm1, %v530_v52, %v532_v53  ;;  %s838_s20 = sshll.u32 (%p988_p5), %s975_s12, 4 }
  0x17   : > { %v525_v44 = vrot.slane %v524_v40, 4  ;;  %s744_s23 = scalar_lea.vmem (%p988_p5), %s1077_s7, %s838_s20 }
  0x18   : > { %v514_v22 = vrot.slane %v513_v19, 4 }
  0x19   : > { %503 = vperm.xlu0 %885, %v490_v2   ;;  %v526_v45 = vsel %vm515_vm1, %v523_v43, %v525_v44 }
  0x1a   : > { %v538_v5 = vld.sshfl [vmem:[#allocation1] sm:$0xff pattern:$0x75316420]  ;;  %v539_v7 = vld.sshfl [vmem:[#allocation1 + $0x8] sm:$0xff pattern:$0x75316420]  ;;  %v516_v26 = vsel %vm515_vm1, %v512_v21, %v514_v22 }
  0x1b   : > { %542 = vst [vmem:[%s1013_s22] sm:$0x7] %v538_v5 }
  0x1c   : > { %543 = vst [vmem:[%s1013_s22 + $0x8] sm:$0x7] %v539_v7 }
  0x1d   : > { %545 = vst [vmem:[#allocation1] ss:$2 sm:$0xff] %v485_v6 }
  0x24   : > { %v546_v10 = vld.sshfl [vmem:[#allocation1] sm:$0xff pattern:$0x75316420]  ;;  %v547_v11 = vld.sshfl [vmem:[#allocation1 + $0x8] sm:$0xff pattern:$0x75316420] }
  0x25   : > { %v548_v12 = vrot.slane %v546_v10, 5  ;;  %v549_v13 = vrot.slane %v547_v11, 5 }
  0x27   : > { %552 = vst [vmem:[%s1013_s22] sm:$0x38] %v548_v12 }
  0x28   : > { %553 = vst [vmem:[%s1013_s22 + $0x8] sm:$0x38] %v549_v13 }
  0x83   : > { %v494_v17 = vpop.permute.xlu0 %493 }
  0x84   : > { %v498_v20 = vperm.slane %v494_v17, %v497_v18 }
  0x86   : > { %v500_v24 = vsub.f32 %v484_v3, %v498_v20 }
  0x8b   : > { %v504_v23 = vpop.permute.xlu0 %503 }
  0x8c   : > { %v508_v25 = vperm.slane %v504_v23, %v497_v18 }
  0x8e   : > { %v510_v27 = vadd.f32 %v508_v25, %v500_v24  ;;  %v519_v29 = vsub.f32 %v485_v6, %v508_v25 }
  0x90   : > { %v518_v28 = vmul.f32 %v516_v26, %v510_v27  ;;  %v520_v30 = vadd.f32 %v519_v29, %v498_v20 }
  0x92   : > { %555 = vst [vmem:[#allocation1] ss:$2 sm:$0xff] %v518_v28  ;;  %v521_v31 = vmul.f32 %v520_v30, %v516_v26  ;;  %v528_v47 = vmul.f32 %v526_v45, %v518_v28 }
  0x94   : > { %v535_v57 = vmul.f32 %v533_v54, %v521_v31 }
  0x99   : > { %v556_v32 = vld.sshfl [vmem:[#allocation1] sm:$0xff pattern:$0x75316420]  ;;  %v557_v33 = vld.sshfl [vmem:[#allocation1 + $0x8] sm:$0xff pattern:$0x75316420] }
  0x9a   : > { %v558_v34 = vrot.slane %v556_v32, 2  ;;  %v559_v35 = vrot.slane %v557_v33, 2  ;;  %567 = vst [vmem:[#allocation1] ss:$2 sm:$0xff] %v521_v31 }
  0x9c   : > { %562 = vst [vmem:[%s1013_s22] sm:$0xc0] %v558_v34 }
  0x9d   : > { %563 = vst [vmem:[%s1013_s22 + $0x8] sm:$0xc0] %v559_v35 }
  0x9e   : > { %564 = vst [vmem:[%s1013_s22 + $0x10] sm:$0x1] %v558_v34 }
  0x9f   : > { %565 = vst [vmem:[%s1013_s22 + $0x18] sm:$0x1] %v559_v35 }
  0xa1   : > { %v568_v36 = vld.sshfl [vmem:[#allocation1] sm:$0xff pattern:$0x75316420]  ;;  %v569_v37 = vld.sshfl [vmem:[#allocation1 + $0x8] sm:$0xff pattern:$0x75316420] }
  0xa2   : > { %v570_v38 = vrot.slane %v568_v36, 7  ;;  %v571_v39 = vrot.slane %v569_v37, 7  ;;  %586 = vst [vmem:[#allocation1] ss:$2 sm:$0xff] %v518_v28 }
  0xa3   : > { %v655_v62 = vld [vmem:[%s1013_s22] sm:$0xff] (%p988_p5) }
  0xa4   : > { %574 = vst [vmem:[%s1013_s22 + $0x10] sm:$0xe] %v570_v38  ;;  %v657_v63 = vld [vmem:[%s1013_s22 + $0x8] sm:$0xff] (%p988_p5) }
  0xa5   : > { %575 = vst [vmem:[%s1013_s22 + $0x18] sm:$0xe] %v571_v39 }
  0xa6   : > { %839 = vst [vmem:[%s744_s23 + $0x10] sm:$0xff] (%p988_p5), %v655_v62 }
  0xa7   : > { %840 = vst [vmem:[%s744_s23 + $0x18] sm:$0xff] (%p988_p5), %v657_v63 }
  0xa9   : > { %v587_v41 = vld.sshfl [vmem:[#allocation1] sm:$0xff pattern:$0x75316420]  ;;  %v588_v42 = vld.sshfl [vmem:[#allocation1 + $0x8] sm:$0xff pattern:$0x75316420] }
  0xaa   : > { %591 = vst [vmem:[%s473_s15] sm:$0x7] %v587_v41 }
  0xab   : > { %592 = vst [vmem:[%s473_s15 + $0x8] sm:$0x7] %v588_v42  ;;  %v659_v0 = vld [vmem:[%s1013_s22 + $0x10] sm:$0xff] (%p988_p5) }
  0xac   : > { %593 = vst [vmem:[#allocation1] ss:$2 sm:$0xff] %v521_v31  ;;  %v661_v1 = vld [vmem:[%s1013_s22 + $0x18] sm:$0xff] (%p988_p5) }
  0xad   : > { %841 = vst [vmem:[%s744_s23 + $0x80] sm:$0xff] (%p988_p5), %v659_v0 }
  0xae   : > { %842 = vst [vmem:[%s744_s23 + $0x88] sm:$0xff] (%p988_p5), %v661_v1 }
  0xb3   : > { %v594_v48 = vld.sshfl [vmem:[#allocation1] sm:$0xff pattern:$0x75316420]  ;;  %v595_v49 = vld.sshfl [vmem:[#allocation1 + $0x8] sm:$0xff pattern:$0x75316420] }
  0xb4   : > { %v596_v50 = vrot.slane %v594_v48, 5  ;;  %v597_v51 = vrot.slane %v595_v49, 5  ;;  %603 = vst [vmem:[#allocation1] ss:$2 sm:$0xff] %v528_v47 }
  0xb6   : > { %600 = vst [vmem:[%s473_s15] sm:$0x38] %v596_v50 }
  0xb7   : > { %601 = vst [vmem:[%s473_s15 + $0x8] sm:$0x38] %v597_v51 }
  0xbb   : > { %v604_v55 = vld.sshfl [vmem:[#allocation1] sm:$0xff pattern:$0x75316420]  ;;  %v605_v56 = vld.sshfl [vmem:[#allocation1 + $0x8] sm:$0xff pattern:$0x75316420] }
  0xbc   : > { %608 = vst [vmem:[%s481_s19] sm:$0x7] %v604_v55 }
  0xbd   : > { %609 = vst [vmem:[%s481_s19 + $0x8] sm:$0x7] %v605_v56 }
  0xbe   : > { %611 = vst [vmem:[#allocation1] ss:$2 sm:$0xff] %v535_v57 }
  0xc5   : > { %v612_v58 = vld.sshfl [vmem:[#allocation1] sm:$0xff pattern:$0x75316420]  ;;  %v613_v59 = vld.sshfl [vmem:[#allocation1 + $0x8] sm:$0xff pattern:$0x75316420] }
  0xc6   : > { %v614_v60 = vrot.slane %v612_v58, 5  ;;  %v615_v61 = vrot.slane %v613_v59, 5  ;;  %638 = sbr.rel (!%p988_p5) target bundleno = 203 (0xcb), region = 52 }
  0xc8   : > { %618 = vst [vmem:[%s481_s19] sm:$0x38] %v614_v60 }
  0xc9   : > { %619 = vst [vmem:[%s481_s19 + $0x8] sm:$0x38] %v615_v61 }
  0xcb PF: > { %p17_p8 = scmp.ge.s32.totalorder %s977_s13, 7   ;;  %s1081_s30 = smov %s904_s10 }
  0xcc   : > { %s1082_s10 = smov %s986_s17  ;;  %s1083_s11 = smov %s977_s13 }
  0xcd   :  { %19 = sbr.rel (!%p17_p8) target bundleno = 2 (0x2), region = 139 }

// kernel: blender_forward.12
= control target key start
LH: loop header
LB: loop body
LE: loop exit
PB: predicated region body
PF: predicated region fallthrough
CT: control target
= control target key end

     0   :  { %s869_s15 = smov 0   ;;  %s983_s0 = inlined_call_operand.vmem [shape: f32[14,1792], index: 0, kind: input, shape index: {}]   ;;  %s984_s1 = inlined_call_operand.vmem [shape: bf16[9,8,14], index: 1, kind: input, shape index: {}]   ;;  %s985_s2 = inlined_call_operand.vmem [shape: f32[8,1], index: 2, kind: input, shape index: {}]   ;;  %s986_s3 = inlined_call_operand.vmem [shape: f32[1,1792], index: 3, kind: input, shape index: {}]   ;;  %s987_s4 = inlined_call_operand.vmem [shape: bf16[8,1792], index: 4, kind: output, shape index: {}]  }
   0x1 LB: > { %s761_s16 = sadd.s32 4294967295, %s833_s15   ;;  %p765_p0 = scmp.ge.s32.totalorder %s833_s15, 1  ;;  %s833_s15 = sphi %s869_s15, %s14_s15  }
   0x2   : > { %p144_p1 = scmp.lt.s32.totalorder %s833_s15, 6 }
   0x4   : > { %p145_p2 = pnand %p765_p0, %p144_p1 }
   0x5   : > { %s801_s17 = sshll.u32 (!%p145_p2), %s761_s16, 1  ;;  %s805_s18 = sshll.u32 (!%p145_p2), %s761_s16, 8 }
   0x6   : > { %148 = sbr.rel (%p145_p2) target bundleno = 356 (0x164), region = 32  ;;  %s802_s19 = sadd.s32 (!%p145_p2), 2, %s801_s17 }
   0x7   : > { %s806_s20 = sadd.s32 (!%p145_p2), 256, %s805_s18  ;;  %p171_p3 = scmp.lt.s32.totalorder (!%p145_p2), %s802_s19, 13 }
   0x8   : > { %s770_s21 = sadd.s32 (!%p145_p2), 4294967168, %s806_s20 }
   0x9   : > { %s188_s22 = sshra.s32 (!%p145_p2), %s770_s21, 7 }
   0xa   : > { %s771_s23 = sshll.u32 (!%p145_p2), %s188_s22, 3 }
   0xb   : > { %s989_s19 = smov (!%p171_p3, %s802_s19), 13  ;;  %s191_s7 = scalar_lea.vmem %s983_s0, %s771_s23 }
   0xc   : > { %s173_s26 = scalar_lea.vmem %s986_s3, %s989_s19  ;;  %s768_s27 = sshll.u32 %s989_s19, 2  ;;  %v202_v0 = vld [vmem:[%s191_s7] sm:$0xff]  ;;  %v204_v1 = vld [vmem:[%s191_s7 + $0x8] sm:$0xff]  ;;  %v206_v2 = vld [vmem:[%s191_s7 + $0x10] sm:$0xff] }
   0xd   : > { %s887_s30 = scalar_lea.vmem %s987_s4, %s768_s27  ;;  %203 = vst [vmem:[#allocation2 + $0x30] sm:$0xff] %v202_v0  ;;  %v208_v3 = vld [vmem:[%s191_s7 + $0x18] sm:$0xff]  ;;  %v210_v4 = vld [vmem:[%s191_s7 + $0x70] sm:$0xff]  ;;  %v214_v6 = vld [vmem:[%s191_s7 + $0x80] sm:$0xff] }
   0xe   : > { %205 = vst [vmem:[#allocation2] sm:$0xff] %v204_v1  ;;  %v212_v5 = vld [vmem:[%s191_s7 + $0x78] sm:$0xff]  ;;  %v216_v7 = vld [vmem:[%s191_s7 + $0x88] sm:$0xff] }
   0xf   : > { %207 = vst [vmem:[#allocation2 + $0x18] sm:$0xff] %v206_v2 }
  0x10   : > { %209 = vst [vmem:[#allocation2 + $0x10] sm:$0xff] %v208_v3 }
  0x11   : > { %211 = vst [vmem:[#allocation2 + $0x8] sm:$0xff] %v210_v4 }
  0x12   : > { %213 = vst [vmem:[#allocation2 + $0x20] sm:$0xff] %v212_v5 }
  0x13   : > { %215 = vst [vmem:[#allocation2 + $0x28] sm:$0xff] %v214_v6 }
  0x14   : > { %217 = vst [vmem:[#allocation2 + $0x38] sm:$0xff] %v216_v7 }
  0x15   : > { %223 = vsyncadd [#allocation3], 1024 }
  0x16   : > { %829 = dma.done.wait [#allocation3], 1024 }
  0x17   : > { %830 = vsyncadd [#allocation3], 4294966272  ;;  %v230_v8 = vld [vmem:[#allocation2 + $0x18] sm:$0xff]  ;;  %v228_v10 = vld [vmem:[#allocation2 + $0x30] sm:$0xff]  ;;  %s835_s8 = smov 34   ;;  %s836_s9 = smov 35  }
  0x18   : > { %v231_v12 = vld [vmem:[#allocation2 + $0x8] sm:$0x3f]  ;;  %v229_v13 = vld [vmem:[#allocation2] sm:$0xff]  ;;  %s837_s10 = smov 33   ;;  %s838_s11 = smov 1   ;;  %v470_v19 = vld [vmem:[#allocation2 + $0x10] sm:$0xff] }
  0x19   : > { %v232_v14 = vld [vmem:[#allocation2 + $0x20] sm:$0x3f]  ;;  %v234_v15 = vpack.c.bf16 %v231_v12, %v228_v10  ;;  %s839_s12 = smov 127   ;;  %s840_s13 = smov 95   ;;  %vm295_vm0 = vcmask 285696   ;;  %vm256_vm1 = vcmask 1046528  }
  0x1a   : > { %v233_v9 = vld [vmem:[#allocation2 + $0x28] sm:$0x3f]  ;;  %v894_v16 = vpack.c.bf16 %v232_v14, %v229_v13  ;;  %v471_v18 = vld [vmem:[#allocation2 + $0x20] sm:$0x3f]  ;;  %s841_s14 = smov 94   ;;  %s842_s16 = smov 93  }
  0x1b   : > { %v892_v11 = vpack.c.bf16 %v233_v9, %v230_v8  ;;  %243 = vrot.lane.b32.xlu0 %v234_v15, %s835_s8  ;;  %v472_v17 = vld [vmem:[#allocation2 + $0x28] sm:$0x3f]  ;;  %v473_v20 = vld [vmem:[#allocation2 + $0x38] sm:$0x3f]  ;;  %v474_v22 = vpack.c.bf16 %v471_v18, %v229_v13  ;;  %v237_v28 = vld [vmem:[%s984_s1] sm:$0xf] }
  0x1c   : > { %291 = vrot.lane.b32.xlu2 %v894_v16, %s836_s9  ;;  %v475_v21 = vpack.c.bf16 %v472_v17, %v230_v8  ;;  %v476_v23 = vpack.c.bf16 %v473_v20, %v470_v19  ;;  %vm252_vm2 = vcmask 113664   ;;  %vm249_vm3 = vcmask 277504   ;;  %v772_v40 = vld [vmem:[%s984_s1 + $0x4] sm:$0xf]  ;;  %v780_v57 = vld [vmem:[%s984_s1 + $0xc] sm:$0xf] }
  0x1d   : > { %247 = vrot.lane.b32.xlu1 %v892_v11, %s835_s8  ;;  %vm341_vm4 = vcmask 269312   ;;  %v438_v44 = vsel %vm256_vm1, %v892_v11, 0  ;;  %v435_v48 = vsel %vm256_vm1, %v894_v16, 0  ;;  %vm389_vm5 = vcmask 7168   ;;  %v777_v58 = vld [vmem:[%s984_s1 + $0x8] sm:$0xf] }
  0x1e   : > { %vm488_vm6 = vcmask 1039360   ;;  %vm536_vm7 = vcmask 777216   ;;  %v786_v7 = vld [vmem:[%s984_s1 + $0x14] sm:$0xf]  ;;  %v783_v9 = vld [vmem:[%s984_s1 + $0x10] sm:$0xf] }
  0x1f   : > { %vm584_vm8 = vcmask 769024   ;;  %v843_v13 = vmov 0   ;;  %vm632_vm9 = vcmask 760832  }
  0x20   : > { %824 = vset.pattern.permute.xlu0 %v843_v13 }
  0x23   : > { %245 = vrot.lane.b32.xlu0 %v894_v16, %s835_s8 }
  0x24   : > { %293 = vrot.lane.b32.xlu2 %v892_v11, %s836_s9 }
  0x25   : > { %289 = vrot.lane.b32.xlu1 %v234_v15, %s836_s9 }
  0x2b   : > { %335 = vrot.lane.b32.xlu0 %v234_v15, %s837_s10 }
  0x2c   : > { %339 = vrot.lane.b32.xlu2 %v892_v11, %s837_s10 }
  0x2d   : > { %337 = vrot.lane.b32.xlu1 %v894_v16, %s837_s10 }
  0x33   : > { %383 = vrot.lane.b32.xlu0 %v234_v15, %s838_s11 }
  0x34   : > { %387 = vrot.lane.b32.xlu2 %v892_v11, %s838_s11  ;;  %v672_v11 = vld [vmem:[%s985_s2] sm:$0xff] }
  0x35   : > { %385 = vrot.lane.b32.xlu1 %v894_v16, %s838_s11 }
  0x3b   : > { %482 = vrot.lane.b32.xlu0 %v474_v22, %s839_s12 }
  0x3c   : > { %486 = vrot.lane.b32.xlu2 %v476_v23, %s839_s12 }
  0x3d   : > { %484 = vrot.lane.b32.xlu1 %v475_v21, %s839_s12 }
  0x43   : > { %530 = vrot.lane.b32.xlu0 %v474_v22, %s840_s13 }
  0x44   : > { %534 = vrot.lane.b32.xlu2 %v476_v23, %s840_s13 }
  0x45   : > { %532 = vrot.lane.b32.xlu1 %v475_v21, %s840_s13 }
  0x4b   : > { %578 = vrot.lane.b32.xlu0 %v474_v22, %s841_s14 }
  0x4c   : > { %582 = vrot.lane.b32.xlu2 %v476_v23, %s841_s14 }
  0x4d   : > { %580 = vrot.lane.b32.xlu1 %v475_v21, %s841_s14 }
  0x53   : > { %626 = vrot.lane.b32.xlu0 %v474_v22, %s842_s16 }
  0x54   : > { %630 = vrot.lane.b32.xlu2 %v476_v23, %s842_s16 }
  0x55   : > { %628 = vrot.lane.b32.xlu1 %v475_v21, %s842_s16 }
  0x5b   : > { %675 = vperm.xlu0 %824, %v672_v11  }
  0x76   : > { %v292_v24 = vpop.permute.xlu2 %291 }
  0x7e   : > { %v294_v25 = vpop.permute.xlu2 %293 }
  0x7f   : > { %v297_v26 = vsel %vm295_vm0, %v292_v24, %v294_v25  ;;  %v792_v25 = vld [vmem:[%s984_s1 + $0x1c] sm:$0xf] }
  0x80   : > { %v305_v27 = vsel %vm256_vm1, %v297_v26, 0 }
  0x81   : > { %327 = vmatpush.bf16.msra.mxu3 %v305_v27  ;;  %v789_v27 = vld [vmem:[%s984_s1 + $0x18] sm:$0xf] }
  0x84   : > { %776 = vmatmul.msk.bf16.vlgmr.msra.gmra.mxu3 %vm252_vm2, %v237_v28 }
  0x86   : > { %v340_v32 = vpop.permute.xlu2 %339 }
  0x8d   : > { %v244_v30 = vpop.permute.xlu0 %243 }
  0x8e   : > { %v388_v47 = vpop.permute.xlu2 %387 }
  0x8f   : > { %v248_v29 = vpop.permute.xlu1 %247 }
  0x95   : > { %v246_v33 = vpop.permute.xlu0 %245 }
  0x96   : > { %v250_v35 = vsel %vm249_vm3, %v244_v30, %v246_v33  ;;  %v251_v36 = vsel %vm249_vm3, %v246_v33, %v248_v29  ;;  %v487_v55 = vpop.permute.xlu2 %486 }
  0x97   : > { %v290_v31 = vpop.permute.xlu1 %289  ;;  %v258_v38 = vsel %vm256_vm1, %v250_v35, 0  ;;  %v261_v39 = vsel %vm256_vm1, %v251_v36, 0 }
  0x98   : > { %v296_v34 = vsel %vm295_vm0, %v290_v31, %v292_v24  ;;  %270 = vmatpush.bf16.msra.mxu0 %v258_v38  ;;  %283 = vmatpush.bf16.msra.mxu1 %v261_v39 }
  0x99   : > { %v302_v37 = vsel %vm256_vm1, %v296_v34, 0 }
  0x9a   : > { %314 = vmatpush.bf16.msra.mxu2 %v302_v37 }
  0x9b   : > { %773 = vmatmul.msk.bf16.vlgmr.msra.gmra.mxu0 %vm252_vm2, %v772_v40  ;;  %774 = vmatmul.msk.bf16.vlgmr.msra.gmra.mxu1 %vm252_vm2, %v772_v40 }
  0x9d   : > { %775 = vmatmul.msk.bf16.vlgmr.msra.gmra.mxu2 %vm252_vm2, %v237_v28  ;;  %v336_v42 = vpop.permute.xlu0 %335  ;;  %v795_v28 = vld [vmem:[%s984_s1 + $0x20] sm:$0xf] }
  0x9e   : > { %v535_v1 = vpop.permute.xlu2 %534 }
  0x9f   : > { %v338_v41 = vpop.permute.xlu1 %337 }
  0xa0   : > { %v343_v43 = vsel %vm341_vm4, %v338_v41, %v340_v32  ;;  %v342_v45 = vsel %vm341_vm4, %v336_v42, %v338_v41 }
  0xa1   : > { %v351_v46 = vsel %vm256_vm1, %v343_v43, 0  ;;  %v348_v49 = vsel %vm256_vm1, %v342_v45, 0 }
  0xa2   : > { %373 = vmatpush.bf16.msrb.mxu1 %v351_v46  ;;  %360 = vmatpush.bf16.msrb.mxu0 %v348_v49 }
  0xa5   : > { %v384_v51 = vpop.permute.xlu0 %383 }
  0xa6   : > { %460 = vmatpush.bf16.msra.mxu1 %v438_v44  ;;  %447 = vmatpush.bf16.msra.mxu0 %v435_v48  ;;  %v583_v10 = vpop.permute.xlu2 %582 }
  0xa7   : > { %v386_v50 = vpop.permute.xlu1 %385 }
  0xa8   : > { %v391_v52 = vsel %vm389_vm5, %v386_v50, %v388_v47  ;;  %v390_v53 = vsel %vm389_vm5, %v384_v51, %v386_v50 }
  0xa9   : > { %v399_v54 = vsel %vm256_vm1, %v391_v52, 0  ;;  %v396_v56 = vsel %vm256_vm1, %v390_v53, 0 }
  0xaa   : > { %421 = vmatpush.bf16.msrb.mxu3 %v399_v54  ;;  %408 = vmatpush.bf16.msrb.mxu2 %v396_v56 }
  0xab   : > { %778 = vmatmul.msk.bf16.vlgmr.msrb.gmra.mxu0 %vm252_vm2, %v777_v58  ;;  %779 = vmatmul.msk.bf16.vlgmr.msrb.gmra.mxu1 %vm252_vm2, %v777_v58 }
  0xad   : > { %782 = vmatmul.msk.bf16.vlgmr.msrb.gmra.mxu3 %vm252_vm2, %v780_v57  ;;  %781 = vmatmul.msk.bf16.vlgmr.msrb.gmra.mxu2 %vm252_vm2, %v780_v57  ;;  %v483_v61 = vpop.permute.xlu0 %482 }
  0xae   : > { %v631_v19 = vpop.permute.xlu2 %630 }
  0xaf   : > { %v485_v59 = vpop.permute.xlu1 %484 }
  0xb0   : > { %v490_v60 = vsel %vm488_vm6, %v485_v59, %v487_v55  ;;  %v489_v63 = vsel %vm488_vm6, %v483_v61, %v485_v59 }
  0xb1   : > { %v498_v62 = vsel %vm256_vm1, %v490_v60, 0  ;;  %v495_v0 = vsel %vm256_vm1, %v489_v63, 0  ;;  %v682_v60 = vld [vmem:[%s173_s26] sm:$0x3] }
  0xb2   : > { %520 = vmatpush.bf16.msra.mxu3 %v498_v62  ;;  %507 = vmatpush.bf16.msra.mxu2 %v495_v0  ;;  %vm683_vm10 = vcmp.gt.f32.partialorder %v682_v60, 0.5 }
  0xb5   : > { %v531_v4 = vpop.permute.xlu0 %530 }
  0xb7   : > { %v533_v2 = vpop.permute.xlu1 %532 }
  0xb8   : > { %v538_v3 = vsel %vm536_vm7, %v533_v2, %v535_v1  ;;  %v537_v6 = vsel %vm536_vm7, %v531_v4, %v533_v2 }
  0xb9   : > { %v546_v5 = vsel %vm256_vm1, %v538_v3, 0  ;;  %v543_v8 = vsel %vm256_vm1, %v537_v6, 0  ;;  %v684_v6 = vsel %vm683_vm10, 1, %v843_v13 }
  0xba   : > { %568 = vmatpush.bf16.msrb.mxu1 %v546_v5  ;;  %555 = vmatpush.bf16.msrb.mxu0 %v543_v8 }
  0xbb   : > { %784 = vmatmul.msk.bf16.vlgmr.msra.gmra.mxu0 %vm252_vm2, %v783_v9  ;;  %785 = vmatmul.msk.bf16.vlgmr.msra.gmra.mxu1 %vm252_vm2, %v783_v9 }
  0xbd   : > { %788 = vmatmul.msk.bf16.vlgmr.msra.gmra.mxu3 %vm252_vm2, %v786_v7  ;;  %787 = vmatmul.msk.bf16.vlgmr.msra.gmra.mxu2 %vm252_vm2, %v786_v7  ;;  %v579_v15 = vpop.permute.xlu0 %578 }
  0xbf   : > { %v581_v12 = vpop.permute.xlu1 %580 }
  0xc0   : > { %v586_v14 = vsel %vm584_vm8, %v581_v12, %v583_v10  ;;  %v585_v17 = vsel %vm584_vm8, %v579_v15, %v581_v12  ;;  %v685_v15 = vperm.slane %v684_v6, 0 }
  0xc1   : > { %v594_v16 = vsel %vm256_vm1, %v586_v14, 0  ;;  %v591_v18 = vsel %vm256_vm1, %v585_v17, 0 }
  0xc2   : > { %616 = vmatpush.bf16.msrb.mxu3 %v594_v16  ;;  %603 = vmatpush.bf16.msrb.mxu2 %v591_v18  ;;  %v686_v16 = vperm.slane %v684_v6, 1  ;;  %vm687_vm11 = vcmp.eq.s32.totalorder %v685_v15, 1 }
  0xc4   : > { %vm688_vm12 = vcmp.eq.s32.totalorder %v686_v16, 1 }
  0xc5   : > { %v627_v22 = vpop.permute.xlu0 %626 }
  0xc7   : > { %v629_v20 = vpop.permute.xlu1 %628 }
  0xc8   : > { %v634_v21 = vsel %vm632_vm9, %v629_v20, %v631_v19  ;;  %v633_v24 = vsel %vm632_vm9, %v627_v22, %v629_v20 }
  0xc9   : > { %v642_v23 = vsel %vm256_vm1, %v634_v21, 0  ;;  %v639_v26 = vsel %vm256_vm1, %v633_v24, 0 }
  0xca   : > { %664 = vmatpush.bf16.msra.mxu1 %v642_v23  ;;  %651 = vmatpush.bf16.msra.mxu0 %v639_v26 }
  0xcb   : > { %790 = vmatmul.msk.bf16.vlgmr.msrb.gmra.mxu0 %vm252_vm2, %v789_v27  ;;  %791 = vmatmul.msk.bf16.vlgmr.msrb.gmra.mxu1 %vm252_vm2, %v789_v27 }
  0xcd   : > { %794 = vmatmul.msk.bf16.vlgmr.msrb.gmra.mxu3 %vm252_vm2, %v792_v25  ;;  %793 = vmatmul.msk.bf16.vlgmr.msrb.gmra.mxu2 %vm252_vm2, %v792_v25  ;;  %v676_v12 = vpop.permute.xlu0 %675 }
  0xdb   : > { %796 = vmatmul.msk.bf16.vlgmr.msra.gmra.mxu0 %vm252_vm2, %v795_v28  ;;  %797 = vmatmul.msk.bf16.vlgmr.msra.gmra.mxu1 %vm252_vm2, %v795_v28 }
 0x107   : > { %v329_v29 = vpop.f32.mrf.mxu3 }
 0x10f   : > { %v331_v30 = vpop.f32.mrf.mxu3 }
 0x118   : > { %v272_v31 = vpop.f32.mrf.mxu0  ;;  %v285_v32 = vpop.f32.mrf.mxu1 }
 0x119   : > { %v330_v55 = vadd.f32 %v329_v29, %v285_v32 }
 0x120   : > { %v316_v33 = vpop.f32.mrf.mxu2  ;;  %v274_v34 = vpop.f32.mrf.mxu0 }
 0x121   : > { %v287_v35 = vpop.f32.mrf.mxu1  ;;  %v317_v56 = vadd.f32 %v316_v33, %v272_v31 }
 0x128   : > { %v318_v36 = vpop.f32.mrf.mxu2  ;;  %v362_v37 = vpop.f32.mrf.mxu0 }
 0x129   : > { %v375_v38 = vpop.f32.mrf.mxu1  ;;  %v379_v57 = vadd.f32 %v362_v37, %v317_v56 }
 0x12a   : > { %v380_v58 = vadd.f32 %v375_v38, %v330_v55 }
 0x130   : > { %v423_v39 = vpop.f32.mrf.mxu3  ;;  %v410_v40 = vpop.f32.mrf.mxu2 }
 0x131   : > { %v364_v41 = vpop.f32.mrf.mxu0  ;;  %v377_v42 = vpop.f32.mrf.mxu1  ;;  %v427_v61 = vadd.f32 %v410_v40, %v379_v57  ;;  %v428_v62 = vadd.f32 %v423_v39, %v380_v58 }
 0x138   : > { %v425_v43 = vpop.f32.mrf.mxu3  ;;  %v412_v44 = vpop.f32.mrf.mxu2 }
 0x139   : > { %v449_v45 = vpop.f32.mrf.mxu0  ;;  %v462_v46 = vpop.f32.mrf.mxu1 }
 0x13a   : > { %v466_v2 = vadd.f32 %v449_v45, %v427_v61  ;;  %v467_v3 = vadd.f32 %v462_v46, %v428_v62 }
 0x140   : > { %v522_v47 = vpop.f32.mrf.mxu3  ;;  %v509_v48 = vpop.f32.mrf.mxu2 }
 0x141   : > { %v451_v49 = vpop.f32.mrf.mxu0  ;;  %v464_v50 = vpop.f32.mrf.mxu1  ;;  %v526_v4 = vadd.f32 %v509_v48, %v466_v2  ;;  %v527_v5 = vadd.f32 %v522_v47, %v467_v3 }
 0x148   : > { %v524_v51 = vpop.f32.mrf.mxu3  ;;  %v511_v52 = vpop.f32.mrf.mxu2 }
 0x149   : > { %v557_v53 = vpop.f32.mrf.mxu0  ;;  %v570_v54 = vpop.f32.mrf.mxu1 }
 0x14a   : > { %v574_v7 = vadd.f32 %v557_v53, %v526_v4  ;;  %v575_v8 = vadd.f32 %v570_v54, %v527_v5 }
 0x150   : > { %v618_v59 = vpop.f32.mrf.mxu3  ;;  %v605_v63 = vpop.f32.mrf.mxu2 }
 0x151   : > { %v559_v0 = vpop.f32.mrf.mxu0  ;;  %v572_v1 = vpop.f32.mrf.mxu1  ;;  %v622_v10 = vadd.f32 %v605_v63, %v574_v7  ;;  %v623_v11 = vadd.f32 %v618_v59, %v575_v8 }
 0x158   : > { %v620_v9 = vpop.f32.mrf.mxu3  ;;  %v607_v14 = vpop.f32.mrf.mxu2 }
 0x159   : > { %v653_v17 = vpop.f32.mrf.mxu0  ;;  %v666_v18 = vpop.f32.mrf.mxu1 }
 0x15a   : > { %v670_v19 = vadd.f32 %v653_v17, %v622_v10  ;;  %v671_v20 = vadd.f32 %v666_v18, %v623_v11 }
 0x15c   : > { %v678_v21 = vadd.f32 %v676_v12, %v670_v19  ;;  %v679_v22 = vadd.f32 %v676_v12, %v671_v20 }
 0x15e   : > { %v680_v23 = vmax.f32 %v678_v21, 0.0  ;;  %v681_v13 = vmax.f32 %v679_v22, 0.0 }
 0x160   : > { %v689_v24 = vsel %vm687_vm11, %v680_v23, 0.0  ;;  %v690_v25 = vsel %vm688_vm12, %v681_v13, 0.0 }
 0x161   : > { %v691_v26 = vpack.c.bf16 %v690_v25, %v689_v24  ;;  %v655_v27 = vpop.f32.mrf.mxu0  ;;  %v668_v28 = vpop.f32.mrf.mxu1 }
 0x163   : > { %692 = vst [vmem:[%s887_s30] sm:$0xff] %v691_v26 }
 0x164 PF: > { %s14_s15 = sadd.s32 1, %s833_s15  }
 0x165   : > { %p11_p4 = scmp.ge.s32.totalorder %s14_s15, 7  }
 0x167   :  { %13 = sbr.rel (!%p11_p4) target bundleno = 1 (0x1), region = 94 }
 0x16c   :  { %718 = vsyncmov [#allocation3] }
 0x16f   :  { %s719_s19 = vpop.sfrf %718 }
 0x170   :  { %p800_p5 = scmp.ne.s32.totalorder %s719_s19, 0 }
 0x172   :  { %723 = shalt.err (%p800_p5)  }

// kernel: blender_forward.13
= control target key start
LH: loop header
LB: loop body
LE: loop exit
PB: predicated region body
PF: predicated region fallthrough
CT: control target
= control target key end

     0   :  { %s656_s15 = smov 0   ;;  %s739_s0 = inlined_call_operand.vmem [shape: bf16[8,640], index: 0, kind: input, shape index: {}]   ;;  %s740_s1 = inlined_call_operand.vmem [shape: bf16[9,8,8], index: 1, kind: input, shape index: {}]   ;;  %s741_s2 = inlined_call_operand.vmem [shape: f32[8,1], index: 2, kind: input, shape index: {}]   ;;  %s742_s3 = inlined_call_operand.vmem [shape: f32[1,640], index: 3, kind: input, shape index: {}]   ;;  %s743_s4 = inlined_call_operand.vmem [shape: bf16[8,640], index: 4, kind: output, shape index: {}]  }
   0x1 LB: > { %s561_s16 = sadd.s32 4294967295, %s620_s15   ;;  %p565_p0 = scmp.ge.s32.totalorder %s620_s15, 1  ;;  %s620_s15 = sphi %s656_s15, %s14_s15  }
   0x2   : > { %p142_p1 = scmp.lt.s32.totalorder %s620_s15, 4 }
   0x4   : > { %p143_p2 = pnand %p565_p0, %p142_p1 }
   0x5   : > { %s165_s17 = sadd.s32 (!%p143_p2), 1, %s561_s16  ;;  %s591_s18 = sshll.u32 (!%p143_p2), %s561_s16, 7 }
   0x6   : > { %146 = sbr.rel (%p143_p2) target bundleno = 321 (0x141), region = 32  ;;  %p166_p3 = scmp.lt.s32.totalorder (!%p143_p2), %s165_s17, 4 }
   0x7   : > { %s592_s19 = sadd.s32 (!%p143_p2), 128, %s591_s18 }
   0x8   : > { %s568_s20 = sadd.s32 (!%p143_p2), 4294967168, %s592_s19 }
   0x9   : > { %s180_s21 = sshra.s32 (!%p143_p2), %s568_s20, 7 }
   0xa   : > { %s569_s29 = sshll.u32 (!%p143_p2), %s180_s21, 2 }
   0xb   : > { %s745_s17 = smov (!%p166_p3, %s165_s17), 4  ;;  %s183_s6 = scalar_lea.vmem %s739_s0, %s569_s29 }
   0xc   : > { %s168_s24 = scalar_lea.vmem %s742_s3, %s745_s17  ;;  %s566_s25 = sshll.u32 %s745_s17, 2  ;;  %v196_v0 = vld [vmem:[%s183_s6] sm:$0xff]  ;;  %v570_v1 = vld [vmem:[%s183_s6 + $0x8] sm:$0xf] }
   0xd   : > { %s674_s28 = scalar_lea.vmem %s743_s4, %s566_s25  ;;  %197 = vst [vmem:[#allocation2] sm:$0xff] %v196_v0 }
   0xe   : > { %209 = vst [vmem:[#allocation2 + $0x8] sm:$0xf] %v570_v1 }
   0xf   : > { %213 = vsyncadd [#allocation3], 192 }
  0x10   : > { %616 = dma.done.wait [#allocation3], 192 }
  0x11   : > { %617 = vsyncadd [#allocation3], 4294967104  ;;  %s622_s7 = smov 17   ;;  %s623_s8 = smov 18   ;;  %vm313_vm0 = vcmask 7168   ;;  %vm237_vm1 = vcmask 1043456  }
  0x12   : > { %s624_s9 = smov 1   ;;  %s625_s10 = smov 19   ;;  %vm233_vm2 = vcmask 64512   ;;  %v576_v16 = vld [vmem:[%s740_s1 + $0xc] sm:$0xf]  ;;  %vm231_vm3 = vcmask 146432  }
  0x13   : > { %s626_s11 = smov 111   ;;  %s627_s12 = smov 110   ;;  %vm285_vm4 = vcmask 138240   ;;  %v571_v27 = vld [vmem:[%s740_s1 + $0x4] sm:$0xf]  ;;  %vm258_vm5 = vcmask 154624  }
  0x14   : > { %v218_v2 = vld [vmem:[#allocation2] sm:$0xff]  ;;  %s628_s13 = smov 127   ;;  %s629_s14 = smov 109   ;;  %v574_v28 = vld [vmem:[%s740_s1 + $0x8] sm:$0xf]  ;;  %v630_v31 = vmov 0  }
  0x15   : > { %v223_v3 = vunpack.c.l.b16 %v218_v2  ;;  %v224_v5 = vunpack.c.h.b16 %v218_v2  ;;  %v358_v7 = vld [vmem:[#allocation2 + $0x4] sm:$0xff]  ;;  %610 = vset.pattern.permute.xlu1 %v630_v31  ;;  %611 = vset.pattern.permute.xlu0 %v630_v31  ;;  %v219_v36 = vld [vmem:[%s740_s1] sm:$0xf]  ;;  %vm398_vm6 = vcmask 908288   ;;  %vm426_vm7 = vcmask 900096  }
  0x16   : > { %v362_v8 = vunpack.c.l.b16 %v358_v7  ;;  %v363_v10 = vunpack.c.h.b16 %v358_v7  ;;  %v335_v19 = vld [vmem:[#allocation2 + $0x4] sm:$0xf]  ;;  %v578_v44 = vld [vmem:[%s740_s1 + $0x10] sm:$0xf]  ;;  %v582_v45 = vld [vmem:[%s740_s1 + $0x18] sm:$0xf] }
  0x17   : > { %v225_v4 = vpack.c.b16 %v223_v3, %v223_v3  ;;  %v226_v6 = vpack.c.b16 %v224_v5, %v224_v5  ;;  %v342_v24 = vsel %vm237_vm1, %v335_v19, 0  ;;  %v476_v30 = vld [vmem:[%s741_s2] sm:$0xff]  ;;  %v584_v46 = vld [vmem:[%s740_s1 + $0x1c] sm:$0xf]  ;;  %vm370_vm8 = vcmask 1039360  }
  0x18   : > { %v364_v9 = vpack.c.b16 %v362_v8, %v362_v8  ;;  %v365_v11 = vpack.c.b16 %v363_v10, %v363_v10  ;;  %v580_v51 = vld [vmem:[%s740_s1 + $0x14] sm:$0xf]  ;;  %vm454_vm9 = vcmask 891904   ;;  %v586_v56 = vld [vmem:[%s740_s1 + $0x20] sm:$0xf] }
  0x19   : > { %281 = vrot.lane.b32.xlu1 %v225_v4, %s622_s7  ;;  %227 = vrot.lane.b32.xlu0 %v225_v4, %s623_s8 }
  0x1a   : > { %309 = vrot.lane.b32.xlu2 %v225_v4, %s624_s9 }
  0x21   : > { %283 = vrot.lane.b32.xlu1 %v226_v6, %s622_s7  ;;  %229 = vrot.lane.b32.xlu0 %v226_v6, %s623_s8 }
  0x22   : > { %311 = vrot.lane.b32.xlu2 %v226_v6, %s624_s9 }
  0x29   : > { %256 = vrot.lane.b32.xlu1 %v226_v6, %s625_s10  ;;  %254 = vrot.lane.b32.xlu0 %v225_v4, %s625_s10  ;;  %v484_v6 = vld [vmem:[%s168_s24] sm:$0x1] }
  0x2a   : > { %394 = vrot.lane.b32.xlu2 %v364_v9, %s626_s11  ;;  %vm485_vm10 = vcmp.gt.f32.partialorder %v484_v6, 0.5 }
  0x31   : > { %422 = vrot.lane.b32.xlu1 %v364_v9, %s627_s12  ;;  %396 = vrot.lane.b32.xlu0 %v365_v11, %s626_s11 }
  0x32   : > { %424 = vrot.lane.b32.xlu2 %v365_v11, %s627_s12 }
  0x39   : > { %368 = vrot.lane.b32.xlu1 %v365_v11, %s628_s13  ;;  %366 = vrot.lane.b32.xlu0 %v364_v9, %s628_s13 }
  0x3a   : > { %450 = vrot.lane.b32.xlu2 %v364_v9, %s629_s14 }
  0x41   : > { %452 = vrot.lane.b32.xlu0 %v365_v11, %s629_s14  ;;  %479 = vperm.xlu1 %610, %v476_v30  }
  0x74   : > { %v310_v12 = vpop.permute.xlu2 %309 }
  0x7c   : > { %v312_v13 = vpop.permute.xlu2 %311 }
  0x7d   : > { %v314_v14 = vsel %vm313_vm0, %v310_v12, %v312_v13  ;;  %v486_v13 = vsel %vm485_vm10, 1, %v630_v31 }
  0x7e   : > { %v319_v15 = vsel %vm237_vm1, %v314_v14, 0 }
  0x7f   : > { %328 = vmatpush.bf16.msra.mxu3 %v319_v15 }
  0x82   : > { %577 = vmatmul.msk.bf16.vlgmr.msra.gmra.mxu3 %vm233_vm2, %v576_v16 }
  0x84   : > { %v395_v29 = vpop.permute.xlu2 %394 }
  0x8b   : > { %v282_v17 = vpop.permute.xlu1 %281  ;;  %v228_v18 = vpop.permute.xlu0 %227 }
  0x8c   : > { %v425_v37 = vpop.permute.xlu2 %424 }
  0x93   : > { %v284_v20 = vpop.permute.xlu1 %283  ;;  %v230_v21 = vpop.permute.xlu0 %229 }
  0x94   : > { %v232_v22 = vsel %vm231_vm3, %v228_v18, %v230_v21  ;;  %v286_v23 = vsel %vm285_vm4, %v282_v17, %v284_v20  ;;  %v451_v52 = vpop.permute.xlu2 %450  ;;  %v487_v18 = vperm.slane %v486_v13, 0 }
  0x95   : > { %v239_v25 = vsel %vm237_vm1, %v232_v22, 0  ;;  %v291_v26 = vsel %vm237_vm1, %v286_v23, 0 }
  0x96   : > { %248 = vmatpush.bf16.msra.mxu0 %v239_v25  ;;  %300 = vmatpush.bf16.msra.mxu2 %v291_v26  ;;  %vm488_vm11 = vcmp.eq.s32.totalorder %v487_v18, 1 }
  0x99   : > { %572 = vmatmul.msk.bf16.vlgmr.msra.gmra.mxu0 %vm233_vm2, %v571_v27  ;;  %575 = vmatmul.msk.bf16.vlgmr.msra.gmra.mxu2 %vm233_vm2, %v574_v28 }
  0x9a   : > { %351 = vmatpush.bf16.msrb.mxu0 %v342_v24 }
  0x9b   : > { %v257_v32 = vpop.permute.xlu1 %256  ;;  %v255_v33 = vpop.permute.xlu0 %254 }
  0x9c   : > { %v259_v34 = vsel %vm258_vm5, %v255_v33, %v257_v32 }
  0x9d   : > { %v264_v35 = vsel %vm237_vm1, %v259_v34, 0 }
  0x9e   : > { %273 = vmatpush.bf16.msra.mxu1 %v264_v35 }
  0xa1   : > { %573 = vmatmul.msk.bf16.vlgmr.msra.gmra.mxu1 %vm233_vm2, %v219_v36 }
  0xa3   : > { %v423_v38 = vpop.permute.xlu1 %422  ;;  %v397_v39 = vpop.permute.xlu0 %396 }
  0xa4   : > { %v399_v40 = vsel %vm398_vm6, %v395_v29, %v397_v39  ;;  %v427_v41 = vsel %vm426_vm7, %v423_v38, %v425_v37 }
  0xa5   : > { %v404_v42 = vsel %vm237_vm1, %v399_v40, 0  ;;  %v432_v43 = vsel %vm237_vm1, %v427_v41, 0 }
  0xa6   : > { %413 = vmatpush.bf16.msrb.mxu2 %v404_v42  ;;  %441 = vmatpush.bf16.msrb.mxu3 %v432_v43 }
  0xa9   : > { %579 = vmatmul.msk.bf16.vlgmr.msrb.gmra.mxu0 %vm233_vm2, %v578_v44  ;;  %583 = vmatmul.msk.bf16.vlgmr.msrb.gmra.mxu2 %vm233_vm2, %v582_v45 }
  0xaa   : > { %585 = vmatmul.msk.bf16.vlgmr.msrb.gmra.mxu3 %vm233_vm2, %v584_v46 }
  0xab   : > { %v369_v47 = vpop.permute.xlu1 %368  ;;  %v367_v48 = vpop.permute.xlu0 %366 }
  0xac   : > { %v371_v49 = vsel %vm370_vm8, %v367_v48, %v369_v47 }
  0xad   : > { %v376_v50 = vsel %vm237_vm1, %v371_v49, 0 }
  0xae   : > { %385 = vmatpush.bf16.msrb.mxu1 %v376_v50 }
  0xb1   : > { %581 = vmatmul.msk.bf16.vlgmr.msrb.gmra.mxu1 %vm233_vm2, %v580_v51 }
  0xb3   : > { %v453_v53 = vpop.permute.xlu0 %452  ;;  %v480_v16 = vpop.permute.xlu1 %479 }
  0xb4   : > { %v455_v54 = vsel %vm454_vm9, %v451_v52, %v453_v53 }
  0xb5   : > { %v460_v55 = vsel %vm237_vm1, %v455_v54, 0 }
  0xb6   : > { %469 = vmatpush.bf16.msra.mxu0 %v460_v55 }
  0xb9   : > { %587 = vmatmul.msk.bf16.vlgmr.msra.gmra.mxu0 %vm233_vm2, %v586_v56 }
 0x105   : > { %v330_v57 = vpop.f32.mrf.mxu3 }
 0x10d   : > { %v332_v58 = vpop.f32.mrf.mxu3 }
 0x116   : > { %v250_v59 = vpop.f32.mrf.mxu0 }
 0x11c   : > { %v302_v60 = vpop.f32.mrf.mxu2 }
 0x11e   : > { %v252_v61 = vpop.f32.mrf.mxu0  ;;  %v275_v62 = vpop.f32.mrf.mxu1 }
 0x11f   : > { %v276_v63 = vadd.f32 %v275_v62, %v250_v59 }
 0x121   : > { %v306_v3 = vadd.f32 %v302_v60, %v276_v63 }
 0x123   : > { %v334_v4 = vadd.f32 %v330_v57, %v306_v3 }
 0x124   : > { %v304_v0 = vpop.f32.mrf.mxu2 }
 0x126   : > { %v277_v1 = vpop.f32.mrf.mxu1  ;;  %v353_v2 = vpop.f32.mrf.mxu0 }
 0x127   : > { %v357_v7 = vadd.f32 %v353_v2, %v334_v4 }
 0x12c   : > { %v415_v5 = vpop.f32.mrf.mxu2 }
 0x12d   : > { %v443_v8 = vpop.f32.mrf.mxu3 }
 0x12e   : > { %v355_v9 = vpop.f32.mrf.mxu0  ;;  %v387_v10 = vpop.f32.mrf.mxu1 }
 0x12f   : > { %v391_v11 = vadd.f32 %v387_v10, %v357_v7 }
 0x131   : > { %v419_v12 = vadd.f32 %v415_v5, %v391_v11 }
 0x133   : > { %v447_v15 = vadd.f32 %v443_v8, %v419_v12 }
 0x134   : > { %v417_v14 = vpop.f32.mrf.mxu2 }
 0x135   : > { %v445_v17 = vpop.f32.mrf.mxu3 }
 0x136   : > { %v471_v19 = vpop.f32.mrf.mxu0  ;;  %v389_v20 = vpop.f32.mrf.mxu1 }
 0x137   : > { %v475_v21 = vadd.f32 %v471_v19, %v447_v15 }
 0x139   : > { %v482_v22 = vadd.f32 %v480_v16, %v475_v21 }
 0x13b   : > { %v483_v23 = vmax.f32 %v482_v22, 0.0 }
 0x13d   : > { %v489_v24 = vsel %vm488_vm11, %v483_v23, 0.0 }
 0x13e   : > { %v490_v25 = vpack.c.bf16 %v489_v24, %v489_v24  ;;  %v473_v26 = vpop.f32.mrf.mxu0 }
 0x140   : > { %491 = vst [vmem:[%s674_s28] sm:$0xf] %v490_v25 }
 0x141 PF: > { %s14_s15 = sadd.s32 1, %s620_s15  }
 0x142   : > { %p11_p4 = scmp.ge.s32.totalorder %s14_s15, 5  }
 0x144   :  { %13 = sbr.rel (!%p11_p4) target bundleno = 1 (0x1), region = 103 }
 0x149   :  { %514 = vsyncmov [#allocation3] }
 0x14c   :  { %s515_s17 = vpop.sfrf %514 }
 0x14d   :  { %p590_p5 = scmp.ne.s32.totalorder %s515_s17, 0 }
 0x14f   :  { %519 = shalt.err (%p590_p5)  }

// kernel: blender_forward.15
= control target key start
LH: loop header
LB: loop body
LE: loop exit
PB: predicated region body
PF: predicated region fallthrough
CT: control target
= control target key end

     0   :  { %s728_s18 = smov 0   ;;  %s817_s0 = inlined_call_operand.vmem [shape: bf16[8,640], index: 0, kind: input, shape index: {}]   ;;  %s818_s1 = inlined_call_operand.vmem [shape: bf16[9,8,8], index: 1, kind: input, shape index: {}]   ;;  %s819_s2 = inlined_call_operand.vmem [shape: f32[8,1], index: 2, kind: input, shape index: {}]   ;;  %s820_s3 = inlined_call_operand.vmem [shape: f32[1,640], index: 3, kind: input, shape index: {}]   ;;  %s821_s4 = inlined_call_operand.vmem [shape: bf16[8,640], index: 4, kind: input, shape index: {}]   ;;  %s822_s5 = inlined_call_operand.vmem [shape: bf16[8,640], index: 5, kind: output, shape index: {}]  }
   0x1 LB: > { %s627_s19 = sadd.s32 4294967295, %s687_s18   ;;  %p631_p0 = scmp.ge.s32.totalorder %s687_s18, 1  ;;  %s687_s18 = sphi %s728_s18, %s15_s18  }
   0x2   : > { %p180_p1 = scmp.lt.s32.totalorder %s687_s18, 4 }
   0x4   : > { %p181_p2 = pnand %p631_p0, %p180_p1 }
   0x5   : > { %s210_s20 = sadd.s32 (!%p181_p2), 1, %s627_s19  ;;  %s658_s21 = sshll.u32 (!%p181_p2), %s627_s19, 7 }
   0x6   : > { %184 = sbr.rel (%p181_p2) target bundleno = 323 (0x143), region = 36  ;;  %p211_p3 = scmp.lt.s32.totalorder (!%p181_p2), %s210_s20, 4 }
   0x7   : > { %s659_s22 = sadd.s32 (!%p181_p2), 128, %s658_s21 }
   0x8   : > { %s635_s23 = sadd.s32 (!%p181_p2), 4294967168, %s659_s22 }
   0x9   : > { %s231_s24 = sshra.s32 (!%p181_p2), %s635_s23, 7 }
   0xa   : > { %s636_s10 = sshll.u32 (!%p181_p2), %s231_s24, 2 }
   0xb   : > { %s824_s20 = smov (!%p211_p3, %s210_s20), 4  ;;  %s234_s13 = scalar_lea.vmem %s817_s0, %s636_s10 }
   0xc   : > { %s213_s27 = scalar_lea.vmem %s820_s3, %s824_s20  ;;  %s632_s28 = sshll.u32 %s824_s20, 2  ;;  %v247_v0 = vld [vmem:[%s234_s13] sm:$0xff]  ;;  %v637_v1 = vld [vmem:[%s234_s13 + $0x8] sm:$0xf] }
   0xd   : > { %s746_s6 = scalar_lea.vmem %s821_s4, %s632_s28  ;;  %s751_s9 = scalar_lea.vmem %s822_s5, %s632_s28  ;;  %248 = vst [vmem:[#allocation2] sm:$0xff] %v247_v0 }
   0xe   : > { %260 = vst [vmem:[#allocation2 + $0x8] sm:$0xf] %v637_v1 }
   0xf   : > { %264 = vsyncadd [#allocation3], 192 }
  0x10   : > { %683 = dma.done.wait [#allocation3], 192 }
  0x11   : > { %684 = vsyncadd [#allocation3], 4294967104  ;;  %s689_s14 = smov 17   ;;  %s690_s15 = smov 18   ;;  %vm364_vm0 = vcmask 7168   ;;  %vm288_vm1 = vcmask 1043456  }
  0x12   : > { %s691_s16 = smov 1   ;;  %s692_s17 = smov 19   ;;  %vm284_vm2 = vcmask 64512   ;;  %v643_v16 = vld [vmem:[%s818_s1 + $0xc] sm:$0xf]  ;;  %vm282_vm3 = vcmask 146432  }
  0x13   : > { %s693_s19 = smov 111   ;;  %s694_s21 = smov 110   ;;  %vm336_vm4 = vcmask 138240   ;;  %v638_v27 = vld [vmem:[%s818_s1 + $0x4] sm:$0xf]  ;;  %vm309_vm5 = vcmask 154624  }
  0x14   : > { %v269_v2 = vld [vmem:[#allocation2] sm:$0xff]  ;;  %s695_s22 = smov 127   ;;  %s696_s23 = smov 109   ;;  %v641_v28 = vld [vmem:[%s818_s1 + $0x8] sm:$0xf]  ;;  %v697_v31 = vmov 0  }
  0x15   : > { %v274_v3 = vunpack.c.l.b16 %v269_v2  ;;  %v275_v5 = vunpack.c.h.b16 %v269_v2  ;;  %v409_v7 = vld [vmem:[#allocation2 + $0x4] sm:$0xff]  ;;  %677 = vset.pattern.permute.xlu1 %v697_v31  ;;  %678 = vset.pattern.permute.xlu0 %v697_v31  ;;  %v270_v36 = vld [vmem:[%s818_s1] sm:$0xf]  ;;  %vm449_vm6 = vcmask 908288   ;;  %vm477_vm7 = vcmask 900096  }
  0x16   : > { %v413_v8 = vunpack.c.l.b16 %v409_v7  ;;  %v414_v10 = vunpack.c.h.b16 %v409_v7  ;;  %v386_v19 = vld [vmem:[#allocation2 + $0x4] sm:$0xf]  ;;  %v645_v44 = vld [vmem:[%s818_s1 + $0x10] sm:$0xf]  ;;  %v649_v45 = vld [vmem:[%s818_s1 + $0x18] sm:$0xf] }
  0x17   : > { %v276_v4 = vpack.c.b16 %v274_v3, %v274_v3  ;;  %v277_v6 = vpack.c.b16 %v275_v5, %v275_v5  ;;  %v393_v24 = vsel %vm288_vm1, %v386_v19, 0  ;;  %v527_v30 = vld [vmem:[%s819_s2] sm:$0xff]  ;;  %v651_v46 = vld [vmem:[%s818_s1 + $0x1c] sm:$0xf]  ;;  %vm421_vm8 = vcmask 1039360  }
  0x18   : > { %v415_v9 = vpack.c.b16 %v413_v8, %v413_v8  ;;  %v416_v11 = vpack.c.b16 %v414_v10, %v414_v10  ;;  %v647_v51 = vld [vmem:[%s818_s1 + $0x14] sm:$0xf]  ;;  %vm505_vm9 = vcmask 891904   ;;  %v653_v56 = vld [vmem:[%s818_s1 + $0x20] sm:$0xf] }
  0x19   : > { %332 = vrot.lane.b32.xlu1 %v276_v4, %s689_s14  ;;  %278 = vrot.lane.b32.xlu0 %v276_v4, %s690_s15  ;;  %v538_v10 = vld [vmem:[%s213_s27] sm:$0x1] }
  0x1a   : > { %360 = vrot.lane.b32.xlu2 %v276_v4, %s691_s16  ;;  %vm539_vm10 = vcmp.gt.f32.partialorder %v538_v10, 0.5 }
  0x21   : > { %334 = vrot.lane.b32.xlu1 %v277_v6, %s689_s14  ;;  %280 = vrot.lane.b32.xlu0 %v277_v6, %s690_s15 }
  0x22   : > { %362 = vrot.lane.b32.xlu2 %v277_v6, %s691_s16 }
  0x29   : > { %307 = vrot.lane.b32.xlu1 %v277_v6, %s692_s17  ;;  %305 = vrot.lane.b32.xlu0 %v276_v4, %s692_s17 }
  0x2a   : > { %445 = vrot.lane.b32.xlu2 %v415_v9, %s693_s19 }
  0x31   : > { %473 = vrot.lane.b32.xlu1 %v415_v9, %s694_s21  ;;  %447 = vrot.lane.b32.xlu0 %v416_v11, %s693_s19 }
  0x32   : > { %475 = vrot.lane.b32.xlu2 %v416_v11, %s694_s21 }
  0x39   : > { %419 = vrot.lane.b32.xlu1 %v416_v11, %s695_s22  ;;  %417 = vrot.lane.b32.xlu0 %v415_v9, %s695_s22 }
  0x3a   : > { %501 = vrot.lane.b32.xlu2 %v415_v9, %s696_s23 }
  0x41   : > { %503 = vrot.lane.b32.xlu0 %v416_v11, %s696_s23  ;;  %530 = vperm.xlu1 %677, %v527_v30  }
  0x74   : > { %v361_v12 = vpop.permute.xlu2 %360 }
  0x7c   : > { %v363_v13 = vpop.permute.xlu2 %362 }
  0x7d   : > { %v365_v14 = vsel %vm364_vm0, %v361_v12, %v363_v13  ;;  %v534_v13 = vld [vmem:[%s746_s6] sm:$0xf] }
  0x7e   : > { %v370_v15 = vsel %vm288_vm1, %v365_v14, 0 }
  0x7f   : > { %379 = vmatpush.bf16.msra.mxu3 %v370_v15  ;;  %v540_v15 = vsel %vm539_vm10, 1, %v697_v31 }
  0x82   : > { %644 = vmatmul.msk.bf16.vlgmr.msra.gmra.mxu3 %vm284_vm2, %v643_v16 }
  0x84   : > { %v446_v29 = vpop.permute.xlu2 %445 }
  0x8b   : > { %v333_v17 = vpop.permute.xlu1 %332  ;;  %v279_v18 = vpop.permute.xlu0 %278 }
  0x8c   : > { %v476_v37 = vpop.permute.xlu2 %475 }
  0x93   : > { %v335_v20 = vpop.permute.xlu1 %334  ;;  %v281_v21 = vpop.permute.xlu0 %280 }
  0x94   : > { %v283_v22 = vsel %vm282_vm3, %v279_v18, %v281_v21  ;;  %v337_v23 = vsel %vm336_vm4, %v333_v17, %v335_v20  ;;  %v502_v52 = vpop.permute.xlu2 %501 }
  0x95   : > { %v290_v25 = vsel %vm288_vm1, %v283_v22, 0  ;;  %v342_v26 = vsel %vm288_vm1, %v337_v23, 0  ;;  %v535_v22 = vunpack.c.l.bf16 %v534_v13  ;;  %v541_v23 = vperm.slane %v540_v15, 0 }
  0x96   : > { %299 = vmatpush.bf16.msra.mxu0 %v290_v25  ;;  %351 = vmatpush.bf16.msra.mxu2 %v342_v26 }
  0x97   : > { %vm542_vm11 = vcmp.eq.s32.totalorder %v541_v23, 1 }
  0x99   : > { %639 = vmatmul.msk.bf16.vlgmr.msra.gmra.mxu0 %vm284_vm2, %v638_v27  ;;  %642 = vmatmul.msk.bf16.vlgmr.msra.gmra.mxu2 %vm284_vm2, %v641_v28 }
  0x9a   : > { %402 = vmatpush.bf16.msrb.mxu0 %v393_v24 }
  0x9b   : > { %v308_v32 = vpop.permute.xlu1 %307  ;;  %v306_v33 = vpop.permute.xlu0 %305 }
  0x9c   : > { %v310_v34 = vsel %vm309_vm5, %v306_v33, %v308_v32 }
  0x9d   : > { %v315_v35 = vsel %vm288_vm1, %v310_v34, 0 }
  0x9e   : > { %324 = vmatpush.bf16.msra.mxu1 %v315_v35 }
  0xa1   : > { %640 = vmatmul.msk.bf16.vlgmr.msra.gmra.mxu1 %vm284_vm2, %v270_v36 }
  0xa3   : > { %v474_v38 = vpop.permute.xlu1 %473  ;;  %v448_v39 = vpop.permute.xlu0 %447 }
  0xa4   : > { %v450_v40 = vsel %vm449_vm6, %v446_v29, %v448_v39  ;;  %v478_v41 = vsel %vm477_vm7, %v474_v38, %v476_v37 }
  0xa5   : > { %v455_v42 = vsel %vm288_vm1, %v450_v40, 0  ;;  %v483_v43 = vsel %vm288_vm1, %v478_v41, 0 }
  0xa6   : > { %464 = vmatpush.bf16.msrb.mxu2 %v455_v42  ;;  %492 = vmatpush.bf16.msrb.mxu3 %v483_v43 }
  0xa9   : > { %646 = vmatmul.msk.bf16.vlgmr.msrb.gmra.mxu0 %vm284_vm2, %v645_v44  ;;  %650 = vmatmul.msk.bf16.vlgmr.msrb.gmra.mxu2 %vm284_vm2, %v649_v45 }
  0xaa   : > { %652 = vmatmul.msk.bf16.vlgmr.msrb.gmra.mxu3 %vm284_vm2, %v651_v46 }
  0xab   : > { %v420_v47 = vpop.permute.xlu1 %419  ;;  %v418_v48 = vpop.permute.xlu0 %417 }
  0xac   : > { %v422_v49 = vsel %vm421_vm8, %v418_v48, %v420_v47 }
  0xad   : > { %v427_v50 = vsel %vm288_vm1, %v422_v49, 0 }
  0xae   : > { %436 = vmatpush.bf16.msrb.mxu1 %v427_v50 }
  0xb1   : > { %648 = vmatmul.msk.bf16.vlgmr.msrb.gmra.mxu1 %vm284_vm2, %v647_v51 }
  0xb3   : > { %v504_v53 = vpop.permute.xlu0 %503  ;;  %v531_v17 = vpop.permute.xlu1 %530 }
  0xb4   : > { %v506_v54 = vsel %vm505_vm9, %v502_v52, %v504_v53 }
  0xb5   : > { %v511_v55 = vsel %vm288_vm1, %v506_v54, 0 }
  0xb6   : > { %520 = vmatpush.bf16.msra.mxu0 %v511_v55 }
  0xb9   : > { %654 = vmatmul.msk.bf16.vlgmr.msra.gmra.mxu0 %vm284_vm2, %v653_v56 }
 0x105   : > { %v381_v57 = vpop.f32.mrf.mxu3 }
 0x10d   : > { %v383_v58 = vpop.f32.mrf.mxu3 }
 0x116   : > { %v301_v59 = vpop.f32.mrf.mxu0 }
 0x11c   : > { %v353_v60 = vpop.f32.mrf.mxu2 }
 0x11e   : > { %v303_v61 = vpop.f32.mrf.mxu0  ;;  %v326_v62 = vpop.f32.mrf.mxu1 }
 0x11f   : > { %v327_v63 = vadd.f32 %v326_v62, %v301_v59 }
 0x121   : > { %v357_v3 = vadd.f32 %v353_v60, %v327_v63 }
 0x123   : > { %v385_v4 = vadd.f32 %v381_v57, %v357_v3 }
 0x124   : > { %v355_v0 = vpop.f32.mrf.mxu2 }
 0x126   : > { %v328_v1 = vpop.f32.mrf.mxu1  ;;  %v404_v2 = vpop.f32.mrf.mxu0 }
 0x127   : > { %v408_v6 = vadd.f32 %v404_v2, %v385_v4 }
 0x12c   : > { %v466_v5 = vpop.f32.mrf.mxu2 }
 0x12d   : > { %v494_v7 = vpop.f32.mrf.mxu3 }
 0x12e   : > { %v406_v8 = vpop.f32.mrf.mxu0  ;;  %v438_v9 = vpop.f32.mrf.mxu1 }
 0x12f   : > { %v442_v11 = vadd.f32 %v438_v9, %v408_v6 }
 0x131   : > { %v470_v12 = vadd.f32 %v466_v5, %v442_v11 }
 0x133   : > { %v498_v16 = vadd.f32 %v494_v7, %v470_v12 }
 0x134   : > { %v468_v14 = vpop.f32.mrf.mxu2 }
 0x135   : > { %v496_v18 = vpop.f32.mrf.mxu3 }
 0x136   : > { %v522_v19 = vpop.f32.mrf.mxu0  ;;  %v440_v20 = vpop.f32.mrf.mxu1 }
 0x137   : > { %v526_v21 = vadd.f32 %v522_v19, %v498_v16 }
 0x139   : > { %v533_v24 = vadd.f32 %v531_v17, %v526_v21 }
 0x13b   : > { %v536_v25 = vadd.f32 %v535_v22, %v533_v24 }
 0x13d   : > { %v537_v26 = vmax.f32 %v536_v25, 0.0 }
 0x13e   : > { %v524_v27 = vpop.f32.mrf.mxu0 }
 0x13f   : > { %v543_v28 = vsel %vm542_vm11, %v537_v26, 0.0 }
 0x140   : > { %v544_v29 = vpack.c.bf16 %v543_v28, %v543_v28 }
 0x142   : > { %545 = vst [vmem:[%s751_s9] sm:$0xf] %v544_v29 }
 0x143 PF: > { %s15_s18 = sadd.s32 1, %s687_s18  }
 0x144   : > { %p12_p4 = scmp.ge.s32.totalorder %s15_s18, 5  }
 0x146   :  { %14 = sbr.rel (!%p12_p4) target bundleno = 1 (0x1), region = 110 }
 0x14b   :  { %568 = vsyncmov [#allocation3] }
 0x14e   :  { %s569_s20 = vpop.sfrf %568 }
 0x14f   :  { %p657_p5 = scmp.ne.s32.totalorder %s569_s20, 0 }
 0x151   :  { %573 = shalt.err (%p657_p5)  }

// kernel: blender_forward.16
= control target key start
LH: loop header
LB: loop body
LE: loop exit
PB: predicated region body
PF: predicated region fallthrough
CT: control target
= control target key end

     0   :  { %s941_s18 = smov 0   ;;  %s1049_s0 = inlined_call_operand.vmem [shape: bf16[8,1792], index: 0, kind: input, shape index: {}, may-alias: {0,4}]   ;;  %s1050_s1 = inlined_call_operand.vmem [shape: bf16[9,8,8], index: 1, kind: input, shape index: {}]   ;;  %s1051_s2 = inlined_call_operand.vmem [shape: f32[8,1], index: 2, kind: input, shape index: {}]   ;;  %s1052_s3 = inlined_call_operand.vmem [shape: f32[1,1792], index: 3, kind: input, shape index: {}]   ;;  %s1053_s4 = inlined_call_operand.vmem [shape: bf16[8,1792], index: 4, kind: input, shape index: {}, may-alias: {0,4}]   ;;  %s1054_s5 = inlined_call_operand.vmem [shape: bf16[8,1792], index: 5, kind: output, shape index: {}]  }
   0x1 LB: > { %s824_s19 = sadd.s32 4294967295, %s900_s18   ;;  %p828_p0 = scmp.ge.s32.totalorder %s900_s18, 1  ;;  %s900_s18 = sphi %s941_s18, %s15_s18  }
   0x2   : > { %p184_p1 = scmp.lt.s32.totalorder %s900_s18, 6 }
   0x4   : > { %p185_p2 = pnand %p828_p0, %p184_p1 }
   0x5   : > { %s866_s20 = sshll.u32 (!%p185_p2), %s824_s19, 1  ;;  %s872_s21 = sshll.u32 (!%p185_p2), %s824_s19, 8 }
   0x6   : > { %188 = sbr.rel (%p185_p2) target bundleno = 355 (0x163), region = 36  ;;  %s867_s22 = sadd.s32 (!%p185_p2), 2, %s866_s20 }
   0x7   : > { %s873_s23 = sadd.s32 (!%p185_p2), 256, %s872_s21  ;;  %p219_p3 = scmp.lt.s32.totalorder (!%p185_p2), %s867_s22, 13 }
   0x8   : > { %s835_s24 = sadd.s32 (!%p185_p2), 4294967168, %s873_s23 }
   0x9   : > { %s244_s25 = sshra.s32 (!%p185_p2), %s835_s24, 7 }
   0xa   : > { %s836_s26 = sshll.u32 (!%p185_p2), %s244_s25, 2 }
   0xb   : > { %s1056_s22 = smov (!%p219_p3, %s867_s22), 13  ;;  %s247_s14 = scalar_lea.vmem %s1049_s0, %s836_s26 }
   0xc   : > { %s221_s29 = scalar_lea.vmem %s1052_s3, %s1056_s22  ;;  %s831_s30 = sshll.u32 %s1056_s22, 2  ;;  %v258_v0 = vld [vmem:[%s247_s14] sm:$0xff]  ;;  %v260_v1 = vld [vmem:[%s247_s14 + $0x8] sm:$0xff] }
   0xd   : > { %s959_s8 = scalar_lea.vmem %s1053_s4, %s831_s30  ;;  %s964_s11 = scalar_lea.vmem %s1054_s5, %s831_s30  ;;  %259 = vst [vmem:[#allocation2] sm:$0xff] %v258_v0 }
   0xe   : > { %261 = vst [vmem:[#allocation2 + $0x8] sm:$0xff] %v260_v1 }
   0xf   : > { %267 = vsyncadd [#allocation3], 256 }
  0x10   : > { %896 = dma.done.wait [#allocation3], 256 }
  0x11   : > { %897 = vsyncadd [#allocation3], 4294967040  ;;  %s902_s15 = smov 34   ;;  %s903_s16 = smov 35   ;;  %vm337_vm0 = vcmask 285696   ;;  %vm298_vm1 = vcmask 1043456  }
  0x12   : > { %s904_s17 = smov 33   ;;  %s905_s19 = smov 1   ;;  %v274_v21 = vld [vmem:[%s1050_s1] sm:$0xf]  ;;  %vm294_vm2 = vcmask 64512   ;;  %vm291_vm3 = vcmask 277504  }
  0x13   : > { %s906_s20 = smov 127   ;;  %s907_s21 = smov 95   ;;  %v837_v33 = vld [vmem:[%s1050_s1 + $0x4] sm:$0xf]  ;;  %vm383_vm4 = vcmask 269312   ;;  %vm431_vm5 = vcmask 7168  }
  0x14   : > { %v272_v3 = vld [vmem:[#allocation2] sm:$0xff]  ;;  %s908_s23 = smov 94   ;;  %s909_s24 = smov 93   ;;  %v842_v50 = vld [vmem:[%s1050_s1 + $0x8] sm:$0xf]  ;;  %vm534_vm6 = vcmask 1039360  }
  0x15   : > { %v273_v2 = vld [vmem:[#allocation2 + $0x8] sm:$0xff]   ;;  %v279_v5 = vunpack.c.l.b16 %v272_v3  ;;  %v280_v6 = vunpack.c.h.b16 %v272_v3  ;;  %vm582_vm7 = vcmask 777216   ;;  %v848_v1 = vld [vmem:[%s1050_s1 + $0x10] sm:$0xf]  ;;  %vm630_vm8 = vcmask 769024  }
  0x16   : > { %v281_v4 = vunpack.c.l.b16 %v273_v2  ;;  %v516_v10 = vld [vmem:[#allocation2 + $0x4] sm:$0xff]  ;;  %v524_v13 = vunpack.c.h.b16 %v273_v2  ;;  %v845_v51 = vld [vmem:[%s1050_s1 + $0xc] sm:$0xf]  ;;  %v851_v2 = vld [vmem:[%s1050_s1 + $0x14] sm:$0xf]  ;;  %vm678_vm9 = vcmask 760832  }
  0x17   : > { %v282_v8 = vpack.c.b16 %v279_v5, %v279_v5  ;;  %v283_v9 = vpack.c.b16 %v280_v6, %v280_v6  ;;  %v523_v11 = vunpack.c.h.b16 %v516_v10  ;;  %v522_v12 = vunpack.c.l.b16 %v516_v10 }
  0x18   : > { %v284_v7 = vpack.c.b16 %v281_v4, %v281_v4  ;;  %v527_v16 = vpack.c.b16 %v524_v13, %v524_v13  ;;  %v718_v4 = vld [vmem:[%s1051_s2] sm:$0xff] }
  0x19   : > { %285 = vrot.lane.b32.xlu0 %v282_v8, %s902_s15  ;;  %333 = vrot.lane.b32.xlu2 %v283_v9, %s903_s16  ;;  %v526_v14 = vpack.c.b16 %v523_v11, %v523_v11  ;;  %v525_v15 = vpack.c.b16 %v522_v12, %v522_v12 }
  0x1a   : > { %289 = vrot.lane.b32.xlu1 %v284_v7, %s902_s15 }
  0x1b   : > { %v483_v38 = vsel %vm298_vm1, %v525_v15, 0  ;;  %v486_v39 = vsel %vm298_vm1, %v526_v14, 0 }
  0x21   : > { %287 = vrot.lane.b32.xlu0 %v283_v9, %s902_s15  ;;  %335 = vrot.lane.b32.xlu2 %v284_v7, %s903_s16 }
  0x22   : > { %331 = vrot.lane.b32.xlu1 %v282_v8, %s903_s16 }
  0x29   : > { %377 = vrot.lane.b32.xlu0 %v282_v8, %s904_s17  ;;  %381 = vrot.lane.b32.xlu2 %v284_v7, %s904_s17 }
  0x2a   : > { %379 = vrot.lane.b32.xlu1 %v283_v9, %s904_s17 }
  0x31   : > { %425 = vrot.lane.b32.xlu0 %v282_v8, %s905_s19  ;;  %429 = vrot.lane.b32.xlu2 %v284_v7, %s905_s19  ;;  %v910_v7 = vmov 0  }
  0x32   : > { %427 = vrot.lane.b32.xlu1 %v283_v9, %s905_s19  ;;  %891 = vset.pattern.permute.xlu0 %v910_v7 }
  0x39   : > { %528 = vrot.lane.b32.xlu0 %v525_v15, %s906_s20  ;;  %532 = vrot.lane.b32.xlu2 %v527_v16, %s906_s20 }
  0x3a   : > { %530 = vrot.lane.b32.xlu1 %v526_v14, %s906_s20 }
  0x41   : > { %576 = vrot.lane.b32.xlu0 %v525_v15, %s907_s21  ;;  %580 = vrot.lane.b32.xlu2 %v527_v16, %s907_s21 }
  0x42   : > { %578 = vrot.lane.b32.xlu1 %v526_v14, %s907_s21 }
  0x49   : > { %624 = vrot.lane.b32.xlu0 %v525_v15, %s908_s23  ;;  %628 = vrot.lane.b32.xlu2 %v527_v16, %s908_s23 }
  0x4a   : > { %626 = vrot.lane.b32.xlu1 %v526_v14, %s908_s23 }
  0x51   : > { %672 = vrot.lane.b32.xlu0 %v525_v15, %s909_s24  ;;  %676 = vrot.lane.b32.xlu2 %v527_v16, %s909_s24 }
  0x52   : > { %674 = vrot.lane.b32.xlu1 %v526_v14, %s909_s24 }
  0x59   : > { %721 = vperm.xlu0 %891, %v718_v4  }
  0x73   : > { %v334_v17 = vpop.permute.xlu2 %333 }
  0x7b   : > { %v336_v18 = vpop.permute.xlu2 %335 }
  0x7c   : > { %v339_v19 = vsel %vm337_vm0, %v334_v17, %v336_v18 }
  0x7d   : > { %v347_v20 = vsel %vm298_vm1, %v339_v19, 0  ;;  %v854_v19 = vld [vmem:[%s1050_s1 + $0x18] sm:$0xf] }
  0x7e   : > { %369 = vmatpush.bf16.msra.mxu3 %v347_v20  ;;  %v857_v20 = vld [vmem:[%s1050_s1 + $0x1c] sm:$0xf] }
  0x81   : > { %841 = vmatmul.msk.bf16.vlgmr.msra.gmra.mxu3 %vm294_vm2, %v274_v21 }
  0x83   : > { %v382_v24 = vpop.permute.xlu2 %381 }
  0x8b   : > { %v286_v23 = vpop.permute.xlu0 %285  ;;  %v430_v42 = vpop.permute.xlu2 %429 }
  0x8c   : > { %v290_v22 = vpop.permute.xlu1 %289 }
  0x93   : > { %v288_v26 = vpop.permute.xlu0 %287  ;;  %v533_v49 = vpop.permute.xlu2 %532 }
  0x94   : > { %v332_v25 = vpop.permute.xlu1 %331  ;;  %v292_v27 = vsel %vm291_vm3, %v286_v23, %v288_v26  ;;  %v293_v28 = vsel %vm291_vm3, %v288_v26, %v290_v22 }
  0x95   : > { %v338_v29 = vsel %vm337_vm0, %v332_v25, %v334_v17  ;;  %v300_v30 = vsel %vm298_vm1, %v292_v27, 0  ;;  %v303_v31 = vsel %vm298_vm1, %v293_v28, 0 }
  0x96   : > { %v344_v32 = vsel %vm298_vm1, %v338_v29, 0  ;;  %312 = vmatpush.bf16.msra.mxu0 %v300_v30  ;;  %325 = vmatpush.bf16.msra.mxu1 %v303_v31 }
  0x97   : > { %356 = vmatpush.bf16.msra.mxu2 %v344_v32 }
  0x99   : > { %838 = vmatmul.msk.bf16.vlgmr.msra.gmra.mxu0 %vm294_vm2, %v837_v33  ;;  %839 = vmatmul.msk.bf16.vlgmr.msra.gmra.mxu1 %vm294_vm2, %v837_v33 }
  0x9a   : > { %840 = vmatmul.msk.bf16.vlgmr.msra.gmra.mxu2 %vm294_vm2, %v274_v21  ;;  %v860_v21 = vld [vmem:[%s1050_s1 + $0x20] sm:$0xf] }
  0x9b   : > { %v378_v35 = vpop.permute.xlu0 %377  ;;  %v581_v58 = vpop.permute.xlu2 %580 }
  0x9c   : > { %v380_v34 = vpop.permute.xlu1 %379 }
  0x9d   : > { %v384_v36 = vsel %vm383_vm4, %v378_v35, %v380_v34  ;;  %v385_v37 = vsel %vm383_vm4, %v380_v34, %v382_v24 }
  0x9e   : > { %v390_v40 = vsel %vm298_vm1, %v384_v36, 0  ;;  %v393_v41 = vsel %vm298_vm1, %v385_v37, 0 }
  0x9f   : > { %402 = vmatpush.bf16.msrb.mxu0 %v390_v40  ;;  %415 = vmatpush.bf16.msrb.mxu1 %v393_v41 }
  0xa3   : > { %495 = vmatpush.bf16.msra.mxu0 %v483_v38  ;;  %508 = vmatpush.bf16.msra.mxu1 %v486_v39  ;;  %v426_v44 = vpop.permute.xlu0 %425  ;;  %v629_v3 = vpop.permute.xlu2 %628 }
  0xa4   : > { %v428_v43 = vpop.permute.xlu1 %427 }
  0xa5   : > { %v432_v45 = vsel %vm431_vm5, %v426_v44, %v428_v43  ;;  %v433_v46 = vsel %vm431_vm5, %v428_v43, %v430_v42 }
  0xa6   : > { %v438_v47 = vsel %vm298_vm1, %v432_v45, 0  ;;  %v441_v48 = vsel %vm298_vm1, %v433_v46, 0 }
  0xa7   : > { %450 = vmatpush.bf16.msrb.mxu2 %v438_v47  ;;  %463 = vmatpush.bf16.msrb.mxu3 %v441_v48 }
  0xa9   : > { %843 = vmatmul.msk.bf16.vlgmr.msrb.gmra.mxu0 %vm294_vm2, %v842_v50  ;;  %844 = vmatmul.msk.bf16.vlgmr.msrb.gmra.mxu1 %vm294_vm2, %v842_v50 }
  0xaa   : > { %846 = vmatmul.msk.bf16.vlgmr.msrb.gmra.mxu2 %vm294_vm2, %v845_v51  ;;  %847 = vmatmul.msk.bf16.vlgmr.msrb.gmra.mxu3 %vm294_vm2, %v845_v51 }
  0xab   : > { %v529_v53 = vpop.permute.xlu0 %528  ;;  %v677_v12 = vpop.permute.xlu2 %676 }
  0xac   : > { %v531_v52 = vpop.permute.xlu1 %530 }
  0xad   : > { %v536_v54 = vsel %vm534_vm6, %v531_v52, %v533_v49  ;;  %v535_v55 = vsel %vm534_vm6, %v529_v53, %v531_v52 }
  0xae   : > { %v544_v56 = vsel %vm298_vm1, %v536_v54, 0  ;;  %v541_v57 = vsel %vm298_vm1, %v535_v55, 0 }
  0xaf   : > { %553 = vmatpush.bf16.msra.mxu2 %v541_v57  ;;  %566 = vmatpush.bf16.msra.mxu3 %v544_v56 }
  0xb3   : > { %v577_v60 = vpop.permute.xlu0 %576 }
  0xb4   : > { %v579_v59 = vpop.permute.xlu1 %578 }
  0xb5   : > { %v584_v61 = vsel %vm582_vm7, %v579_v59, %v581_v58  ;;  %v583_v62 = vsel %vm582_vm7, %v577_v60, %v579_v59  ;;  %v733_v58 = vld [vmem:[%s221_s29] sm:$0x3] }
  0xb6   : > { %v592_v63 = vsel %vm298_vm1, %v584_v61, 0  ;;  %v589_v0 = vsel %vm298_vm1, %v583_v62, 0  ;;  %vm734_vm10 = vcmp.gt.f32.partialorder %v733_v58, 0.5 }
  0xb7   : > { %601 = vmatpush.bf16.msrb.mxu0 %v589_v0  ;;  %614 = vmatpush.bf16.msrb.mxu1 %v592_v63 }
  0xb9   : > { %849 = vmatmul.msk.bf16.vlgmr.msra.gmra.mxu0 %vm294_vm2, %v848_v1  ;;  %850 = vmatmul.msk.bf16.vlgmr.msra.gmra.mxu1 %vm294_vm2, %v848_v1 }
  0xba   : > { %852 = vmatmul.msk.bf16.vlgmr.msra.gmra.mxu2 %vm294_vm2, %v851_v2  ;;  %853 = vmatmul.msk.bf16.vlgmr.msra.gmra.mxu3 %vm294_vm2, %v851_v2  ;;  %v735_v2 = vsel %vm734_vm10, 1, %v910_v7 }
  0xbb   : > { %v625_v6 = vpop.permute.xlu0 %624 }
  0xbc   : > { %v627_v5 = vpop.permute.xlu1 %626 }
  0xbd   : > { %v632_v8 = vsel %vm630_vm8, %v627_v5, %v629_v3  ;;  %v631_v9 = vsel %vm630_vm8, %v625_v6, %v627_v5 }
  0xbe   : > { %v640_v10 = vsel %vm298_vm1, %v632_v8, 0  ;;  %v637_v11 = vsel %vm298_vm1, %v631_v9, 0 }
  0xbf   : > { %649 = vmatpush.bf16.msrb.mxu2 %v637_v11  ;;  %662 = vmatpush.bf16.msrb.mxu3 %v640_v10  ;;  %v728_v10 = vld [vmem:[%s959_s8] sm:$0xff] }
  0xc3   : > { %v673_v14 = vpop.permute.xlu0 %672 }
  0xc4   : > { %v675_v13 = vpop.permute.xlu1 %674 }
  0xc5   : > { %v680_v15 = vsel %vm678_vm9, %v675_v13, %v677_v12  ;;  %v679_v16 = vsel %vm678_vm9, %v673_v14, %v675_v13  ;;  %v736_v13 = vperm.slane %v735_v2, 0  ;;  %v737_v14 = vperm.slane %v735_v2, 1 }
  0xc6   : > { %v688_v17 = vsel %vm298_vm1, %v680_v15, 0  ;;  %v685_v18 = vsel %vm298_vm1, %v679_v16, 0  ;;  %v729_v15 = vunpack.c.l.bf16 %v728_v10  ;;  %v730_v16 = vunpack.c.h.bf16 %v728_v10 }
  0xc7   : > { %697 = vmatpush.bf16.msra.mxu0 %v685_v18  ;;  %710 = vmatpush.bf16.msra.mxu1 %v688_v17  ;;  %vm738_vm11 = vcmp.eq.s32.totalorder %v736_v13, 1  ;;  %vm739_vm12 = vcmp.eq.s32.totalorder %v737_v14, 1 }
  0xc9   : > { %855 = vmatmul.msk.bf16.vlgmr.msrb.gmra.mxu0 %vm294_vm2, %v854_v19  ;;  %856 = vmatmul.msk.bf16.vlgmr.msrb.gmra.mxu1 %vm294_vm2, %v854_v19 }
  0xca   : > { %858 = vmatmul.msk.bf16.vlgmr.msrb.gmra.mxu2 %vm294_vm2, %v857_v20  ;;  %859 = vmatmul.msk.bf16.vlgmr.msrb.gmra.mxu3 %vm294_vm2, %v857_v20 }
  0xcb   : > { %v722_v1 = vpop.permute.xlu0 %721 }
  0xd9   : > { %861 = vmatmul.msk.bf16.vlgmr.msra.gmra.mxu0 %vm294_vm2, %v860_v21  ;;  %862 = vmatmul.msk.bf16.vlgmr.msra.gmra.mxu1 %vm294_vm2, %v860_v21 }
 0x104   : > { %v371_v22 = vpop.f32.mrf.mxu3 }
 0x10c   : > { %v373_v23 = vpop.f32.mrf.mxu3 }
 0x116   : > { %v314_v24 = vpop.f32.mrf.mxu0  ;;  %v327_v25 = vpop.f32.mrf.mxu1 }
 0x117   : > { %v372_v48 = vadd.f32 %v371_v22, %v327_v25 }
 0x11d   : > { %v358_v26 = vpop.f32.mrf.mxu2 }
 0x11e   : > { %v316_v27 = vpop.f32.mrf.mxu0  ;;  %v329_v28 = vpop.f32.mrf.mxu1  ;;  %v359_v49 = vadd.f32 %v358_v26, %v314_v24 }
 0x125   : > { %v360_v29 = vpop.f32.mrf.mxu2 }
 0x126   : > { %v404_v30 = vpop.f32.mrf.mxu0  ;;  %v417_v31 = vpop.f32.mrf.mxu1 }
 0x127   : > { %v421_v50 = vadd.f32 %v404_v30, %v359_v49  ;;  %v422_v51 = vadd.f32 %v417_v31, %v372_v48 }
 0x12d   : > { %v452_v32 = vpop.f32.mrf.mxu2  ;;  %v465_v33 = vpop.f32.mrf.mxu3 }
 0x12e   : > { %v406_v34 = vpop.f32.mrf.mxu0  ;;  %v419_v35 = vpop.f32.mrf.mxu1  ;;  %v469_v52 = vadd.f32 %v452_v32, %v421_v50  ;;  %v470_v53 = vadd.f32 %v465_v33, %v422_v51 }
 0x135   : > { %v454_v36 = vpop.f32.mrf.mxu2  ;;  %v467_v37 = vpop.f32.mrf.mxu3 }
 0x136   : > { %v497_v38 = vpop.f32.mrf.mxu0  ;;  %v510_v39 = vpop.f32.mrf.mxu1 }
 0x137   : > { %v514_v59 = vadd.f32 %v497_v38, %v469_v52  ;;  %v515_v60 = vadd.f32 %v510_v39, %v470_v53 }
 0x13d   : > { %v555_v40 = vpop.f32.mrf.mxu2  ;;  %v568_v41 = vpop.f32.mrf.mxu3 }
 0x13e   : > { %v499_v42 = vpop.f32.mrf.mxu0  ;;  %v512_v43 = vpop.f32.mrf.mxu1  ;;  %v572_v61 = vadd.f32 %v555_v40, %v514_v59  ;;  %v573_v62 = vadd.f32 %v568_v41, %v515_v60 }
 0x145   : > { %v557_v44 = vpop.f32.mrf.mxu2  ;;  %v570_v45 = vpop.f32.mrf.mxu3 }
 0x146   : > { %v603_v46 = vpop.f32.mrf.mxu0  ;;  %v616_v47 = vpop.f32.mrf.mxu1 }
 0x147   : > { %v620_v63 = vadd.f32 %v603_v46, %v572_v61  ;;  %v621_v0 = vadd.f32 %v616_v47, %v573_v62 }
 0x14d   : > { %v651_v54 = vpop.f32.mrf.mxu2  ;;  %v664_v55 = vpop.f32.mrf.mxu3 }
 0x14e   : > { %v605_v56 = vpop.f32.mrf.mxu0  ;;  %v618_v57 = vpop.f32.mrf.mxu1  ;;  %v668_v3 = vadd.f32 %v651_v54, %v620_v63  ;;  %v669_v4 = vadd.f32 %v664_v55, %v621_v0 }
 0x155   : > { %v653_v5 = vpop.f32.mrf.mxu2  ;;  %v666_v6 = vpop.f32.mrf.mxu3 }
 0x156   : > { %v699_v8 = vpop.f32.mrf.mxu0  ;;  %v712_v9 = vpop.f32.mrf.mxu1 }
 0x157   : > { %v716_v11 = vadd.f32 %v699_v8, %v668_v3  ;;  %v717_v12 = vadd.f32 %v712_v9, %v669_v4 }
 0x159   : > { %v724_v17 = vadd.f32 %v722_v1, %v716_v11  ;;  %v725_v18 = vadd.f32 %v722_v1, %v717_v12 }
 0x15b   : > { %v726_v19 = vmax.f32 %v724_v17, 0.0  ;;  %v727_v20 = vmax.f32 %v725_v18, 0.0 }
 0x15d   : > { %v731_v7 = vadd.f32 %v729_v15, %v726_v19  ;;  %v732_v21 = vadd.f32 %v730_v16, %v727_v20 }
 0x15e   : > { %v701_v22 = vpop.f32.mrf.mxu0  ;;  %v714_v23 = vpop.f32.mrf.mxu1 }
 0x15f   : > { %v740_v24 = vsel %vm738_vm11, %v731_v7, 0.0  ;;  %v741_v25 = vsel %vm739_vm12, %v732_v21, 0.0 }
 0x160   : > { %v742_v26 = vpack.c.bf16 %v741_v25, %v740_v24 }
 0x162   : > { %743 = vst [vmem:[%s964_s11] sm:$0xff] %v742_v26 }
 0x163 PF: > { %s15_s18 = sadd.s32 1, %s900_s18  }
 0x164   : > { %p12_p4 = scmp.ge.s32.totalorder %s15_s18, 7  }
 0x166   :  { %14 = sbr.rel (!%p12_p4) target bundleno = 1 (0x1), region = 101 }
 0x16b   :  { %769 = vsyncmov [#allocation3] }
 0x16e   :  { %s770_s22 = vpop.sfrf %769 }
 0x16f   :  { %p865_p5 = scmp.ne.s32.totalorder %s770_s22, 0 }
 0x171   :  { %774 = shalt.err (%p865_p5)  }

// kernel: blender_forward.17
= control target key start
LH: loop header
LB: loop body
LE: loop exit
PB: predicated region body
PF: predicated region fallthrough
CT: control target
= control target key end

     0   :  { %s867_s15 = smov 0   ;;  %s968_s0 = inlined_call_operand.vmem [shape: bf16[8,1792], index: 0, kind: input, shape index: {}]   ;;  %s969_s1 = inlined_call_operand.vmem [shape: bf16[9,3,8], index: 1, kind: input, shape index: {}]   ;;  %s970_s2 = inlined_call_operand.vmem [shape: f32[3,1], index: 2, kind: input, shape index: {}]   ;;  %s971_s3 = inlined_call_operand.vmem [shape: f32[1,1792], index: 3, kind: input, shape index: {}]   ;;  %s972_s4 = inlined_call_operand.vmem [shape: f32[3,1792], index: 4, kind: output, shape index: {}]  }
   0x1 LB: > { %s755_s16 = sadd.s32 4294967295, %s831_s15   ;;  %p759_p0 = scmp.ge.s32.totalorder %s831_s15, 1  ;;  %s831_s15 = sphi %s867_s15, %s14_s15  }
   0x2   : > { %p144_p1 = scmp.lt.s32.totalorder %s831_s15, 6 }
   0x4   : > { %p145_p2 = pnand %p759_p0, %p144_p1 }
   0x5   : > { %s795_s17 = sshll.u32 (!%p145_p2), %s755_s16, 1  ;;  %s799_s18 = sshll.u32 (!%p145_p2), %s755_s16, 8 }
   0x6   : > { %148 = sbr.rel (%p145_p2) target bundleno = 359 (0x167), region = 32  ;;  %s796_s19 = sadd.s32 (!%p145_p2), 2, %s795_s17 }
   0x7   : > { %s800_s20 = sadd.s32 (!%p145_p2), 256, %s799_s18  ;;  %p171_p3 = scmp.lt.s32.totalorder (!%p145_p2), %s796_s19, 13 }
   0x8   : > { %s764_s21 = sadd.s32 (!%p145_p2), 4294967168, %s800_s20 }
   0x9   : > { %s188_s22 = sshra.s32 (!%p145_p2), %s764_s21, 7 }
   0xa   : > { %s765_s23 = sshll.u32 (!%p145_p2), %s188_s22, 2 }
   0xb   : > { %s974_s19 = smov (!%p171_p3, %s796_s19), 13  ;;  %s191_s7 = scalar_lea.vmem %s968_s0, %s765_s23 }
   0xc   : > { %s173_s26 = scalar_lea.vmem %s971_s3, %s974_s19  ;;  %s762_s27 = sshll.u32 %s974_s19, 2  ;;  %v202_v0 = vld [vmem:[%s191_s7] sm:$0xff]  ;;  %v204_v1 = vld [vmem:[%s191_s7 + $0x8] sm:$0xff] }
   0xd   : > { %s885_s30 = scalar_lea.vmem %s972_s4, %s762_s27  ;;  %203 = vst [vmem:[#allocation2] sm:$0xff] %v202_v0 }
   0xe   : > { %205 = vst [vmem:[#allocation2 + $0x8] sm:$0xff] %v204_v1 }
   0xf   : > { %211 = vsyncadd [#allocation3], 256 }
  0x10   : > { %827 = dma.done.wait [#allocation3], 256 }
  0x11   : > { %828 = vsyncadd [#allocation3], 4294967040  ;;  %s833_s8 = smov 34   ;;  %s834_s9 = smov 35   ;;  %vm235_vm0 = vcmask 277504   ;;  %vm242_vm1 = vcmask 1043456  }
  0x12   : > { %s835_s10 = smov 33   ;;  %s836_s11 = smov 1   ;;  %v766_v23 = vld [vmem:[%s969_s1 + $0x2] sm:$0x3]  ;;  %vm238_vm2 = vcmask 64512   ;;  %vm281_vm3 = vcmask 285696  }
  0x13   : > { %s837_s12 = smov 127   ;;  %s838_s13 = smov 95   ;;  %v218_v33 = vld [vmem:[%s969_s1] sm:$0x3]  ;;  %vm327_vm4 = vcmask 269312   ;;  %vm375_vm5 = vcmask 7168  }
  0x14   : > { %v216_v2 = vld [vmem:[#allocation2] sm:$0xff]  ;;  %s839_s14 = smov 94   ;;  %s840_s16 = smov 93   ;;  %vm478_vm6 = vcmask 1039360   ;;  %v777_v59 = vld [vmem:[%s969_s1 + $0x8] sm:$0x3] }
  0x15   : > { %v217_v3 = vld [vmem:[#allocation2 + $0x8] sm:$0xff]   ;;  %v224_v4 = vunpack.c.h.b16 %v216_v2  ;;  %v223_v5 = vunpack.c.l.b16 %v216_v2  ;;  %v771_v43 = vld [vmem:[%s969_s1 + $0x4] sm:$0x3]  ;;  %v774_v51 = vld [vmem:[%s969_s1 + $0x6] sm:$0x3]  ;;  %vm526_vm7 = vcmask 777216  }
  0x16   : > { %v225_v6 = vunpack.c.l.b16 %v217_v3  ;;  %v460_v10 = vld [vmem:[#allocation2 + $0x4] sm:$0xff]  ;;  %v468_v12 = vunpack.c.h.b16 %v217_v3  ;;  %vm574_vm8 = vcmask 769024   ;;  %vm622_vm9 = vcmask 760832  }
  0x17   : > { %v227_v7 = vpack.c.b16 %v224_v4, %v224_v4  ;;  %v226_v8 = vpack.c.b16 %v223_v5, %v223_v5  ;;  %v467_v11 = vunpack.c.h.b16 %v460_v10  ;;  %v466_v13 = vunpack.c.l.b16 %v460_v10  ;;  %v780_v2 = vld [vmem:[%s969_s1 + $0xa] sm:$0x3]  ;;  %v662_v4 = vld [vmem:[%s970_s2] sm:$0x7] }
  0x18   : > { %v228_v9 = vpack.c.b16 %v225_v6, %v225_v6  ;;  %v471_v15 = vpack.c.b16 %v468_v12, %v468_v12  ;;  %v841_v5 = vmov 0   ;;  %v783_v12 = vld [vmem:[%s969_s1 + $0xc] sm:$0x3] }
  0x19   : > { %231 = vrot.lane.b32.xlu0 %v227_v7, %s833_s8  ;;  %229 = vrot.lane.b32.xlu1 %v226_v8, %s833_s8  ;;  %v470_v14 = vpack.c.b16 %v467_v11, %v467_v11  ;;  %v469_v16 = vpack.c.b16 %v466_v13, %v466_v13 }
  0x1a   : > { %279 = vrot.lane.b32.xlu2 %v228_v9, %s834_s9  ;;  %818 = vset.pattern.permute.xlu0 %v841_v5 }
  0x1b   : > { %v427_v39 = vsel %vm242_vm1, %v469_v16, 0  ;;  %v430_v40 = vsel %vm242_vm1, %v470_v14, 0 }
  0x21   : > { %233 = vrot.lane.b32.xlu0 %v228_v9, %s833_s8  ;;  %277 = vrot.lane.b32.xlu1 %v227_v7, %s834_s9 }
  0x22   : > { %275 = vrot.lane.b32.xlu2 %v226_v8, %s834_s9 }
  0x29   : > { %323 = vrot.lane.b32.xlu0 %v227_v7, %s835_s10  ;;  %325 = vrot.lane.b32.xlu1 %v228_v9, %s835_s10 }
  0x2a   : > { %321 = vrot.lane.b32.xlu2 %v226_v8, %s835_s10 }
  0x31   : > { %371 = vrot.lane.b32.xlu0 %v227_v7, %s836_s11  ;;  %373 = vrot.lane.b32.xlu1 %v228_v9, %s836_s11 }
  0x32   : > { %369 = vrot.lane.b32.xlu2 %v226_v8, %s836_s11 }
  0x39   : > { %474 = vrot.lane.b32.xlu0 %v470_v14, %s837_s12  ;;  %476 = vrot.lane.b32.xlu1 %v471_v15, %s837_s12 }
  0x3a   : > { %472 = vrot.lane.b32.xlu2 %v469_v16, %s837_s12 }
  0x41   : > { %522 = vrot.lane.b32.xlu0 %v470_v14, %s838_s13  ;;  %524 = vrot.lane.b32.xlu1 %v471_v15, %s838_s13 }
  0x42   : > { %520 = vrot.lane.b32.xlu2 %v469_v16, %s838_s13 }
  0x49   : > { %570 = vrot.lane.b32.xlu0 %v470_v14, %s839_s14  ;;  %572 = vrot.lane.b32.xlu1 %v471_v15, %s839_s14 }
  0x4a   : > { %568 = vrot.lane.b32.xlu2 %v469_v16, %s839_s14 }
  0x51   : > { %618 = vrot.lane.b32.xlu0 %v470_v14, %s840_s16  ;;  %620 = vrot.lane.b32.xlu1 %v471_v15, %s840_s16 }
  0x52   : > { %616 = vrot.lane.b32.xlu2 %v469_v16, %s840_s16 }
  0x59   : > { %665 = vperm.xlu0 %818, %v662_v4   ;;  %v672_v4 = vld [vmem:[%s173_s26] sm:$0x3] }
  0x5a   : > { %vm673_vm10 = vcmp.gt.f32.partialorder %v672_v4, 0.5 }
  0x74   : > { %v280_v17 = vpop.permute.xlu2 %279 }
  0x7c   : > { %v276_v18 = vpop.permute.xlu2 %275 }
  0x84   : > { %v322_v24 = vpop.permute.xlu2 %321 }
  0x8b   : > { %v232_v19 = vpop.permute.xlu0 %231  ;;  %v230_v20 = vpop.permute.xlu1 %229 }
  0x8c   : > { %v236_v21 = vsel %vm235_vm0, %v230_v20, %v232_v19  ;;  %v370_v34 = vpop.permute.xlu2 %369  ;;  %v786_v20 = vld [vmem:[%s969_s1 + $0xe] sm:$0x3] }
  0x8d   : > { %v244_v22 = vsel %vm242_vm1, %v236_v21, 0  ;;  %v789_v21 = vld [vmem:[%s969_s1 + $0x10] sm:$0x3] }
  0x8e   : > { %256 = vmatpush.bf16.msra.mxu0 %v244_v22 }
  0x91   : > { %767 = vmatmul.msk.bf16.vlgmr.msra.gmra.mxu0 %vm238_vm2, %v766_v23 }
  0x93   : > { %v234_v25 = vpop.permute.xlu0 %233  ;;  %v278_v26 = vpop.permute.xlu1 %277 }
  0x94   : > { %v237_v27 = vsel %vm235_vm0, %v232_v19, %v234_v25  ;;  %v282_v28 = vsel %vm281_vm3, %v276_v18, %v278_v26  ;;  %v283_v29 = vsel %vm281_vm3, %v278_v26, %v280_v17  ;;  %v473_v44 = vpop.permute.xlu2 %472 }
  0x95   : > { %v247_v30 = vsel %vm242_vm1, %v237_v27, 0  ;;  %v288_v31 = vsel %vm242_vm1, %v282_v28, 0  ;;  %v291_v32 = vsel %vm242_vm1, %v283_v29, 0 }
  0x96   : > { %269 = vmatpush.bf16.msra.mxu1 %v247_v30  ;;  %300 = vmatpush.bf16.msra.mxu2 %v288_v31 }
  0x97   : > { %313 = vmatpush.bf16.msra.mxu3 %v291_v32 }
  0x99   : > { %768 = vmatmul.msk.bf16.vlgmr.msra.gmra.mxu1 %vm238_vm2, %v766_v23  ;;  %769 = vmatmul.msk.bf16.vlgmr.msra.gmra.mxu2 %vm238_vm2, %v218_v33 }
  0x9a   : > { %770 = vmatmul.msk.bf16.vlgmr.msra.gmra.mxu3 %vm238_vm2, %v218_v33 }
  0x9b   : > { %v324_v35 = vpop.permute.xlu0 %323  ;;  %v326_v36 = vpop.permute.xlu1 %325 }
  0x9c   : > { %v328_v37 = vsel %vm327_vm4, %v322_v24, %v324_v35  ;;  %v329_v38 = vsel %vm327_vm4, %v324_v35, %v326_v36  ;;  %v521_v58 = vpop.permute.xlu2 %520 }
  0x9d   : > { %v334_v41 = vsel %vm242_vm1, %v328_v37, 0  ;;  %v337_v42 = vsel %vm242_vm1, %v329_v38, 0 }
  0x9e   : > { %346 = vmatpush.bf16.msrb.mxu0 %v334_v41  ;;  %359 = vmatpush.bf16.msrb.mxu1 %v337_v42 }
  0xa1   : > { %772 = vmatmul.msk.bf16.vlgmr.msrb.gmra.mxu0 %vm238_vm2, %v771_v43 }
  0xa2   : > { %439 = vmatpush.bf16.msra.mxu0 %v427_v39  ;;  %452 = vmatpush.bf16.msra.mxu1 %v430_v40 }
  0xa3   : > { %v372_v45 = vpop.permute.xlu0 %371  ;;  %v374_v46 = vpop.permute.xlu1 %373 }
  0xa4   : > { %v376_v47 = vsel %vm375_vm5, %v370_v34, %v372_v45  ;;  %v377_v48 = vsel %vm375_vm5, %v372_v45, %v374_v46  ;;  %v569_v3 = vpop.permute.xlu2 %568 }
  0xa5   : > { %v382_v49 = vsel %vm242_vm1, %v376_v47, 0  ;;  %v385_v50 = vsel %vm242_vm1, %v377_v48, 0 }
  0xa6   : > { %394 = vmatpush.bf16.msrb.mxu2 %v382_v49  ;;  %407 = vmatpush.bf16.msrb.mxu3 %v385_v50 }
  0xa9   : > { %773 = vmatmul.msk.bf16.vlgmr.msrb.gmra.mxu1 %vm238_vm2, %v771_v43  ;;  %775 = vmatmul.msk.bf16.vlgmr.msrb.gmra.mxu2 %vm238_vm2, %v774_v51 }
  0xaa   : > { %776 = vmatmul.msk.bf16.vlgmr.msrb.gmra.mxu3 %vm238_vm2, %v774_v51 }
  0xab   : > { %v475_v52 = vpop.permute.xlu0 %474  ;;  %v477_v53 = vpop.permute.xlu1 %476 }
  0xac   : > { %v479_v54 = vsel %vm478_vm6, %v473_v44, %v475_v52  ;;  %v480_v55 = vsel %vm478_vm6, %v475_v52, %v477_v53  ;;  %v617_v13 = vpop.permute.xlu2 %616 }
  0xad   : > { %v485_v56 = vsel %vm242_vm1, %v479_v54, 0  ;;  %v488_v57 = vsel %vm242_vm1, %v480_v55, 0 }
  0xae   : > { %497 = vmatpush.bf16.msra.mxu2 %v485_v56  ;;  %510 = vmatpush.bf16.msra.mxu3 %v488_v57 }
  0xb1   : > { %778 = vmatmul.msk.bf16.vlgmr.msra.gmra.mxu0 %vm238_vm2, %v777_v59 }
  0xb3   : > { %v523_v60 = vpop.permute.xlu0 %522  ;;  %v525_v61 = vpop.permute.xlu1 %524 }
  0xb4   : > { %v527_v62 = vsel %vm526_vm7, %v521_v58, %v523_v60  ;;  %v528_v63 = vsel %vm526_vm7, %v523_v60, %v525_v61 }
  0xb5   : > { %v533_v0 = vsel %vm242_vm1, %v527_v62, 0  ;;  %v536_v1 = vsel %vm242_vm1, %v528_v63, 0 }
  0xb6   : > { %545 = vmatpush.bf16.msrb.mxu0 %v533_v0  ;;  %558 = vmatpush.bf16.msrb.mxu1 %v536_v1 }
  0xb9   : > { %779 = vmatmul.msk.bf16.vlgmr.msra.gmra.mxu1 %vm238_vm2, %v777_v59  ;;  %781 = vmatmul.msk.bf16.vlgmr.msra.gmra.mxu2 %vm238_vm2, %v780_v2 }
  0xba   : > { %782 = vmatmul.msk.bf16.vlgmr.msra.gmra.mxu3 %vm238_vm2, %v780_v2 }
  0xbb   : > { %v571_v6 = vpop.permute.xlu0 %570  ;;  %v573_v7 = vpop.permute.xlu1 %572 }
  0xbc   : > { %v575_v8 = vsel %vm574_vm8, %v569_v3, %v571_v6  ;;  %v576_v9 = vsel %vm574_vm8, %v571_v6, %v573_v7 }
  0xbd   : > { %v581_v10 = vsel %vm242_vm1, %v575_v8, 0  ;;  %v584_v11 = vsel %vm242_vm1, %v576_v9, 0 }
  0xbe   : > { %593 = vmatpush.bf16.msrb.mxu2 %v581_v10  ;;  %606 = vmatpush.bf16.msrb.mxu3 %v584_v11 }
  0xc1   : > { %784 = vmatmul.msk.bf16.vlgmr.msrb.gmra.mxu0 %vm238_vm2, %v783_v12 }
  0xc3   : > { %v619_v14 = vpop.permute.xlu0 %618  ;;  %v621_v15 = vpop.permute.xlu1 %620 }
  0xc4   : > { %v623_v16 = vsel %vm622_vm9, %v617_v13, %v619_v14  ;;  %v624_v17 = vsel %vm622_vm9, %v619_v14, %v621_v15  ;;  %v674_v14 = vsel %vm673_vm10, 1, %v841_v5 }
  0xc5   : > { %v629_v18 = vsel %vm242_vm1, %v623_v16, 0  ;;  %v632_v19 = vsel %vm242_vm1, %v624_v17, 0  ;;  %v676_v15 = vperm.slane %v674_v14, 1  ;;  %v675_v16 = vperm.slane %v674_v14, 0 }
  0xc6   : > { %641 = vmatpush.bf16.msra.mxu0 %v629_v18  ;;  %654 = vmatpush.bf16.msra.mxu1 %v632_v19 }
  0xc7   : > { %vm678_vm11 = vcmp.eq.s32.totalorder %v676_v15, 1  ;;  %vm677_vm12 = vcmp.eq.s32.totalorder %v675_v16, 1 }
  0xc9   : > { %785 = vmatmul.msk.bf16.vlgmr.msrb.gmra.mxu1 %vm238_vm2, %v783_v12  ;;  %787 = vmatmul.msk.bf16.vlgmr.msrb.gmra.mxu2 %vm238_vm2, %v786_v20 }
  0xca   : > { %788 = vmatmul.msk.bf16.vlgmr.msrb.gmra.mxu3 %vm238_vm2, %v786_v20 }
  0xcb   : > { %v666_v3 = vpop.permute.xlu0 %665 }
  0xd1   : > { %790 = vmatmul.msk.bf16.vlgmr.msra.gmra.mxu0 %vm238_vm2, %v789_v21 }
  0xd9   : > { %791 = vmatmul.msk.bf16.vlgmr.msra.gmra.mxu1 %vm238_vm2, %v789_v21 }
 0x10e   : > { %v258_v22 = vpop.f32.mrf.mxu0 }
 0x116   : > { %v260_v23 = vpop.f32.mrf.mxu0  ;;  %v271_v24 = vpop.f32.mrf.mxu1 }
 0x11c   : > { %v302_v25 = vpop.f32.mrf.mxu2 }
 0x11d   : > { %v315_v26 = vpop.f32.mrf.mxu3  ;;  %v303_v41 = vadd.f32 %v302_v25, %v258_v22 }
 0x11e   : > { %v273_v27 = vpop.f32.mrf.mxu1  ;;  %v348_v28 = vpop.f32.mrf.mxu0  ;;  %v316_v54 = vadd.f32 %v315_v26, %v271_v24 }
 0x11f   : > { %v365_v46 = vadd.f32 %v348_v28, %v303_v41 }
 0x124   : > { %v304_v29 = vpop.f32.mrf.mxu2 }
 0x125   : > { %v317_v30 = vpop.f32.mrf.mxu3 }
 0x126   : > { %v350_v31 = vpop.f32.mrf.mxu0  ;;  %v361_v32 = vpop.f32.mrf.mxu1 }
 0x127   : > { %v366_v55 = vadd.f32 %v361_v32, %v316_v54 }
 0x12c   : > { %v396_v33 = vpop.f32.mrf.mxu2 }
 0x12d   : > { %v409_v34 = vpop.f32.mrf.mxu3  ;;  %v413_v47 = vadd.f32 %v396_v33, %v365_v46 }
 0x12e   : > { %v363_v35 = vpop.f32.mrf.mxu1  ;;  %v441_v36 = vpop.f32.mrf.mxu0  ;;  %v414_v58 = vadd.f32 %v409_v34, %v366_v55 }
 0x12f   : > { %v458_v50 = vadd.f32 %v441_v36, %v413_v47 }
 0x134   : > { %v398_v37 = vpop.f32.mrf.mxu2 }
 0x135   : > { %v411_v38 = vpop.f32.mrf.mxu3 }
 0x136   : > { %v443_v39 = vpop.f32.mrf.mxu0  ;;  %v454_v40 = vpop.f32.mrf.mxu1 }
 0x137   : > { %v459_v63 = vadd.f32 %v454_v40, %v414_v58 }
 0x13c   : > { %v499_v42 = vpop.f32.mrf.mxu2 }
 0x13d   : > { %v512_v43 = vpop.f32.mrf.mxu3  ;;  %v516_v53 = vadd.f32 %v499_v42, %v458_v50 }
 0x13e   : > { %v456_v44 = vpop.f32.mrf.mxu1  ;;  %v547_v45 = vpop.f32.mrf.mxu0  ;;  %v517_v0 = vadd.f32 %v512_v43, %v459_v63 }
 0x13f   : > { %v564_v56 = vadd.f32 %v547_v45, %v516_v53 }
 0x144   : > { %v501_v48 = vpop.f32.mrf.mxu2 }
 0x145   : > { %v514_v49 = vpop.f32.mrf.mxu3 }
 0x146   : > { %v549_v51 = vpop.f32.mrf.mxu0  ;;  %v560_v52 = vpop.f32.mrf.mxu1 }
 0x147   : > { %v565_v2 = vadd.f32 %v560_v52, %v517_v0 }
 0x14c   : > { %v595_v57 = vpop.f32.mrf.mxu2 }
 0x14d   : > { %v608_v59 = vpop.f32.mrf.mxu3  ;;  %v612_v60 = vadd.f32 %v595_v57, %v564_v56 }
 0x14e   : > { %v562_v61 = vpop.f32.mrf.mxu1  ;;  %v643_v62 = vpop.f32.mrf.mxu0  ;;  %v613_v7 = vadd.f32 %v608_v59, %v565_v2 }
 0x14f   : > { %v660_v1 = vadd.f32 %v643_v62, %v612_v60 }
 0x151   : > { %v668_v9 = vadd.f32 %v666_v3, %v660_v1 }
 0x153   : > { %819 = vtanh.f32 %v668_v9 }
 0x154   : > { %v597_v6 = vpop.f32.mrf.mxu2 }
 0x155   : > { %v610_v8 = vpop.f32.mrf.mxu3 }
 0x156   : > { %v656_v10 = vpop.f32.mrf.mxu1  ;;  %v645_v11 = vpop.f32.mrf.mxu0 }
 0x157   : > { %v661_v12 = vadd.f32 %v656_v10, %v613_v7 }
 0x159   : > { %v669_v13 = vadd.f32 %v666_v3, %v661_v12  ;;  %v820_v18 = vpop.eup %819 }
 0x15a   : > { %v679_v22 = vsel %vm677_vm12, %v820_v18, 0.0 }
 0x15b   : > { %821 = vtanh.f32 %v669_v13 }
 0x15e   : > { %v658_v17 = vpop.f32.mrf.mxu1 }
 0x161   : > { %v822_v19 = vpop.eup %821 }
 0x162   : > { %v680_v20 = vsel %vm678_vm11, %v822_v19, 0.0 }
 0x163   : > { %v683_v21 = vrot.slane %v680_v20, 4 }
 0x165   : > { %v684_v23 = vsel %vm242_vm1, %v679_v22, %v683_v21 }
 0x166   : > { %686 = vst [vmem:[%s885_s30] sm:$0x77] %v684_v23 }
 0x167 PF: > { %s14_s15 = sadd.s32 1, %s831_s15  }
 0x168   : > { %p11_p4 = scmp.ge.s32.totalorder %s14_s15, 7  }
 0x16a   :  { %13 = sbr.rel (!%p11_p4) target bundleno = 1 (0x1), region = 94 }
 0x16f   :  { %712 = vsyncmov [#allocation3] }
 0x172   :  { %s713_s19 = vpop.sfrf %712 }
 0x173   :  { %p794_p5 = scmp.ne.s32.totalorder %s713_s19, 0 }
 0x175   :  { %717 = shalt.err (%p794_p5)  }

</bundles_post_ra>
